<compile_context>
chip_gen: v6e
topology: v6e:2x2x1
jax: 0.10.0
libtpu: 0.0.40
codegen_flags: <defaults>
</compile_context>

<pallas_src>
import functools

import numpy as np
import jax
import jax.numpy as jnp
from jax.experimental import pallas as pl
from jax.experimental.pallas import tpu as pltpu


# ----------------------------------------------------------------------------
# Flat padded layout helpers.
# A padded (H+2, W+2) image is stored row-major on the lane axis (length Lp).
# A stride-1 conv output lives on a length L = H*(W+2) - 2 "output-flat" axis,
# where column q = y*(W+2) + x is output pixel (y, x), valid iff x < W.
# ----------------------------------------------------------------------------
def _flat_sizes(H, W):
    Wp = W + 2
    return Wp, (H + 2) * Wp, H * Wp - 2  # Wp, Lp, L


def build_input_pad_matrix(H, W):
    """(H*W) dense row-major pixels -> zero-padded flat layout (Lp)."""
    Wp, Lp, _ = _flat_sizes(H, W)
    M = np.zeros((H * W, Lp), np.float32)
    for y in range(H):
        for x in range(W):
            M[y * W + x, (y + 1) * Wp + (x + 1)] = 1.0
    return M


def build_pad_matrix(H, W):
    """conv-out flat (L) -> zero-padded flat layout (Lp), same resolution."""
    Wp, Lp, L = _flat_sizes(H, W)
    M = np.zeros((L, Lp), np.float32)
    for y in range(H):
        for x in range(W):
            M[y * Wp + x, (y + 1) * Wp + (x + 1)] = 1.0
    return M


def build_down_matrix(H, W):
    """stride-1 conv-out flat at (H,W) -> zero-padded flat layout at (H//2,W//2).
    Selecting even output rows/cols of the stride-1 conv == the stride-2 conv."""
    Wp, _, L = _flat_sizes(H, W)
    Ho, Wo = H // 2, W // 2
    Wpo, Lpo, _ = _flat_sizes(Ho, Wo)
    M = np.zeros((L, Lpo), np.float32)
    for yo in range(Ho):
        for xo in range(Wo):
            M[(2 * yo) * Wp + (2 * xo), (yo + 1) * Wpo + (xo + 1)] = 1.0
    return M


def build_upsample_matrix(H, W):
    """padded flat (H,W) -> padded flat (2H,2W), bilinear align_corners=False
    (exact PyTorch nn.Upsample(scale_factor=2, mode='bilinear') semantics)."""
    Wpi, Lpi, _ = _flat_sizes(H, W)
    Ho, Wo = 2 * H, 2 * W
    Wpo, Lpo, _ = _flat_sizes(Ho, Wo)

    def axis_weights(size_in, size_out):
        out = []
        for d in range(size_out):
            src = max((d + 0.5) / 2.0 - 0.5, 0.0)   # PyTorch clamps negative coords
            i0 = int(np.floor(src))
            lam = src - i0
            i0 = min(i0, size_in - 1)
            i1 = min(i0 + 1, size_in - 1)
            out.append(((i0, 1.0 - lam), (i1, lam)))
        return out

    rows = axis_weights(H, Ho)
    cols = axis_weights(W, Wo)
    M = np.zeros((Lpi, Lpo), np.float32)
    for y in range(Ho):
        for x in range(Wo):
            p_out = (y + 1) * Wpo + (x + 1)
            for iy, wy in rows[y]:
                for ix, wx in cols[x]:
                    M[(iy + 1) * Wpi + (ix + 1), p_out] += wy * wx
    return M


def build_select_matrix(H, W):
    """conv-out flat (L) -> dense row-major (H*W) valid pixels."""
    Wp, _, L = _flat_sizes(H, W)
    M = np.zeros((L, H * W), np.float32)
    for y in range(H):
        for x in range(W):
            M[y * Wp + x, y * W + x] = 1.0
    return M


# ----------------------------------------------------------------------------
# Network definition (mirrors PhysiqueMaskGenerator) + deterministic params.
# ----------------------------------------------------------------------------
def make_layer_params(key, cin, cout, with_bn):
    k1, k2, k3, k4, k5, k6 = jax.random.split(key, 6)
    w_oihw = jax.random.normal(k1, (cout, cin, 3, 3), jnp.float32) / jnp.sqrt(cin * 9.0)
    p = {
        "w_hwio": jnp.transpose(w_oihw, (2, 3, 1, 0)),  # OIHW -> HWIO
        "b": 0.01 * jax.random.normal(k2, (cout,), jnp.float32),
        "with_bn": with_bn,
    }
    if with_bn:
        p["gamma"] = 1.0 + 0.1 * jax.random.normal(k3, (cout,), jnp.float32)
        p["beta"] = 0.1 * jax.random.normal(k4, (cout,), jnp.float32)
        p["mean"] = 0.1 * jax.random.normal(k5, (cout,), jnp.float32)
        p["var"] = 1.0 + 0.1 * jax.random.uniform(k6, (cout,), jnp.float32)
    return p


def define_network(key, num_features, num_parts):
    """Layer list: (kind, cin, cout, resolution_level_of_the_conv)."""
    layers = [("conv", num_parts, num_features[0], 0)]
    for i in range(1, len(num_features)):
        layers.append(("conv", num_features[i - 1], num_features[i - 1], i - 1))
        layers.append(("down", num_features[i - 1], num_features[i], i - 1))
    for i in range(len(num_features) - 1, 0, -1):
        layers.append(("conv", num_features[i], num_features[i], i))
        layers.append(("up", num_features[i], num_features[i - 1], i - 1))
    layers.append(("final", num_features[0], 1, 0))
    keys = jax.random.split(key, len(layers))
    params = [make_layer_params(k, cin, cout, kind != "final")
              for k, (kind, cin, cout, _) in zip(keys, layers)]
    return layers, params


def fold_bn(p):
    cout = p["b"].shape[0]
    if p["with_bn"]:
        scale = p["gamma"] / jnp.sqrt(p["var"] + 1e-5)
        bias = p["beta"] + (p["b"] - p["mean"]) * scale
    else:
        scale = jnp.ones((cout,), jnp.float32)
        bias = p["b"]
    return scale, bias


def build_kernel_operands(layers, params, H, W):
    """Static per-layer plan (indices into `arrays`) + ordered matmul operands."""
    plan, arrays, cache = [], [], {}

    def add(key, builder):
        if key not in cache:
            cache[key] = len(arrays)
            arrays.append(jnp.asarray(builder()))
        return cache[key]

    for (kind, cin, cout, lvl), p in zip(layers, params):
        h, w = H >> lvl, W >> lvl
        entry = {"H": h, "W": w, "act": "sigmoid" if kind == "final" else "leaky"}
        if kind == "up":
            hi, wi = H >> (lvl + 1), W >> (lvl + 1)
            entry["up"] = add(("up", hi, wi),
                              lambda hi=hi, wi=wi: build_upsample_matrix(hi, wi))
        else:
            entry["up"] = None
        scale, bias = fold_bn(p)
        # (ky,kx,cin,cout) -> (cout, ky, kx, cin) -> (cout, 9*cin); BN scale folded.
        w2 = jnp.transpose(p["w_hwio"], (3, 0, 1, 2)).reshape(cout, 9 * cin)
        entry["w"] = len(arrays); arrays.append(w2 * scale[:, None])
        entry["b"] = len(arrays); arrays.append(bias.reshape(cout, 1))
        if kind == "down":
            entry["post"] = add(("down", h, w), lambda h=h, w=w: build_down_matrix(h, w))
        elif kind == "final":
            entry["post"] = add(("sel", h, w), lambda h=h, w=w: build_select_matrix(h, w))
        else:
            entry["post"] = add(("pad", h, w), lambda h=h, w=w: build_pad_matrix(h, w))
        plan.append(entry)
    return plan, arrays


# ----------------------------------------------------------------------------
# Fused Pallas kernel
# ----------------------------------------------------------------------------
def _conv3x3(a_pad, w, b, H, W, act):
    """3x3 stride-1 conv on a flat zero-padded activation.
    a_pad: (Cin, (H+2)*(W+2)), w: (Cout, 9*Cin) (BN folded), b: (Cout, 1).
    Returns (Cout, L), L = H*(W+2) - 2 (columns with x >= W are ignored later)."""
    Wp = W + 2
    L = H * Wp - 2
    cin = a_pad.shape[0]
    cout = w.shape[0]
    offsets = [dy * Wp + dx for dy in range(3) for dx in range(3)]
    if cin == 1:
        # Rank-1 taps: 9 VPU broadcast-FMAs beat a (Cout,1)x(1,L) MXU matmul.
        y = jnp.zeros((cout, L), jnp.float32)
        for t, o in enumerate(offsets):
            y = y + w[:, t:t + 1] * a_pad[:, o:o + L]
    else:
        # One lane-dense im2col matmul: K = 9*Cin, N = L on the lane axis.
        im2col = jnp.concatenate([a_pad[:, o:o + L] for o in offsets], axis=0)
        y = jnp.dot(w, im2col, preferred_element_type=jnp.float32)
    y = y + b
    if act == "leaky":
        return jnp.where(y >= 0.0, y, 0.01 * y)          # nn.LeakyReLU default slope
    return 1.0 / (1.0 + jnp.exp(-y))                     # sigmoid (EUP exp + recip)


def _fused_forward_kernel(*refs, plan):
    x_ref, pin_ref = refs[0], refs[1]
    o_ref = refs[-1]
    prm = refs[2:-1]
    f32 = jnp.float32
    # zero-pad the input in-kernel (constant 0/1 matmul -> padded flat layout)
    a = jnp.dot(x_ref[0].astype(f32), pin_ref[...], preferred_element_type=f32)
    for lay in plan:
        if lay["up"] is not None:
            # bilinear 2x upsample as one interpolation matmul (padded -> padded)
            a = jnp.dot(a, prm[lay["up"]][...], preferred_element_type=f32)
        y = _conv3x3(a, prm[lay["w"]][...], prm[lay["b"]][...],
                     lay["H"], lay["W"], lay["act"])
        # re-pad / stride-2 subsample / final valid-pixel select, all as matmuls
        a = jnp.dot(y, prm[lay["post"]][...], preferred_element_type=f32)
    o_ref[0] = a.astype(o_ref.dtype)


def physique_mask_forward(x_nchw, layers, params):
    """x_nchw: (N, num_parts, H, W) f32 -> (N, 1, H, W) mask (PyTorch layout)."""
    N, C, H, W = x_nchw.shape
    plan, arrays = build_kernel_operands(layers, params, H, W)
    pin = jnp.asarray(build_input_pad_matrix(H, W))
    x_flat = x_nchw.astype(jnp.float32).reshape(N, C, H * W)

    in_specs = [pl.BlockSpec((1, C, H * W), lambda n: (n, 0, 0)),
                pl.BlockSpec(pin.shape, lambda n: (0, 0))]
    in_specs += [pl.BlockSpec(a.shape, lambda n: (0, 0)) for a in arrays]

    out_flat = pl.pallas_call(
        functools.partial(_fused_forward_kernel, plan=plan),
        out_shape=jax.ShapeDtypeStruct((N, 1, H * W), jnp.float32),
        grid=(N,),
        in_specs=in_specs,
        out_specs=pl.BlockSpec((1, 1, H * W), lambda n: (n, 0, 0)),
        compiler_params=pltpu.CompilerParams(
            dimension_semantics=("parallel",)),
    )(x_flat, pin, *arrays)
    return out_flat.reshape(N, 1, H, W)


# ----------------------------------------------------------------------------
# Pure-JAX reference (XLA convs + explicit BN) mirroring the PyTorch module.
# ----------------------------------------------------------------------------
def _upsample2x_bilinear_ref(x_nhwc):
    N, H, W, C = x_nhwc.shape

    def axis_weights(size):
        dst = jnp.arange(2 * size, dtype=jnp.float32)
        src = jnp.maximum((dst + 0.5) / 2.0 - 0.5, 0.0)
        i0f = jnp.floor(src)
        lam = src - i0f
        i0 = jnp.minimum(i0f.astype(jnp.int32), size - 1)
        i1 = jnp.minimum(i0 + 1, size - 1)
        return i0, i1, lam

    r0, r1, rl = axis_weights(H)
    c0, c1, cl = axis_weights(W)
    xr = x_nhwc[:, r0] * (1.0 - rl)[None, :, None, None] \
        + x_nhwc[:, r1] * rl[None, :, None, None]
    return xr[:, :, c0] * (1.0 - cl)[None, None, :, None] \
        + xr[:, :, c1] * cl[None, None, :, None]


def reference_forward(x_nchw, layers, params):
    x = jnp.transpose(x_nchw, (0, 2, 3, 1))  # NHWC
    for (kind, _, _, _), p in zip(layers, params):
        if kind == "up":
            x = _upsample2x_bilinear_ref(x)
        stride = 2 if kind == "down" else 1
        y = jax.lax.conv_general_dilated(
            x, p["w_hwio"], (stride, stride), ((1, 1), (1, 1)),
            dimension_numbers=("NHWC", "HWIO", "NHWC"),
            precision=jax.lax.Precision.HIGHEST) + p["b"]
        if kind == "final":
            y = jax.nn.sigmoid(y)
        else:
            y = (y - p["mean"]) / jnp.sqrt(p["var"] + 1e-5) * p["gamma"] + p["beta"]
            y = jnp.where(y >= 0.0, y, 0.01 * y)
        x = y
    return jnp.transpose(x, (0, 3, 1, 2))  # back to NCHW


if __name__ == "__main__":
    key = jax.random.PRNGKey(0)
    k_in, k_params = jax.random.split(key)

    num_features = [8, 16]
    num_parts = 1
    N, H, W = 2, 16, 16

    # PyTorch-convention NCHW input.
    x = jax.random.normal(k_in, (N, num_parts, H, W), jnp.float32)
    layers, params = define_network(k_params, num_features, num_parts)

    out = jax.block_until_ready(physique_mask_forward(x, layers, params))
    ref = jax.block_until_ready(reference_forward(x, layers, params))

    assert out.shape == (N, 1, H, W)
    assert bool(jnp.all(jnp.isfinite(out)))
    assert bool(jnp.all((out >= 0.0) & (out <= 1.0)))
    assert float(jnp.max(jnp.abs(out - ref))) < 3e-2
    print("KERNEL_OK")
</pallas_src>

<mosaic_0001>
module attributes {stable_mosaic.version = 11 : i64} {
  func.func @_fused_forward_kernel(%arg0: i32, %arg1: memref<1x1x256xf32, #tpu.memory_space<vmem>>, %arg2: memref<256x324xf32, #tpu.memory_space<vmem>>, %arg3: memref<8x9xf32, #tpu.memory_space<vmem>>, %arg4: memref<8x1xf32, #tpu.memory_space<vmem>>, %arg5: memref<286x324xf32, #tpu.memory_space<vmem>>, %arg6: memref<8x72xf32, #tpu.memory_space<vmem>>, %arg7: memref<8x1xf32, #tpu.memory_space<vmem>>, %arg8: memref<16x72xf32, #tpu.memory_space<vmem>>, %arg9: memref<16x1xf32, #tpu.memory_space<vmem>>, %arg10: memref<286x100xf32, #tpu.memory_space<vmem>>, %arg11: memref<16x144xf32, #tpu.memory_space<vmem>>, %arg12: memref<16x1xf32, #tpu.memory_space<vmem>>, %arg13: memref<78x100xf32, #tpu.memory_space<vmem>>, %arg14: memref<100x324xf32, #tpu.memory_space<vmem>>, %arg15: memref<8x144xf32, #tpu.memory_space<vmem>>, %arg16: memref<8x1xf32, #tpu.memory_space<vmem>>, %arg17: memref<1x72xf32, #tpu.memory_space<vmem>>, %arg18: memref<1x1xf32, #tpu.memory_space<vmem>>, %arg19: memref<286x256xf32, #tpu.memory_space<vmem>>, %arg20: memref<1x1x256xf32, #tpu.memory_space<vmem>>) attributes {dimension_semantics = [#tpu.dimension_semantics<parallel>], iteration_bounds = array<i64: 2>, scalar_prefetch = 0 : i64, scratch_operands = 0 : i64, tpu.core_type = #tpu.core_type<tc>, window_params = [{transform_indices = @transform_0, window_bounds = array<i64: 1, 1, 256>}, {pipeline_mode = #tpu.pipeline_mode<synchronous>, transform_indices = @transform_1, window_bounds = array<i64: 256, 324>}, {pipeline_mode = #tpu.pipeline_mode<synchronous>, transform_indices = @transform_2, window_bounds = array<i64: 8, 9>}, {pipeline_mode = #tpu.pipeline_mode<synchronous>, transform_indices = @transform_3, window_bounds = array<i64: 8, 1>}, {pipeline_mode = #tpu.pipeline_mode<synchronous>, transform_indices = @transform_4, window_bounds = array<i64: 286, 324>}, {pipeline_mode = #tpu.pipeline_mode<synchronous>, transform_indices = @transform_5, window_bounds = array<i64: 8, 72>}, {pipeline_mode = #tpu.pipeline_mode<synchronous>, transform_indices = @transform_6, window_bounds = array<i64: 8, 1>}, {pipeline_mode = #tpu.pipeline_mode<synchronous>, transform_indices = @transform_7, window_bounds = array<i64: 16, 72>}, {pipeline_mode = #tpu.pipeline_mode<synchronous>, transform_indices = @transform_8, window_bounds = array<i64: 16, 1>}, {pipeline_mode = #tpu.pipeline_mode<synchronous>, transform_indices = @transform_9, window_bounds = array<i64: 286, 100>}, {pipeline_mode = #tpu.pipeline_mode<synchronous>, transform_indices = @transform_10, window_bounds = array<i64: 16, 144>}, {pipeline_mode = #tpu.pipeline_mode<synchronous>, transform_indices = @transform_11, window_bounds = array<i64: 16, 1>}, {pipeline_mode = #tpu.pipeline_mode<synchronous>, transform_indices = @transform_12, window_bounds = array<i64: 78, 100>}, {pipeline_mode = #tpu.pipeline_mode<synchronous>, transform_indices = @transform_13, window_bounds = array<i64: 100, 324>}, {pipeline_mode = #tpu.pipeline_mode<synchronous>, transform_indices = @transform_14, window_bounds = array<i64: 8, 144>}, {pipeline_mode = #tpu.pipeline_mode<synchronous>, transform_indices = @transform_15, window_bounds = array<i64: 8, 1>}, {pipeline_mode = #tpu.pipeline_mode<synchronous>, transform_indices = @transform_16, window_bounds = array<i64: 1, 72>}, {pipeline_mode = #tpu.pipeline_mode<synchronous>, transform_indices = @transform_17, window_bounds = array<i64: 1, 1>}, {pipeline_mode = #tpu.pipeline_mode<synchronous>, transform_indices = @transform_18, window_bounds = array<i64: 286, 256>}, {transform_indices = @transform_19, window_bounds = array<i64: 1, 1, 256>}]} {
    %c0 = arith.constant 0 : index
    %c0_0 = arith.constant 0 : index
    %c0_1 = arith.constant 0 : index
    %0 = vector.load %arg1[%c0, %c0_0, %c0_1] : memref<1x1x256xf32, #tpu.memory_space<vmem>>, vector<1x1x256xf32>
    %1 = vector.shape_cast %0 : vector<1x1x256xf32> to vector<1x256xf32>
    %c0_2 = arith.constant 0 : index
    %c0_3 = arith.constant 0 : index
    %2 = vector.load %arg2[%c0_2, %c0_3] : memref<256x324xf32, #tpu.memory_space<vmem>>, vector<256x324xf32>
    %cst = arith.constant dense<0.000000e+00> : vector<1x324xf32>
    %3 = tpu.matmul %1, %2, %cst {dimension_numbers = #tpu.dot_dimension_numbers<[1], [0], [0], [1], [0, 0, 1, 1], [], []>} : vector<1x256xf32>, vector<256x324xf32>, vector<1x324xf32> -> vector<1x324xf32>
    %c0_4 = arith.constant 0 : index
    %c0_5 = arith.constant 0 : index
    %4 = vector.load %arg3[%c0_4, %c0_5] : memref<8x9xf32, #tpu.memory_space<vmem>>, vector<8x9xf32>
    %c0_6 = arith.constant 0 : index
    %c0_7 = arith.constant 0 : index
    %5 = vector.load %arg4[%c0_6, %c0_7] : memref<8x1xf32, #tpu.memory_space<vmem>>, vector<8x1xf32>
    %cst_8 = arith.constant 0.000000e+00 : f32
    %6 = vector.broadcast %cst_8 : f32 to vector<8x286xf32>
    %7 = vector.extract_strided_slice %4 {offsets = [0, 0], sizes = [8, 1], strides = [1, 1]} : vector<8x9xf32> to vector<8x1xf32>
    %8 = vector.extract_strided_slice %3 {offsets = [0, 0], sizes = [1, 286], strides = [1, 1]} : vector<1x324xf32> to vector<1x286xf32>
    %9 = vector.broadcast %7 : vector<8x1xf32> to vector<8x286xf32>
    %10 = vector.broadcast %8 : vector<1x286xf32> to vector<8x286xf32>
    %11 = arith.mulf %9, %10 : vector<8x286xf32>
    %12 = arith.addf %6, %11 : vector<8x286xf32>
    %13 = vector.extract_strided_slice %4 {offsets = [0, 1], sizes = [8, 1], strides = [1, 1]} : vector<8x9xf32> to vector<8x1xf32>
    %14 = vector.extract_strided_slice %3 {offsets = [0, 1], sizes = [1, 286], strides = [1, 1]} : vector<1x324xf32> to vector<1x286xf32>
    %15 = vector.broadcast %13 : vector<8x1xf32> to vector<8x286xf32>
    %16 = vector.broadcast %14 : vector<1x286xf32> to vector<8x286xf32>
    %17 = arith.mulf %15, %16 : vector<8x286xf32>
    %18 = arith.addf %12, %17 : vector<8x286xf32>
    %19 = vector.extract_strided_slice %4 {offsets = [0, 2], sizes = [8, 1], strides = [1, 1]} : vector<8x9xf32> to vector<8x1xf32>
    %20 = vector.extract_strided_slice %3 {offsets = [0, 2], sizes = [1, 286], strides = [1, 1]} : vector<1x324xf32> to vector<1x286xf32>
    %21 = vector.broadcast %19 : vector<8x1xf32> to vector<8x286xf32>
    %22 = vector.broadcast %20 : vector<1x286xf32> to vector<8x286xf32>
    %23 = arith.mulf %21, %22 : vector<8x286xf32>
    %24 = arith.addf %18, %23 : vector<8x286xf32>
    %25 = vector.extract_strided_slice %4 {offsets = [0, 3], sizes = [8, 1], strides = [1, 1]} : vector<8x9xf32> to vector<8x1xf32>
    %26 = vector.extract_strided_slice %3 {offsets = [0, 18], sizes = [1, 286], strides = [1, 1]} : vector<1x324xf32> to vector<1x286xf32>
    %27 = vector.broadcast %25 : vector<8x1xf32> to vector<8x286xf32>
    %28 = vector.broadcast %26 : vector<1x286xf32> to vector<8x286xf32>
    %29 = arith.mulf %27, %28 : vector<8x286xf32>
    %30 = arith.addf %24, %29 : vector<8x286xf32>
    %31 = vector.extract_strided_slice %4 {offsets = [0, 4], sizes = [8, 1], strides = [1, 1]} : vector<8x9xf32> to vector<8x1xf32>
    %32 = vector.extract_strided_slice %3 {offsets = [0, 19], sizes = [1, 286], strides = [1, 1]} : vector<1x324xf32> to vector<1x286xf32>
    %33 = vector.broadcast %31 : vector<8x1xf32> to vector<8x286xf32>
    %34 = vector.broadcast %32 : vector<1x286xf32> to vector<8x286xf32>
    %35 = arith.mulf %33, %34 : vector<8x286xf32>
    %36 = arith.addf %30, %35 : vector<8x286xf32>
    %37 = vector.extract_strided_slice %4 {offsets = [0, 5], sizes = [8, 1], strides = [1, 1]} : vector<8x9xf32> to vector<8x1xf32>
    %38 = vector.extract_strided_slice %3 {offsets = [0, 20], sizes = [1, 286], strides = [1, 1]} : vector<1x324xf32> to vector<1x286xf32>
    %39 = vector.broadcast %37 : vector<8x1xf32> to vector<8x286xf32>
    %40 = vector.broadcast %38 : vector<1x286xf32> to vector<8x286xf32>
    %41 = arith.mulf %39, %40 : vector<8x286xf32>
    %42 = arith.addf %36, %41 : vector<8x286xf32>
    %43 = vector.extract_strided_slice %4 {offsets = [0, 6], sizes = [8, 1], strides = [1, 1]} : vector<8x9xf32> to vector<8x1xf32>
    %44 = vector.extract_strided_slice %3 {offsets = [0, 36], sizes = [1, 286], strides = [1, 1]} : vector<1x324xf32> to vector<1x286xf32>
    %45 = vector.broadcast %43 : vector<8x1xf32> to vector<8x286xf32>
    %46 = vector.broadcast %44 : vector<1x286xf32> to vector<8x286xf32>
    %47 = arith.mulf %45, %46 : vector<8x286xf32>
    %48 = arith.addf %42, %47 : vector<8x286xf32>
    %49 = vector.extract_strided_slice %4 {offsets = [0, 7], sizes = [8, 1], strides = [1, 1]} : vector<8x9xf32> to vector<8x1xf32>
    %50 = vector.extract_strided_slice %3 {offsets = [0, 37], sizes = [1, 286], strides = [1, 1]} : vector<1x324xf32> to vector<1x286xf32>
    %51 = vector.broadcast %49 : vector<8x1xf32> to vector<8x286xf32>
    %52 = vector.broadcast %50 : vector<1x286xf32> to vector<8x286xf32>
    %53 = arith.mulf %51, %52 : vector<8x286xf32>
    %54 = arith.addf %48, %53 : vector<8x286xf32>
    %55 = vector.extract_strided_slice %4 {offsets = [0, 8], sizes = [8, 1], strides = [1, 1]} : vector<8x9xf32> to vector<8x1xf32>
    %56 = vector.extract_strided_slice %3 {offsets = [0, 38], sizes = [1, 286], strides = [1, 1]} : vector<1x324xf32> to vector<1x286xf32>
    %57 = vector.broadcast %55 : vector<8x1xf32> to vector<8x286xf32>
    %58 = vector.broadcast %56 : vector<1x286xf32> to vector<8x286xf32>
    %59 = arith.mulf %57, %58 : vector<8x286xf32>
    %60 = arith.addf %54, %59 : vector<8x286xf32>
    %61 = vector.broadcast %5 : vector<8x1xf32> to vector<8x286xf32>
    %62 = arith.addf %60, %61 : vector<8x286xf32>
    %cst_9 = arith.constant 0.000000e+00 : f32
    %63 = vector.broadcast %cst_9 : f32 to vector<8x286xf32>
    %64 = arith.cmpf oge, %62, %63 : vector<8x286xf32>
    %cst_10 = arith.constant 0.00999999977 : f32
    %65 = vector.broadcast %cst_10 : f32 to vector<8x286xf32>
    %66 = arith.mulf %65, %62 : vector<8x286xf32>
    %67 = arith.select %64, %62, %66 : vector<8x286xi1>, vector<8x286xf32>
    %c0_11 = arith.constant 0 : index
    %c0_12 = arith.constant 0 : index
    %68 = vector.load %arg5[%c0_11, %c0_12] : memref<286x324xf32, #tpu.memory_space<vmem>>, vector<286x324xf32>
    %cst_13 = arith.constant dense<0.000000e+00> : vector<8x324xf32>
    %69 = tpu.matmul %67, %68, %cst_13 {dimension_numbers = #tpu.dot_dimension_numbers<[1], [0], [0], [1], [0, 0, 1, 1], [], []>} : vector<8x286xf32>, vector<286x324xf32>, vector<8x324xf32> -> vector<8x324xf32>
    %c0_14 = arith.constant 0 : index
    %c0_15 = arith.constant 0 : index
    %70 = vector.load %arg6[%c0_14, %c0_15] : memref<8x72xf32, #tpu.memory_space<vmem>>, vector<8x72xf32>
    %c0_16 = arith.constant 0 : index
    %c0_17 = arith.constant 0 : index
    %71 = vector.load %arg7[%c0_16, %c0_17] : memref<8x1xf32, #tpu.memory_space<vmem>>, vector<8x1xf32>
    %72 = vector.extract_strided_slice %69 {offsets = [0, 0], sizes = [8, 286], strides = [1, 1]} : vector<8x324xf32> to vector<8x286xf32>
    %73 = vector.extract_strided_slice %69 {offsets = [0, 1], sizes = [8, 286], strides = [1, 1]} : vector<8x324xf32> to vector<8x286xf32>
    %74 = vector.extract_strided_slice %69 {offsets = [0, 2], sizes = [8, 286], strides = [1, 1]} : vector<8x324xf32> to vector<8x286xf32>
    %75 = vector.extract_strided_slice %69 {offsets = [0, 18], sizes = [8, 286], strides = [1, 1]} : vector<8x324xf32> to vector<8x286xf32>
    %76 = vector.extract_strided_slice %69 {offsets = [0, 19], sizes = [8, 286], strides = [1, 1]} : vector<8x324xf32> to vector<8x286xf32>
    %77 = vector.extract_strided_slice %69 {offsets = [0, 20], sizes = [8, 286], strides = [1, 1]} : vector<8x324xf32> to vector<8x286xf32>
    %78 = vector.extract_strided_slice %69 {offsets = [0, 36], sizes = [8, 286], strides = [1, 1]} : vector<8x324xf32> to vector<8x286xf32>
    %79 = vector.extract_strided_slice %69 {offsets = [0, 37], sizes = [8, 286], strides = [1, 1]} : vector<8x324xf32> to vector<8x286xf32>
    %80 = vector.extract_strided_slice %69 {offsets = [0, 38], sizes = [8, 286], strides = [1, 1]} : vector<8x324xf32> to vector<8x286xf32>
    %81 = tpu.concatenate %72, %73, %74, %75, %76, %77, %78, %79, %80 in 0 : vector<8x286xf32>, vector<8x286xf32>, vector<8x286xf32>, vector<8x286xf32>, vector<8x286xf32>, vector<8x286xf32>, vector<8x286xf32>, vector<8x286xf32>, vector<8x286xf32> -> vector<72x286xf32>
    %cst_18 = arith.constant dense<0.000000e+00> : vector<8x286xf32>
    %82 = tpu.matmul %70, %81, %cst_18 {dimension_numbers = #tpu.dot_dimension_numbers<[1], [0], [0], [1], [0, 0, 1, 1], [], []>} : vector<8x72xf32>, vector<72x286xf32>, vector<8x286xf32> -> vector<8x286xf32>
    %83 = vector.broadcast %71 : vector<8x1xf32> to vector<8x286xf32>
    %84 = arith.addf %82, %83 : vector<8x286xf32>
    %cst_19 = arith.constant 0.000000e+00 : f32
    %85 = vector.broadcast %cst_19 : f32 to vector<8x286xf32>
    %86 = arith.cmpf oge, %84, %85 : vector<8x286xf32>
    %cst_20 = arith.constant 0.00999999977 : f32
    %87 = vector.broadcast %cst_20 : f32 to vector<8x286xf32>
    %88 = arith.mulf %87, %84 : vector<8x286xf32>
    %89 = arith.select %86, %84, %88 : vector<8x286xi1>, vector<8x286xf32>
    %c0_21 = arith.constant 0 : index
    %c0_22 = arith.constant 0 : index
    %90 = vector.load %arg5[%c0_21, %c0_22] : memref<286x324xf32, #tpu.memory_space<vmem>>, vector<286x324xf32>
    %cst_23 = arith.constant dense<0.000000e+00> : vector<8x324xf32>
    %91 = tpu.matmul %89, %90, %cst_23 {dimension_numbers = #tpu.dot_dimension_numbers<[1], [0], [0], [1], [0, 0, 1, 1], [], []>} : vector<8x286xf32>, vector<286x324xf32>, vector<8x324xf32> -> vector<8x324xf32>
    %c0_24 = arith.constant 0 : index
    %c0_25 = arith.constant 0 : index
    %92 = vector.load %arg8[%c0_24, %c0_25] : memref<16x72xf32, #tpu.memory_space<vmem>>, vector<16x72xf32>
    %c0_26 = arith.constant 0 : index
    %c0_27 = arith.constant 0 : index
    %93 = vector.load %arg9[%c0_26, %c0_27] : memref<16x1xf32, #tpu.memory_space<vmem>>, vector<16x1xf32>
    %94 = vector.extract_strided_slice %91 {offsets = [0, 0], sizes = [8, 286], strides = [1, 1]} : vector<8x324xf32> to vector<8x286xf32>
    %95 = vector.extract_strided_slice %91 {offsets = [0, 1], sizes = [8, 286], strides = [1, 1]} : vector<8x324xf32> to vector<8x286xf32>
    %96 = vector.extract_strided_slice %91 {offsets = [0, 2], sizes = [8, 286], strides = [1, 1]} : vector<8x324xf32> to vector<8x286xf32>
    %97 = vector.extract_strided_slice %91 {offsets = [0, 18], sizes = [8, 286], strides = [1, 1]} : vector<8x324xf32> to vector<8x286xf32>
    %98 = vector.extract_strided_slice %91 {offsets = [0, 19], sizes = [8, 286], strides = [1, 1]} : vector<8x324xf32> to vector<8x286xf32>
    %99 = vector.extract_strided_slice %91 {offsets = [0, 20], sizes = [8, 286], strides = [1, 1]} : vector<8x324xf32> to vector<8x286xf32>
    %100 = vector.extract_strided_slice %91 {offsets = [0, 36], sizes = [8, 286], strides = [1, 1]} : vector<8x324xf32> to vector<8x286xf32>
    %101 = vector.extract_strided_slice %91 {offsets = [0, 37], sizes = [8, 286], strides = [1, 1]} : vector<8x324xf32> to vector<8x286xf32>
    %102 = vector.extract_strided_slice %91 {offsets = [0, 38], sizes = [8, 286], strides = [1, 1]} : vector<8x324xf32> to vector<8x286xf32>
    %103 = tpu.concatenate %94, %95, %96, %97, %98, %99, %100, %101, %102 in 0 : vector<8x286xf32>, vector<8x286xf32>, vector<8x286xf32>, vector<8x286xf32>, vector<8x286xf32>, vector<8x286xf32>, vector<8x286xf32>, vector<8x286xf32>, vector<8x286xf32> -> vector<72x286xf32>
    %cst_28 = arith.constant dense<0.000000e+00> : vector<16x286xf32>
    %104 = tpu.matmul %92, %103, %cst_28 {dimension_numbers = #tpu.dot_dimension_numbers<[1], [0], [0], [1], [0, 0, 1, 1], [], []>} : vector<16x72xf32>, vector<72x286xf32>, vector<16x286xf32> -> vector<16x286xf32>
    %105 = vector.broadcast %93 : vector<16x1xf32> to vector<16x286xf32>
    %106 = arith.addf %104, %105 : vector<16x286xf32>
    %cst_29 = arith.constant 0.000000e+00 : f32
    %107 = vector.broadcast %cst_29 : f32 to vector<16x286xf32>
    %108 = arith.cmpf oge, %106, %107 : vector<16x286xf32>
    %cst_30 = arith.constant 0.00999999977 : f32
    %109 = vector.broadcast %cst_30 : f32 to vector<16x286xf32>
    %110 = arith.mulf %109, %106 : vector<16x286xf32>
    %111 = arith.select %108, %106, %110 : vector<16x286xi1>, vector<16x286xf32>
    %c0_31 = arith.constant 0 : index
    %c0_32 = arith.constant 0 : index
    %112 = vector.load %arg10[%c0_31, %c0_32] : memref<286x100xf32, #tpu.memory_space<vmem>>, vector<286x100xf32>
    %cst_33 = arith.constant dense<0.000000e+00> : vector<16x100xf32>
    %113 = tpu.matmul %111, %112, %cst_33 {dimension_numbers = #tpu.dot_dimension_numbers<[1], [0], [0], [1], [0, 0, 1, 1], [], []>} : vector<16x286xf32>, vector<286x100xf32>, vector<16x100xf32> -> vector<16x100xf32>
    %c0_34 = arith.constant 0 : index
    %c0_35 = arith.constant 0 : index
    %114 = vector.load %arg11[%c0_34, %c0_35] : memref<16x144xf32, #tpu.memory_space<vmem>>, vector<16x144xf32>
    %c0_36 = arith.constant 0 : index
    %c0_37 = arith.constant 0 : index
    %115 = vector.load %arg12[%c0_36, %c0_37] : memref<16x1xf32, #tpu.memory_space<vmem>>, vector<16x1xf32>
    %116 = vector.extract_strided_slice %113 {offsets = [0, 0], sizes = [16, 78], strides = [1, 1]} : vector<16x100xf32> to vector<16x78xf32>
    %117 = vector.extract_strided_slice %113 {offsets = [0, 1], sizes = [16, 78], strides = [1, 1]} : vector<16x100xf32> to vector<16x78xf32>
    %118 = vector.extract_strided_slice %113 {offsets = [0, 2], sizes = [16, 78], strides = [1, 1]} : vector<16x100xf32> to vector<16x78xf32>
    %119 = vector.extract_strided_slice %113 {offsets = [0, 10], sizes = [16, 78], strides = [1, 1]} : vector<16x100xf32> to vector<16x78xf32>
    %120 = vector.extract_strided_slice %113 {offsets = [0, 11], sizes = [16, 78], strides = [1, 1]} : vector<16x100xf32> to vector<16x78xf32>
    %121 = vector.extract_strided_slice %113 {offsets = [0, 12], sizes = [16, 78], strides = [1, 1]} : vector<16x100xf32> to vector<16x78xf32>
    %122 = vector.extract_strided_slice %113 {offsets = [0, 20], sizes = [16, 78], strides = [1, 1]} : vector<16x100xf32> to vector<16x78xf32>
    %123 = vector.extract_strided_slice %113 {offsets = [0, 21], sizes = [16, 78], strides = [1, 1]} : vector<16x100xf32> to vector<16x78xf32>
    %124 = vector.extract_strided_slice %113 {offsets = [0, 22], sizes = [16, 78], strides = [1, 1]} : vector<16x100xf32> to vector<16x78xf32>
    %125 = tpu.concatenate %116, %117, %118, %119, %120, %121, %122, %123, %124 in 0 : vector<16x78xf32>, vector<16x78xf32>, vector<16x78xf32>, vector<16x78xf32>, vector<16x78xf32>, vector<16x78xf32>, vector<16x78xf32>, vector<16x78xf32>, vector<16x78xf32> -> vector<144x78xf32>
    %cst_38 = arith.constant dense<0.000000e+00> : vector<16x78xf32>
    %126 = tpu.matmul %114, %125, %cst_38 {dimension_numbers = #tpu.dot_dimension_numbers<[1], [0], [0], [1], [0, 0, 1, 1], [], []>} : vector<16x144xf32>, vector<144x78xf32>, vector<16x78xf32> -> vector<16x78xf32>
    %127 = vector.broadcast %115 : vector<16x1xf32> to vector<16x78xf32>
    %128 = arith.addf %126, %127 : vector<16x78xf32>
    %cst_39 = arith.constant 0.000000e+00 : f32
    %129 = vector.broadcast %cst_39 : f32 to vector<16x78xf32>
    %130 = arith.cmpf oge, %128, %129 : vector<16x78xf32>
    %cst_40 = arith.constant 0.00999999977 : f32
    %131 = vector.broadcast %cst_40 : f32 to vector<16x78xf32>
    %132 = arith.mulf %131, %128 : vector<16x78xf32>
    %133 = arith.select %130, %128, %132 : vector<16x78xi1>, vector<16x78xf32>
    %c0_41 = arith.constant 0 : index
    %c0_42 = arith.constant 0 : index
    %134 = vector.load %arg13[%c0_41, %c0_42] : memref<78x100xf32, #tpu.memory_space<vmem>>, vector<78x100xf32>
    %cst_43 = arith.constant dense<0.000000e+00> : vector<16x100xf32>
    %135 = tpu.matmul %133, %134, %cst_43 {dimension_numbers = #tpu.dot_dimension_numbers<[1], [0], [0], [1], [0, 0, 1, 1], [], []>} : vector<16x78xf32>, vector<78x100xf32>, vector<16x100xf32> -> vector<16x100xf32>
    %c0_44 = arith.constant 0 : index
    %c0_45 = arith.constant 0 : index
    %136 = vector.load %arg14[%c0_44, %c0_45] : memref<100x324xf32, #tpu.memory_space<vmem>>, vector<100x324xf32>
    %cst_46 = arith.constant dense<0.000000e+00> : vector<16x324xf32>
    %137 = tpu.matmul %135, %136, %cst_46 {dimension_numbers = #tpu.dot_dimension_numbers<[1], [0], [0], [1], [0, 0, 1, 1], [], []>} : vector<16x100xf32>, vector<100x324xf32>, vector<16x324xf32> -> vector<16x324xf32>
    %c0_47 = arith.constant 0 : index
    %c0_48 = arith.constant 0 : index
    %138 = vector.load %arg15[%c0_47, %c0_48] : memref<8x144xf32, #tpu.memory_space<vmem>>, vector<8x144xf32>
    %c0_49 = arith.constant 0 : index
    %c0_50 = arith.constant 0 : index
    %139 = vector.load %arg16[%c0_49, %c0_50] : memref<8x1xf32, #tpu.memory_space<vmem>>, vector<8x1xf32>
    %140 = vector.extract_strided_slice %137 {offsets = [0, 0], sizes = [16, 286], strides = [1, 1]} : vector<16x324xf32> to vector<16x286xf32>
    %141 = vector.extract_strided_slice %137 {offsets = [0, 1], sizes = [16, 286], strides = [1, 1]} : vector<16x324xf32> to vector<16x286xf32>
    %142 = vector.extract_strided_slice %137 {offsets = [0, 2], sizes = [16, 286], strides = [1, 1]} : vector<16x324xf32> to vector<16x286xf32>
    %143 = vector.extract_strided_slice %137 {offsets = [0, 18], sizes = [16, 286], strides = [1, 1]} : vector<16x324xf32> to vector<16x286xf32>
    %144 = vector.extract_strided_slice %137 {offsets = [0, 19], sizes = [16, 286], strides = [1, 1]} : vector<16x324xf32> to vector<16x286xf32>
    %145 = vector.extract_strided_slice %137 {offsets = [0, 20], sizes = [16, 286], strides = [1, 1]} : vector<16x324xf32> to vector<16x286xf32>
    %146 = vector.extract_strided_slice %137 {offsets = [0, 36], sizes = [16, 286], strides = [1, 1]} : vector<16x324xf32> to vector<16x286xf32>
    %147 = vector.extract_strided_slice %137 {offsets = [0, 37], sizes = [16, 286], strides = [1, 1]} : vector<16x324xf32> to vector<16x286xf32>
    %148 = vector.extract_strided_slice %137 {offsets = [0, 38], sizes = [16, 286], strides = [1, 1]} : vector<16x324xf32> to vector<16x286xf32>
    %149 = tpu.concatenate %140, %141, %142, %143, %144, %145, %146, %147, %148 in 0 : vector<16x286xf32>, vector<16x286xf32>, vector<16x286xf32>, vector<16x286xf32>, vector<16x286xf32>, vector<16x286xf32>, vector<16x286xf32>, vector<16x286xf32>, vector<16x286xf32> -> vector<144x286xf32>
    %cst_51 = arith.constant dense<0.000000e+00> : vector<8x286xf32>
    %150 = tpu.matmul %138, %149, %cst_51 {dimension_numbers = #tpu.dot_dimension_numbers<[1], [0], [0], [1], [0, 0, 1, 1], [], []>} : vector<8x144xf32>, vector<144x286xf32>, vector<8x286xf32> -> vector<8x286xf32>
    %151 = vector.broadcast %139 : vector<8x1xf32> to vector<8x286xf32>
    %152 = arith.addf %150, %151 : vector<8x286xf32>
    %cst_52 = arith.constant 0.000000e+00 : f32
    %153 = vector.broadcast %cst_52 : f32 to vector<8x286xf32>
    %154 = arith.cmpf oge, %152, %153 : vector<8x286xf32>
    %cst_53 = arith.constant 0.00999999977 : f32
    %155 = vector.broadcast %cst_53 : f32 to vector<8x286xf32>
    %156 = arith.mulf %155, %152 : vector<8x286xf32>
    %157 = arith.select %154, %152, %156 : vector<8x286xi1>, vector<8x286xf32>
    %c0_54 = arith.constant 0 : index
    %c0_55 = arith.constant 0 : index
    %158 = vector.load %arg5[%c0_54, %c0_55] : memref<286x324xf32, #tpu.memory_space<vmem>>, vector<286x324xf32>
    %cst_56 = arith.constant dense<0.000000e+00> : vector<8x324xf32>
    %159 = tpu.matmul %157, %158, %cst_56 {dimension_numbers = #tpu.dot_dimension_numbers<[1], [0], [0], [1], [0, 0, 1, 1], [], []>} : vector<8x286xf32>, vector<286x324xf32>, vector<8x324xf32> -> vector<8x324xf32>
    %c0_57 = arith.constant 0 : index
    %c0_58 = arith.constant 0 : index
    %160 = vector.load %arg17[%c0_57, %c0_58] : memref<1x72xf32, #tpu.memory_space<vmem>>, vector<1x72xf32>
    %c0_59 = arith.constant 0 : index
    %c0_60 = arith.constant 0 : index
    %161 = vector.load %arg18[%c0_59, %c0_60] : memref<1x1xf32, #tpu.memory_space<vmem>>, vector<1x1xf32>
    %162 = vector.extract_strided_slice %159 {offsets = [0, 0], sizes = [8, 286], strides = [1, 1]} : vector<8x324xf32> to vector<8x286xf32>
    %163 = vector.extract_strided_slice %159 {offsets = [0, 1], sizes = [8, 286], strides = [1, 1]} : vector<8x324xf32> to vector<8x286xf32>
    %164 = vector.extract_strided_slice %159 {offsets = [0, 2], sizes = [8, 286], strides = [1, 1]} : vector<8x324xf32> to vector<8x286xf32>
    %165 = vector.extract_strided_slice %159 {offsets = [0, 18], sizes = [8, 286], strides = [1, 1]} : vector<8x324xf32> to vector<8x286xf32>
    %166 = vector.extract_strided_slice %159 {offsets = [0, 19], sizes = [8, 286], strides = [1, 1]} : vector<8x324xf32> to vector<8x286xf32>
    %167 = vector.extract_strided_slice %159 {offsets = [0, 20], sizes = [8, 286], strides = [1, 1]} : vector<8x324xf32> to vector<8x286xf32>
    %168 = vector.extract_strided_slice %159 {offsets = [0, 36], sizes = [8, 286], strides = [1, 1]} : vector<8x324xf32> to vector<8x286xf32>
    %169 = vector.extract_strided_slice %159 {offsets = [0, 37], sizes = [8, 286], strides = [1, 1]} : vector<8x324xf32> to vector<8x286xf32>
    %170 = vector.extract_strided_slice %159 {offsets = [0, 38], sizes = [8, 286], strides = [1, 1]} : vector<8x324xf32> to vector<8x286xf32>
    %171 = tpu.concatenate %162, %163, %164, %165, %166, %167, %168, %169, %170 in 0 : vector<8x286xf32>, vector<8x286xf32>, vector<8x286xf32>, vector<8x286xf32>, vector<8x286xf32>, vector<8x286xf32>, vector<8x286xf32>, vector<8x286xf32>, vector<8x286xf32> -> vector<72x286xf32>
    %cst_61 = arith.constant dense<0.000000e+00> : vector<1x286xf32>
    %172 = tpu.matmul %160, %171, %cst_61 {dimension_numbers = #tpu.dot_dimension_numbers<[1], [0], [0], [1], [0, 0, 1, 1], [], []>} : vector<1x72xf32>, vector<72x286xf32>, vector<1x286xf32> -> vector<1x286xf32>
    %173 = vector.broadcast %161 : vector<1x1xf32> to vector<1x286xf32>
    %174 = arith.addf %172, %173 : vector<1x286xf32>
    %cst_62 = arith.constant 0.000000e+00 : f32
    %175 = vector.broadcast %cst_62 : f32 to vector<1x286xf32>
    %176 = arith.subf %175, %174 : vector<1x286xf32>
    %177 = math.exp %176 : vector<1x286xf32>
    %cst_63 = arith.constant 1.000000e+00 : f32
    %178 = vector.broadcast %cst_63 : f32 to vector<1x286xf32>
    %179 = arith.addf %178, %177 : vector<1x286xf32>
    %cst_64 = arith.constant 1.000000e+00 : f32
    %180 = vector.broadcast %cst_64 : f32 to vector<1x286xf32>
    %181 = arith.divf %180, %179 : vector<1x286xf32>
    %c0_65 = arith.constant 0 : index
    %c0_66 = arith.constant 0 : index
    %182 = vector.load %arg19[%c0_65, %c0_66] : memref<286x256xf32, #tpu.memory_space<vmem>>, vector<286x256xf32>
    %cst_67 = arith.constant dense<0.000000e+00> : vector<1x256xf32>
    %183 = tpu.matmul %181, %182, %cst_67 {dimension_numbers = #tpu.dot_dimension_numbers<[1], [0], [0], [1], [0, 0, 1, 1], [], []>} : vector<1x286xf32>, vector<286x256xf32>, vector<1x256xf32> -> vector<1x256xf32>
    %c0_68 = arith.constant 0 : index
    %c0_69 = arith.constant 0 : index
    %c0_70 = arith.constant 0 : index
    %184 = vector.load %arg20[%c0_68, %c0_69, %c0_70] : memref<1x1x256xf32, #tpu.memory_space<vmem>>, vector<1x1x256xf32>
    %185 = vector.shape_cast %184 : vector<1x1x256xf32> to vector<1x256xf32>
    %186 = vector.shape_cast %183 : vector<1x256xf32> to vector<1x1x256xf32>
    tpu.vector_store %arg20[%c0_68, %c0_69, %c0_70], %186 {strides = array<i32>} : memref<1x1x256xf32, #tpu.memory_space<vmem>>, vector<1x1x256xf32>,
    return
  }
  func.func @transform_0(%arg0: i32) -> (i32, i32, i32) {
    %c0_i32 = arith.constant 0 : i32
    %c0_i32_0 = arith.constant 0 : i32
    %c0_i32_1 = arith.constant 0 : i32
    return %arg0, %c0_i32, %c0_i32_0 : i32, i32, i32
  }
  func.func @transform_1(%arg0: i32) -> (i32, i32) {
    %c0_i32 = arith.constant 0 : i32
    %c0_i32_0 = arith.constant 0 : i32
    %c0_i32_1 = arith.constant 0 : i32
    return %c0_i32, %c0_i32_0 : i32, i32
  }
  func.func @transform_2(%arg0: i32) -> (i32, i32) {
    %c0_i32 = arith.constant 0 : i32
    %c0_i32_0 = arith.constant 0 : i32
    %c0_i32_1 = arith.constant 0 : i32
    return %c0_i32, %c0_i32_0 : i32, i32
  }
  func.func @transform_3(%arg0: i32) -> (i32, i32) {
    %c0_i32 = arith.constant 0 : i32
    %c0_i32_0 = arith.constant 0 : i32
    %c0_i32_1 = arith.constant 0 : i32
    return %c0_i32, %c0_i32_0 : i32, i32
  }
  func.func @transform_4(%arg0: i32) -> (i32, i32) {
    %c0_i32 = arith.constant 0 : i32
    %c0_i32_0 = arith.constant 0 : i32
    %c0_i32_1 = arith.constant 0 : i32
    return %c0_i32, %c0_i32_0 : i32, i32
  }
  func.func @transform_5(%arg0: i32) -> (i32, i32) {
    %c0_i32 = arith.constant 0 : i32
    %c0_i32_0 = arith.constant 0 : i32
    %c0_i32_1 = arith.constant 0 : i32
    return %c0_i32, %c0_i32_0 : i32, i32
  }
  func.func @transform_6(%arg0: i32) -> (i32, i32) {
    %c0_i32 = arith.constant 0 : i32
    %c0_i32_0 = arith.constant 0 : i32
    %c0_i32_1 = arith.constant 0 : i32
    return %c0_i32, %c0_i32_0 : i32, i32
  }
  func.func @transform_7(%arg0: i32) -> (i32, i32) {
    %c0_i32 = arith.constant 0 : i32
    %c0_i32_0 = arith.constant 0 : i32
    %c0_i32_1 = arith.constant 0 : i32
    return %c0_i32, %c0_i32_0 : i32, i32
  }
  func.func @transform_8(%arg0: i32) -> (i32, i32) {
    %c0_i32 = arith.constant 0 : i32
    %c0_i32_0 = arith.constant 0 : i32
    %c0_i32_1 = arith.constant 0 : i32
    return %c0_i32, %c0_i32_0 : i32, i32
  }
  func.func @transform_9(%arg0: i32) -> (i32, i32) {
    %c0_i32 = arith.constant 0 : i32
    %c0_i32_0 = arith.constant 0 : i32
    %c0_i32_1 = arith.constant 0 : i32
    return %c0_i32, %c0_i32_0 : i32, i32
  }
  func.func @transform_10(%arg0: i32) -> (i32, i32) {
    %c0_i32 = arith.constant 0 : i32
    %c0_i32_0 = arith.constant 0 : i32
    %c0_i32_1 = arith.constant 0 : i32
    return %c0_i32, %c0_i32_0 : i32, i32
  }
  func.func @transform_11(%arg0: i32) -> (i32, i32) {
    %c0_i32 = arith.constant 0 : i32
    %c0_i32_0 = arith.constant 0 : i32
    %c0_i32_1 = arith.constant 0 : i32
    return %c0_i32, %c0_i32_0 : i32, i32
  }
  func.func @transform_12(%arg0: i32) -> (i32, i32) {
    %c0_i32 = arith.constant 0 : i32
    %c0_i32_0 = arith.constant 0 : i32
    %c0_i32_1 = arith.constant 0 : i32
    return %c0_i32, %c0_i32_0 : i32, i32
  }
  func.func @transform_13(%arg0: i32) -> (i32, i32) {
    %c0_i32 = arith.constant 0 : i32
    %c0_i32_0 = arith.constant 0 : i32
    %c0_i32_1 = arith.constant 0 : i32
    return %c0_i32, %c0_i32_0 : i32, i32
  }
  func.func @transform_14(%arg0: i32) -> (i32, i32) {
    %c0_i32 = arith.constant 0 : i32
    %c0_i32_0 = arith.constant 0 : i32
    %c0_i32_1 = arith.constant 0 : i32
    return %c0_i32, %c0_i32_0 : i32, i32
  }
  func.func @transform_15(%arg0: i32) -> (i32, i32) {
    %c0_i32 = arith.constant 0 : i32
    %c0_i32_0 = arith.constant 0 : i32
    %c0_i32_1 = arith.constant 0 : i32
    return %c0_i32, %c0_i32_0 : i32, i32
  }
  func.func @transform_16(%arg0: i32) -> (i32, i32) {
    %c0_i32 = arith.constant 0 : i32
    %c0_i32_0 = arith.constant 0 : i32
    %c0_i32_1 = arith.constant 0 : i32
    return %c0_i32, %c0_i32_0 : i32, i32
  }
  func.func @transform_17(%arg0: i32) -> (i32, i32) {
    %c0_i32 = arith.constant 0 : i32
    %c0_i32_0 = arith.constant 0 : i32
    %c0_i32_1 = arith.constant 0 : i32
    return %c0_i32, %c0_i32_0 : i32, i32
  }
  func.func @transform_18(%arg0: i32) -> (i32, i32) {
    %c0_i32 = arith.constant 0 : i32
    %c0_i32_0 = arith.constant 0 : i32
    %c0_i32_1 = arith.constant 0 : i32
    return %c0_i32, %c0_i32_0 : i32, i32
  }
  func.func @transform_19(%arg0: i32) -> (i32, i32, i32) {
    %c0_i32 = arith.constant 0 : i32
    %c0_i32_0 = arith.constant 0 : i32
    %c0_i32_1 = arith.constant 0 : i32
    return %arg0, %c0_i32, %c0_i32_0 : i32, i32, i32
  }
}

</mosaic_0001>

<bundles_post_ra>
// kernel: tpu_custom_call.1
= control target key start
LH: loop header
LB: loop body
LE: loop exit
PB: predicated region body
PF: predicated region fallthrough
CT: control target
= control target key end

     0   :  { %s7981_s0 = inlined_call_operand.vmem [shape: f32[2,1,256], index: 0, kind: input, shape index: {}]   ;;  %s7982_s1 = inlined_call_operand.vmem [shape: f32[256,324], index: 1, kind: input, shape index: {}]   ;;  %s7983_s2 = inlined_call_operand.hbm [shape: f32[8,9], index: 2, kind: input, shape index: {}]   ;;  %s7984_s3 = inlined_call_operand.vmem [shape: f32[8,1], index: 3, kind: input, shape index: {}]   ;;  %s7985_s4 = inlined_call_operand.vmem [shape: f32[286,324], index: 4, kind: input, shape index: {}]   ;;  %s7986_s5 = inlined_call_operand.hbm [shape: f32[8,72], index: 5, kind: input, shape index: {}]   ;;  %s7987_s6 = inlined_call_operand.vmem [shape: f32[8,1], index: 6, kind: input, shape index: {}]   ;;  %s7988_s7 = inlined_call_operand.vmem [shape: f32[16,72], index: 7, kind: input, shape index: {}]   ;;  %s7989_s8 = inlined_call_operand.vmem [shape: f32[16,1], index: 8, kind: input, shape index: {}]   ;;  %s7990_s9 = inlined_call_operand.hbm [shape: f32[286,100], index: 9, kind: input, shape index: {}]   ;;  %s7991_s10 = inlined_call_operand.vmem [shape: f32[16,144], index: 10, kind: input, shape index: {}]   ;;  %s7992_s11 = inlined_call_operand.vmem [shape: f32[16,1], index: 11, kind: input, shape index: {}]   ;;  %s7993_s12 = inlined_call_operand.hbm [shape: f32[78,100], index: 12, kind: input, shape index: {}]   ;;  %s7994_s13 = inlined_call_operand.hbm [shape: f32[100,324], index: 13, kind: input, shape index: {}]   ;;  %s7995_s14 = inlined_call_operand.vmem [shape: f32[8,144], index: 14, kind: input, shape index: {}]   ;;  %s7996_s15 = inlined_call_operand.vmem [shape: f32[8,1], index: 15, kind: input, shape index: {}]   ;;  %s7997_s16 = inlined_call_operand.hbm [shape: f32[1,72], index: 16, kind: input, shape index: {}]   ;;  %s7998_s17 = inlined_call_operand.<no memory space> [shape: f32[1,1], index: 17, kind: input, shape index: {}]   ;;  %s7999_s18 = inlined_call_operand.vmem [shape: f32[286,256], index: 18, kind: input, shape index: {}]   ;;  %s8000_s19 = inlined_call_operand.hbm [shape: f32[2,1,256], index: 19, kind: output, shape index: {}]  }
   0x1   :  { %8094 = sst [smem:[#allocation85_spill]] %s7981_s0  ;;  %v24_v0 = vstv %s7998_s17 }
   0x2   :  { %8095 = sst [smem:[#allocation86_spill]] %s7982_s1  ;;  %25 = vst [vmem:[#allocation2] sm:$0x1] %v24_v0 }
   0x3   :  { %8096 = sst [smem:[#allocation87_spill]] %s7983_s2 }
   0x4   :  { %8097 = sst [smem:[#allocation88_spill]] %s7984_s3 }
   0x5   :  { %8098 = sst [smem:[#allocation89_spill]] %s7986_s5 }
   0x6   :  { %8099 = sst [smem:[#allocation90_spill]] %s7987_s6 }
   0x7   :  { %8100 = sst [smem:[#allocation91_spill]] %s7988_s7 }
   0x8   :  { %8101 = sst [smem:[#allocation92_spill]] %s7989_s8 }
   0x9   :  { %8102 = sst [smem:[#allocation93_spill]] %s7990_s9 }
   0xa   :  { %8103 = sst [smem:[#allocation94_spill]] %s7991_s10 }
   0xb   :  { %8104 = sst [smem:[#allocation95_spill]] %s7992_s11 }
   0xc   :  { %26 = vsyncpa [#allocation4], 0 }
   0xd   :  { %27 = vsyncpa [#allocation7], 0 }
   0xe   :  { %28 = vsyncpa [#allocation10], 0 }
   0xf   :  { %29 = vsyncpa [#allocation13], 0 }
  0x10   :  { %30 = vsyncpa [#allocation5], 0 }
  0x11   :  { %32 = vsyncpa [#allocation5 + $0x1], 0  ;;  %s5440_s20 = smov 0   ;;  %s5442_s21 = smov 0  }
  0x12   :  { %s5444_s1 = smov 0   ;;  %s5446_s22 = smov 0  }
  0x13 LB: > { %8105 = sst [smem:[#allocation20_spill]] %s5287_s20  ;;  %s5461_s17 = sadd.s32 4294967295, %s5299_s22   ;;  %s5299_s22 = sphi %s5446_s22, %s8274_s22   ;;  %s5295_s1 = sphi %s5444_s1, %s8276_s1   ;;  %s5291_s21 = sphi %s5442_s21, %s8278_s21   ;;  %s5287_s20 = sphi %s5440_s20, %s8277_s20  }
  0x14   : > { %8106 = sst [smem:[#allocation21_spill]] %s5295_s1  ;;  %s4319_s2 = sadd.s32 4294967294, %s5299_s22  }
  0x15   : > { %s5465_s23 = sadd.s32 1, %s5299_s22   ;;  %s449_s24 = sadd.s32 1, %s5295_s1 }
  0x16   : > { %8107 = sst [smem:[#allocation22_spill]] %s5465_s23  ;;  %s446_s25 = ssub.s32 %s5299_s22, %s5465_s23 }
  0x17   : > { %p459_p0 = scmp.ne.s32.totalorder %s5295_s1, %s5291_s21  ;;  %p447_p1 = scmp.eq.s32.totalorder %s446_s25, 0 }
  0x18   : > { %p460_p2 = scmp.eq.s32.totalorder %s5461_s17, 1  ;;  %p465_p3 = scmp.ne.s32.totalorder %s5291_s21, %s5287_s20 }
  0x19   : > { %p466_p4 = scmp.eq.s32.totalorder %s4319_s2, 1  ;;  %p4320_p7 = scmp.ge.s32.totalorder %s5299_s22, 1 }
  0x1a   : > { %s5476_s3 = scalar_select %p447_p1, %s5295_s1, %s449_s24  }
  0x1b   : > { %p5478_p5 = por %p460_p2, %p459_p0  ;;  %p5482_p6 = por %p466_p4, %p465_p3 }
  0x1c   : > { %8108 = sst [smem:[#allocation23_spill]] %s5476_s3  ;;  %p473_p8 = scmp.lt.s32.totalorder %s5299_s22, 3 }
  0x1d   : > { %s8109_s26 = scalar_select %p5478_p5, 1, 0 }
  0x1e   : > { %s8110_s27 = scalar_select %p5482_p6, 1, 0 }
  0x1f   : > { %p8005_p9 = scmp.eq.s32.totalorder %s5461_s17, 0  ;;  %p5489_p10 = pnand %p4320_p7, %p473_p8 }
  0x20   : > { %8111 = sst [smem:[#allocation24_spill]] %s8110_s27  ;;  %s5301_s29 = smov [#allocation6]  }
  0x21   : > { %s8112_s28 = scalar_select %p5489_p10, 1, 0 }
  0x22   : > { %s506_s0 = sshll.u32 %s5301_s29, 4  ;;  %p4828_p11 = pneg %p5489_p10  ;;  %s507_s0 = int_to_ptr.vmem [resolvable:$true] %s506_s0 }
  0x23   : > { %s5302_s2 = smov [#allocation9]   ;;  %s5303_s25 = smov [#allocation3]  }
  0x24   : > { %p5497_p12 = pnand %p8005_p9, %p4828_p11  ;;  %s544_s24 = sshll.u32 %s5302_s2, 4  ;;  %s545_s24 = int_to_ptr.vmem [resolvable:$true] %s544_s24 }
  0x25   : > { %s489_s3 = sshll.u32 %s5303_s25, 4  ;;  %s5078_s29 = scalar_lea.vmem %s507_s0, 128  ;;  %s490_s3 = int_to_ptr.vmem [resolvable:$true] %s489_s3 }
  0x26   : > { %p5503_p13 = pneg %p5497_p12  ;;  %p5079_p0 = scmp.ne.s32.totalorder %s507_s0, %s5078_s29 }
  0x27   : > { %p5086_p3 = scmp.lt.s32.totalorder %s507_s0, %s507_s0  ;;  %p5087_p4 = scmp.lt.s32.totalorder %s5078_s29, %s5078_s29 }
  0x28   : > { %p5081_p1 = pnand %p5079_p0, %p5503_p13 }
  0x29   : > { %p5088_p7 = por %p5087_p4, %p5086_p3 }
  0x2a   : > { %p5082_p2 = pneg %p5081_p1 }
  0x2c   : > { %p5089_p8 = pnand %p5088_p7, %p5082_p2 }
  0x2e   : > { %5092 = shalt.err (!%p5089_p8)
}
  0x2f   : > { %s8115_s5 = sld [smem:[#allocation89_spill]]  ;;  %s5104_s23 = scalar_lea.vmem %s545_s24, 1280 }
  0x30   : > { %p5105_p11 = scmp.ne.s32.totalorder %s545_s24, %s5104_s23  ;;  %p5112_p5 = scmp.lt.s32.totalorder %s545_s24, %s545_s24 }
  0x31   : > { %p5113_p0 = scmp.lt.s32.totalorder %s5104_s23, %s5104_s23 }
  0x32   : > { %p5107_p9 = pnand %p5105_p11, %p5503_p13 }
  0x33   : > { %p5114_p1 = por %p5113_p0, %p5112_p5 }
  0x34   : > { %p5108_p6 = pneg %p5107_p9 }
  0x35   : > { %4834 = dma.hbm_to_vmem [thread:$0]  (!%p5497_p12), %s8115_s5, 128, %s507_s0, [#allocation7]  }
  0x36   : > { %p5115_p10 = pnand %p5114_p1, %p5108_p6 }
  0x38   : > { %5118 = shalt.err (!%p5115_p10)
}
  0x39   : > { %s8010_s29 = smov 128   ;;  %s8011_s27 = smov 8  }
  0x3a   : > { %4840 = dma.hbm_to_vmem [thread:$0]  (!%p5497_p12), %s7993_s12, 1280, %s545_s24, [#allocation10], %s8010_s29, %s8010_s29, %s8011_s27  }
  0x3b   : > { %s5130_s25 = scalar_lea.vmem %s490_s3, 128  ;;  %p5138_p6 = scmp.lt.s32.totalorder %s490_s3, %s490_s3 }
  0x3c   : > { %p5131_p9 = scmp.ne.s32.totalorder %s490_s3, %s5130_s25  ;;  %p5139_p10 = scmp.lt.s32.totalorder %s5130_s25, %s5130_s25 }
  0x3e   : > { %p5133_p2 = pnand %p5131_p9, %p5503_p13  ;;  %p5140_p3 = por %p5139_p10, %p5138_p6 }
  0x40   : > { %p5134_p5 = pneg %p5133_p2 }
  0x42   : > { %p5141_p4 = pnand %p5140_p3, %p5134_p5 }
  0x44   : > { %5144 = shalt.err (!%p5141_p4)
}
  0x45   : > { %s8116_s20 = sld [smem:[#allocation87_spill]]  ;;  %s5306_s2 = smov [#allocation8]  }
  0x46   : > { %s525_s24 = sshll.u32 %s5306_s2, 4  ;;  %s5307_s0 = smov [#allocation11]   ;;  %s526_s24 = int_to_ptr.vmem [resolvable:$true] %s525_s24 }
  0x47   : > { %s557_s29 = sshll.u32 %s5307_s0, 4  ;;  %s5156_s27 = scalar_lea.vmem %s526_s24, 4608  ;;  %s558_s29 = int_to_ptr.vmem [resolvable:$true] %s557_s29 }
  0x48   : > { %p5157_p7 = scmp.ne.s32.totalorder %s526_s24, %s5156_s27  ;;  %p5164_p0 = scmp.lt.s32.totalorder %s526_s24, %s526_s24 }
  0x49   : > { %p5165_p1 = scmp.lt.s32.totalorder %s5156_s27, %s5156_s27 }
  0x4a   : > { %p5159_p8 = pnand %p5157_p7, %p5503_p13 }
  0x4b   : > { %4831 = dma.hbm_to_vmem [thread:$0]  (!%p5497_p12), %s8116_s20, 128, %s490_s3, [#allocation4]  }
  0x4c   : > { %p5160_p11 = pneg %p5159_p8  ;;  %p5166_p9 = por %p5165_p1, %p5164_p0 }
  0x4e   : > { %p5167_p2 = pnand %p5166_p9, %p5160_p11 }
  0x50   : > { %5170 = shalt.err (!%p5167_p2)
}
  0x51   : > { %s8117_s5 = smov 8   ;;  %s8118_s25 = smov 128  }
  0x52   : > { %s8119_s9 = sld [smem:[#allocation93_spill]]  ;;  %s5182_s23 = scalar_lea.vmem %s558_s29, 4992 }
  0x53   : > { %p5183_p5 = scmp.ne.s32.totalorder %s558_s29, %s5182_s23  ;;  %p5190_p3 = scmp.lt.s32.totalorder %s558_s29, %s558_s29 }
  0x54   : > { %p5191_p4 = scmp.lt.s32.totalorder %s5182_s23, %s5182_s23 }
  0x55   : > { %p5185_p6 = pnand %p5183_p5, %p5503_p13 }
  0x56   : > { %p5192_p7 = por %p5191_p4, %p5190_p3 }
  0x57   : > { %p5186_p10 = pneg %p5185_p6 }
  0x58   : > { %4837 = dma.hbm_to_vmem [thread:$0]  (!%p5497_p12), %s8119_s9, 4608, %s526_s24, [#allocation7], %s8118_s25, %s8118_s25, %s8117_s5  }
  0x59   : > { %p5193_p8 = pnand %p5192_p7, %p5186_p10 }
  0x5b   : > { %5196 = shalt.err (!%p5193_p8)
}
  0x5c   : > { %s5308_s27 = smov 384   ;;  %s5309_s2 = smov 24  }
  0x5d   : > { %4843 = dma.hbm_to_vmem [thread:$0]  (!%p5497_p12), %s7994_s13, 4992, %s558_s29, [#allocation10], %s5308_s27, %s5308_s27, %s5309_s2  }
  0x5e   : > { %s5310_s24 = smov [#allocation12]  }
  0x5f   : > { %s577_s5 = sshll.u32 %s5310_s24, 4  ;;  %s578_s5 = int_to_ptr.vmem [resolvable:$true] %s577_s5 }
  0x60   : > { %s5208_s25 = scalar_lea.vmem %s578_s5, 16  ;;  %s5215_s3 = scalar_lea.vmem %s578_s5, 32 }
  0x61   : > { %p5209_p11 = scmp.ne.s32.totalorder %s578_s5, %s5208_s25  ;;  %p5216_p9 = scmp.lt.s32.totalorder %s578_s5, %s578_s5 }
  0x62   : > { %p5217_p2 = scmp.lt.s32.totalorder %s5215_s3, %s5208_s25 }
  0x63   : > { %p5211_p0 = pnand %p5209_p11, %p5503_p13 }
  0x64   : > { %p5218_p5 = por %p5217_p2, %p5216_p9 }
  0x65   : > { %p5212_p1 = pneg %p5211_p0 }
  0x67   : > { %p5219_p6 = pnand %p5218_p5, %p5212_p1 }
  0x69   : > { %5222 = shalt.err (!%p5219_p6)
}
  0x6a   : > { %4846 = dma.hbm_to_vmem [thread:$0]  (!%p5497_p12), %s7997_s16, 16, %s578_s5, [#allocation13]  }
  0x6b   : > { %p8120_p10 = scmp.ne.s32.totalorder %s8112_s28, 0 }
  0x6d   : > { %603 = sbr.rel (%p8120_p10) target bundleno = 3837 (0xefd), region = 96 }
  0x72   : > { %p8121_p3 = scmp.eq.s32.totalorder %s5461_s17, 0 }
  0x74   : > { %5266 = dma.done.wait (%p8121_p3), [#allocation4], 128   ;;  %p8122_p13 = pmov %p8121_p3 }
  0x75   : > { %p8123_p4 = pmov %p8121_p3 }
  0x76   : > { %5268 = vsyncadd (%p8122_p13), [#allocation4], 4294967168 }
  0x77   : > { %5270 = dma.done.wait (%p8123_p4), [#allocation7], 4736   ;;  %p8124_p7 = pmov %p8121_p3 }
  0x78   : > { %p8125_p8 = pmov %p8121_p3 }
  0x79   : > { %5272 = vsyncadd (%p8124_p7), [#allocation7], 4294962560 }
  0x7a   : > { %5274 = dma.done.wait (%p8125_p8), [#allocation10], 6272   ;;  %p8126_p12 = pmov %p8121_p3 }
  0x7b   : > { %p8127_p11 = pmov %p8121_p3 }
  0x7c   : > { %5276 = vsyncadd (%p8126_p12), [#allocation10], 4294961024 }
  0x7d   : > { %5278 = dma.done.wait (%p8127_p11), [#allocation13], 16   ;;  %p8128_p0 = pmov %p8121_p3 }
  0x7e   : > { %v5311_v1 = vmov 3   ;;  %v5312_v2 = vmov 1   ;;  %s8129_s28 = sld [smem:[#allocation86_spill]]  ;;  %p678_p1 = scmp.lt.s32.totalorder %s5461_s17, 1  ;;  %v8018_v43 = vlaneseq  ;;  %vm1285_vm0 = vcmask 1045504  }
  0x7f   : > { %5280 = vsyncadd (%p8128_p0), [#allocation13], 4294967280  ;;  %4933 = vset.pattern.permute.xlu1 %v5311_v1  ;;  %4931 = vset.pattern.permute.xlu0 %v5312_v2  ;;  %s8131_s0 = sld [smem:[#allocation85_spill]]  ;;  %s8031_s24 = smov 127   ;;  %vm1281_vm2 = vcmask 244736   ;;  %vm972_vm3 = vcmask 1039360  }
  0x80   : > { %s5691_s3 = scalar_select %p678_p1, %s5461_s17, 1  ;;  %v5725_v52 = vshrl.u32 %v8018_v43, 7  ;;  %v6291_v43 = vld [vmem:[%s7985_s4 + $0x240] sm:$0xff]  ;;  %vm997_vm4 = vcmask 1031168   ;;  %vm1022_vm5 = vcmask 900096   ;;  %vm1047_vm6 = vcmask 891904  }
  0x81   : > { %s8014_s9 = smov 108   ;;  %s8012_s5 = smov 90   ;;  %8151 = vst [vmem:[#allocation44_spill] sm:$0xff] %v6291_v43  ;;  %vm1072_vm7 = vcmask 883712   ;;  %vm1097_vm8 = vcmask 752640   ;;  %vm1122_vm9 = vcmask 744448  }
  0x82   : > { %s4336_s29 = sshll.u32 %s5691_s3, 1  ;;  %8130 = vst [vmem:[#allocation25_spill] sm:$0xff] %v5725_v52  ;;  %v786_v61 = vsub.s32 1, %v5725_v52  ;;  %v5762_v1 = vsub.s32 0, %v5725_v52  ;;  %s8085_s3 = smov 109   ;;  %v6312_v52 = vld [vmem:[%s7985_s4 + $0x218] sm:$0xff] }
  0x83   : > { %s8089_s23 = smov 92   ;;  %s8016_s25 = smov 91   ;;  %8154 = vst [vmem:[#allocation47_spill] sm:$0xff] %v6312_v52  ;;  %vm1147_vm10 = vcmask 736256   ;;  %vm8092_vm13 = vmmov 0   ;;  %vm8091_vm14 = vcmask 588800  }
  0x84   : > { %v729_v3 = vld [vmem:[%s8129_s28 + $0x170] sm:$0xff]  ;;  %v778_v4 = vld [vmem:[%s8129_s28 + $0x2f8] sm:$0xff]  ;;  %v728_v5 = vld [vmem:[%s8129_s28 + $0x168] sm:$0xff]  ;;  %8132 = vst [vmem:[#allocation26_spill] sm:$0xff] %v5762_v1  ;;  %s8155_s2 = smov 108   ;;  %s8169_s27 = smov 90  }
  0x85   : > { %790 = vmatprep.subr.mxu0 %v729_v3  ;;  %4386 = vmatprep.subr.mxu1 %v778_v4  ;;  %v730_v6 = vld [vmem:[%s8129_s28 + $0x178] sm:$0xff]  ;;  %v775_v8 = vld [vmem:[%s8129_s28 + $0x2e0] sm:$0xff]  ;;  %v725_v9 = vld [vmem:[%s8129_s28 + $0x150] sm:$0xff]  ;;  %s681_s20 = scalar_lea.vmem %s8131_s0, %s4336_s29  ;;  %s8133_s0 = sld [smem:[#allocation88_spill]] }
  0x86   : > { %v726_v7 = vld [vmem:[%s8129_s28 + $0x158] sm:$0xff]  ;;  %791 = vmatpush1.msra.mxu0 %v728_v5  ;;  %4387 = vmatpush3.msra.mxu1 %v730_v6  ;;  %v727_v10 = vld [vmem:[%s8129_s28 + $0x160] sm:$0xff]  ;;  %v772_v12 = vld [vmem:[%s8129_s28 + $0x2c8] sm:$0xff]  ;;  %s8164_s29 = smov 91   ;;  %s8197_s6 = sld [smem:[#allocation90_spill]] }
  0x87   : > { %v723_v11 = vld [vmem:[%s8129_s28 + $0x140] sm:$0xff]  ;;  %792 = vmatprep.subr.mxu0 %v726_v7  ;;  %4388 = vmatprep.subr.mxu1 %v775_v8  ;;  %v722_v13 = vld [vmem:[%s8129_s28 + $0x138] sm:$0xff]  ;;  %v724_v14 = vld [vmem:[%s8129_s28 + $0x148] sm:$0xff]  ;;  %s8260_s7 = sld [smem:[#allocation91_spill]]  ;;  %s5332_s1 = smov 117  }
  0x88   : > { %793 = vmatpush1.msra.mxu0 %v725_v9  ;;  %4389 = vmatpush3.msra.mxu1 %v727_v10  ;;  %v720_v15 = vld [vmem:[%s8129_s28 + $0x128] sm:$0xff]  ;;  %v769_v16 = vld [vmem:[%s8129_s28 + $0x2b0] sm:$0xff]  ;;  %v719_v17 = vld [vmem:[%s8129_s28 + $0x120] sm:$0xff]  ;;  %s8261_s8 = sld [smem:[#allocation92_spill]]  ;;  %s5333_s30 = smov 118  }
  0x89   : > { %794 = vmatprep.subr.mxu0 %v723_v11  ;;  %4390 = vmatprep.subr.mxu1 %v772_v12  ;;  %v721_v18 = vld [vmem:[%s8129_s28 + $0x130] sm:$0xff]  ;;  %v766_v20 = vld [vmem:[%s8129_s28 + $0x298] sm:$0xff]  ;;  %v716_v21 = vld [vmem:[%s8129_s28 + $0x108] sm:$0xff]  ;;  %s8262_s10 = sld [smem:[#allocation94_spill]]  ;;  %p8270_p2 = scmp.ne.s32.totalorder %s8109_s26, 0 }
  0x8a   : > { %795 = vmatpush1.msra.mxu0 %v722_v13  ;;  %4391 = vmatpush3.msra.mxu1 %v724_v14  ;;  %v717_v19 = vld [vmem:[%s8129_s28 + $0x110] sm:$0xff]  ;;  %v718_v22 = vld [vmem:[%s8129_s28 + $0x118] sm:$0xff]  ;;  %v763_v24 = vld [vmem:[%s8129_s28 + $0x280] sm:$0xff]  ;;  %s8263_s11 = sld [smem:[#allocation95_spill]] }
  0x8b   : > { %796 = vmatprep.subr.mxu0 %v720_v15  ;;  %4392 = vmatprep.subr.mxu1 %v769_v16  ;;  %v714_v23 = vld [vmem:[%s8129_s28 + $0xf8] sm:$0xff]  ;;  %v713_v25 = vld [vmem:[%s8129_s28 + $0xf0] sm:$0xff]  ;;  %v715_v26 = vld [vmem:[%s8129_s28 + $0x100] sm:$0xff] }
  0x8c   : > { %797 = vmatpush1.msra.mxu0 %v719_v17  ;;  %4393 = vmatpush3.msra.mxu1 %v721_v18  ;;  %v711_v27 = vld [vmem:[%s8129_s28 + $0xe0] sm:$0xff]  ;;  %v760_v28 = vld [vmem:[%s8129_s28 + $0x268] sm:$0xff]  ;;  %v710_v29 = vld [vmem:[%s8129_s28 + $0xd8] sm:$0xff] }
  0x8d   : > { %798 = vmatprep.subr.mxu0 %v717_v19  ;;  %4394 = vmatprep.subr.mxu1 %v766_v20  ;;  %v712_v30 = vld [vmem:[%s8129_s28 + $0xe8] sm:$0xff]  ;;  %v757_v32 = vld [vmem:[%s8129_s28 + $0x250] sm:$0xff]  ;;  %v707_v33 = vld [vmem:[%s8129_s28 + $0xc0] sm:$0xff] }
  0x8e   : > { %799 = vmatpush1.msra.mxu0 %v716_v21  ;;  %4395 = vmatpush3.msra.mxu1 %v718_v22  ;;  %v708_v31 = vld [vmem:[%s8129_s28 + $0xc8] sm:$0xff]  ;;  %v709_v34 = vld [vmem:[%s8129_s28 + $0xd0] sm:$0xff]  ;;  %v754_v36 = vld [vmem:[%s8129_s28 + $0x238] sm:$0xff]  ;;  %v5313_v22 = vmov 4  }
  0x8f   : > { %800 = vmatprep.subr.mxu0 %v714_v23  ;;  %4396 = vmatprep.subr.mxu1 %v763_v24  ;;  %v705_v35 = vld [vmem:[%s8129_s28 + $0xb0] sm:$0xff]  ;;  %v704_v37 = vld [vmem:[%s8129_s28 + $0xa8] sm:$0xff]  ;;  %v706_v38 = vld [vmem:[%s8129_s28 + $0xb8] sm:$0xff] }
  0x90   : > { %801 = vmatpush1.msra.mxu0 %v713_v25  ;;  %4397 = vmatpush3.msra.mxu1 %v715_v26  ;;  %v702_v39 = vld [vmem:[%s8129_s28 + $0x98] sm:$0xff]  ;;  %v751_v40 = vld [vmem:[%s8129_s28 + $0x220] sm:$0xff]  ;;  %v701_v41 = vld [vmem:[%s8129_s28 + $0x90] sm:$0xff]  ;;  %v5314_v25 = vmov 2  }
  0x91   : > { %802 = vmatprep.subr.mxu0 %v711_v27  ;;  %4398 = vmatprep.subr.mxu1 %v760_v28  ;;  %v703_v42 = vld [vmem:[%s8129_s28 + $0xa0] sm:$0xff]  ;;  %v748_v45 = vld [vmem:[%s8129_s28 + $0x208] sm:$0xff]  ;;  %v698_v46 = vld [vmem:[%s8129_s28 + $0x78] sm:$0xff] }
  0x92   : > { %803 = vmatpush1.msra.mxu0 %v710_v29  ;;  %4399 = vmatpush3.msra.mxu1 %v712_v30  ;;  %v699_v44 = vld [vmem:[%s8129_s28 + $0x80] sm:$0xff]  ;;  %v700_v47 = vld [vmem:[%s8129_s28 + $0x88] sm:$0xff]  ;;  %v745_v49 = vld [vmem:[%s8129_s28 + $0x1f0] sm:$0xff]  ;;  %v5315_v29 = vmov 5  }
  0x93   : > { %804 = vmatprep.subr.mxu0 %v708_v31  ;;  %4400 = vmatprep.subr.mxu1 %v757_v32  ;;  %v696_v48 = vld [vmem:[%s8129_s28 + $0x68] sm:$0xff]  ;;  %v695_v50 = vld [vmem:[%s8129_s28 + $0x60] sm:$0xff]  ;;  %v697_v51 = vld [vmem:[%s8129_s28 + $0x70] sm:$0xff]  ;;  %v5316_v32 = vmov 6  }
  0x94   : > { %805 = vmatpush1.msra.mxu0 %v707_v33  ;;  %4401 = vmatpush3.msra.mxu1 %v709_v34  ;;  %v693_v53 = vld [vmem:[%s8129_s28 + $0x50] sm:$0xff]  ;;  %v742_v54 = vld [vmem:[%s8129_s28 + $0x1d8] sm:$0xff]  ;;  %v692_v55 = vld [vmem:[%s8129_s28 + $0x48] sm:$0xff] }
  0x95   : > { %806 = vmatprep.subr.mxu0 %v705_v35  ;;  %4402 = vmatprep.subr.mxu1 %v754_v36  ;;  %v694_v56 = vld [vmem:[%s8129_s28 + $0x58] sm:$0xff]  ;;  %v739_v58 = vld [vmem:[%s8129_s28 + $0x1c0] sm:$0xff]  ;;  %v689_v59 = vld [vmem:[%s8129_s28 + $0x30] sm:$0xff]  ;;  %v5317_v36 = vmov 7  }
  0x96   : > { %807 = vmatpush1.msra.mxu0 %v704_v37  ;;  %4403 = vmatpush3.msra.mxu1 %v706_v38  ;;  %v690_v57 = vld [vmem:[%s8129_s28 + $0x38] sm:$0xff]  ;;  %v691_v60 = vld [vmem:[%s8129_s28 + $0x40] sm:$0xff]  ;;  %v736_v63 = vld [vmem:[%s8129_s28 + $0x1a8] sm:$0xff] }
  0x97   : > { %808 = vmatprep.subr.mxu0 %v702_v39  ;;  %4404 = vmatprep.subr.mxu1 %v751_v40  ;;  %v687_v62 = vld [vmem:[%s8129_s28 + $0x20] sm:$0xff]  ;;  %v686_v2 = vld [vmem:[%s8129_s28 + $0x18] sm:$0xff]  ;;  %v688_v3 = vld [vmem:[%s8129_s28 + $0x28] sm:$0xff]  ;;  %v5318_v39 = vmov 0  }
  0x98   : > { %809 = vmatpush1.msra.mxu0 %v701_v41  ;;  %4405 = vmatpush3.msra.mxu1 %v703_v42  ;;  %v682_v0 = vld [vmem:[%s681_s20] sm:$0x3]  ;;  %v684_v4 = vld [vmem:[%s8129_s28 + $0x8] sm:$0xff]  ;;  %v733_v5 = vld [vmem:[%s8129_s28 + $0x190] sm:$0xff]  ;;  %s8083_s20 = smov 126  }
  0x99   : > { %810 = vmatprep.subr.mxu0 %v699_v44  ;;  %4406 = vmatprep.subr.mxu1 %v748_v45  ;;  %v683_v6 = vld [vmem:[%s8129_s28] sm:$0xff]  ;;  %v685_v7 = vld [vmem:[%s8129_s28 + $0x10] sm:$0xff]  ;;  %v787_v8 = vrot.slane %v682_v0, %v786_v61  ;;  %v5783_v9 = vrot.slane %v682_v0, %v5762_v1  ;;  %v776_v11 = vld [vmem:[%s8129_s28 + $0x2e8] sm:$0xff]  ;;  %v5319_v45 = vmov 8  }
  0x9a   : > { %811 = vmatpush1.msra.mxu0 %v698_v46  ;;  %4407 = vmatpush3.msra.mxu1 %v700_v47  ;;  %v777_v10 = vld [vmem:[%s8129_s28 + $0x2f0] sm:$0xff]  ;;  %v774_v12 = vld [vmem:[%s8129_s28 + $0x2d8] sm:$0xff]  ;;  %v5797_v14 = vld [vmem:[#allocation3] sm:$0xff] }
  0x9b   : > { %812 = vmatprep.subr.mxu0 %v696_v48  ;;  %4408 = vmatprep.subr.mxu1 %v745_v49  ;;  %v773_v13 = vld [vmem:[%s8129_s28 + $0x2d0] sm:$0xff]  ;;  %v771_v15 = vld [vmem:[%s8129_s28 + $0x2c0] sm:$0xff]  ;;  %v770_v16 = vld [vmem:[%s8129_s28 + $0x2b8] sm:$0xff] }
  0x9c   : > { %813 = vmatpush1.msra.mxu0 %v695_v50  ;;  %4409 = vmatpush3.msra.mxu1 %v697_v51  ;;  %v768_v17 = vld [vmem:[%s8129_s28 + $0x2a8] sm:$0xff]  ;;  %v767_v18 = vld [vmem:[%s8129_s28 + $0x2a0] sm:$0xff]  ;;  %v765_v19 = vld [vmem:[%s8129_s28 + $0x290] sm:$0xff] }
  0x9d   : > { %814 = vmatprep.subr.mxu0 %v693_v53  ;;  %4410 = vmatprep.subr.mxu1 %v742_v54  ;;  %v764_v20 = vld [vmem:[%s8129_s28 + $0x288] sm:$0xff]  ;;  %v762_v21 = vld [vmem:[%s8129_s28 + $0x278] sm:$0xff]  ;;  %v761_v23 = vld [vmem:[%s8129_s28 + $0x270] sm:$0xff] }
  0x9e   : > { %815 = vmatpush1.msra.mxu0 %v692_v55  ;;  %4411 = vmatpush3.msra.mxu1 %v694_v56  ;;  %v759_v24 = vld [vmem:[%s8129_s28 + $0x260] sm:$0xff]  ;;  %v758_v26 = vld [vmem:[%s8129_s28 + $0x258] sm:$0xff]  ;;  %v756_v27 = vld [vmem:[%s8129_s28 + $0x248] sm:$0xff] }
  0x9f   : > { %816 = vmatprep.subr.mxu0 %v690_v57  ;;  %4412 = vmatprep.subr.mxu1 %v739_v58  ;;  %v755_v28 = vld [vmem:[%s8129_s28 + $0x240] sm:$0xff]  ;;  %v753_v30 = vld [vmem:[%s8129_s28 + $0x230] sm:$0xff]  ;;  %v752_v31 = vld [vmem:[%s8129_s28 + $0x228] sm:$0xff] }
  0xa0   : > { %817 = vmatpush1.msra.mxu0 %v689_v59  ;;  %4413 = vmatpush3.msra.mxu1 %v691_v60  ;;  %v750_v33 = vld [vmem:[%s8129_s28 + $0x218] sm:$0xff]  ;;  %v749_v34 = vld [vmem:[%s8129_s28 + $0x210] sm:$0xff]  ;;  %v747_v35 = vld [vmem:[%s8129_s28 + $0x200] sm:$0xff] }
  0xa1   : > { %818 = vmatprep.subr.mxu0 %v687_v62  ;;  %4414 = vmatprep.subr.mxu1 %v736_v63  ;;  %v746_v37 = vld [vmem:[%s8129_s28 + $0x1f8] sm:$0xff]  ;;  %v744_v38 = vld [vmem:[%s8129_s28 + $0x1e8] sm:$0xff]  ;;  %v743_v40 = vld [vmem:[%s8129_s28 + $0x1e0] sm:$0xff] }
  0xa2   : > { %819 = vmatpush1.msra.mxu0 %v686_v2  ;;  %4415 = vmatpush3.msra.mxu1 %v688_v3  ;;  %v741_v41 = vld [vmem:[%s8129_s28 + $0x1d0] sm:$0xff]  ;;  %v932_v42 = vld [vmem:[%s8133_s0] sm:$0xff]  ;;  %v740_v44 = vld [vmem:[%s8129_s28 + $0x1c8] sm:$0xff]  ;;  %s8087_s0 = smov 110  }
  0xa3   : > { %820 = vmatprep.subr.mxu0 %v684_v4  ;;  %4416 = vmatprep.subr.mxu1 %v733_v5  ;;  %v738_v46 = vld [vmem:[%s8129_s28 + $0x1b8] sm:$0xff]  ;;  %v737_v47 = vld [vmem:[%s8129_s28 + $0x1b0] sm:$0xff]  ;;  %v735_v48 = vld [vmem:[%s8129_s28 + $0x1a0] sm:$0xff] }
  0xa4   : > { %821 = vmatpush1.msra.mxu0 %v683_v6  ;;  %4417 = vmatpush3.msra.mxu1 %v685_v7  ;;  %v734_v49 = vld [vmem:[%s8129_s28 + $0x198] sm:$0xff]  ;;  %v732_v50 = vld [vmem:[%s8129_s28 + $0x188] sm:$0xff]  ;;  %v731_v51 = vld [vmem:[%s8129_s28 + $0x180] sm:$0xff] }
  0xa5   : > { %925 = vmatprep.mubr.f32.mxu1 %v787_v8  ;;  %822 = vmatprep.subr.mxu0 %v777_v10  ;;  %v1219_v55 = vld [vmem:[%s7985_s4 + $0x170] sm:$0xff]  ;;  %v1218_v56 = vld [vmem:[%s7985_s4 + $0x168] sm:$0xff]  ;;  %v1216_v59 = vld [vmem:[%s7985_s4 + $0x158] sm:$0xff] }
  0xa6   : > { %926 = vmatmul.mubr.f32.vlgmr.msra.gmra.mxu1 %v5783_v9  ;;  %823 = vmatpush2.msra.mxu0 %v776_v11  ;;  %v1215_v60 = vld [vmem:[%s7985_s4 + $0x150] sm:$0xff]  ;;  %v1213_v61 = vld [vmem:[%s7985_s4 + $0x140] sm:$0xff]  ;;  %v1212_v62 = vld [vmem:[%s7985_s4 + $0x138] sm:$0xff] }
  0xa7   : > { %824 = vmatprep.subr.mxu0 %v774_v12  ;;  %854 = vmatprep.mubr.f32.mxu0 %v787_v8  ;;  %v5928_v4 = vld [vmem:[%s7985_s4 + $0x128] sm:$0xff]  ;;  %v5933_v5 = vld [vmem:[%s7985_s4 + $0x120] sm:$0xff]  ;;  %v5938_v6 = vld [vmem:[%s7985_s4 + $0x110] sm:$0xff] }
  0xa8   : > { %825 = vmatpush2.msra.mxu0 %v773_v13  ;;  %1007 = vperm.xlu1 %4933, %v5797_v14   ;;  %v5947_v8 = vld [vmem:[%s7985_s4 + $0x108] sm:$0xff]  ;;  %v5961_v12 = vld [vmem:[%s7985_s4 + $0xf8] sm:$0xff]  ;;  %v5966_v13 = vld [vmem:[%s7985_s4 + $0xf0] sm:$0xff] }
  0xa9   : > { %826 = vmatprep.subr.mxu0 %v771_v15  ;;  %957 = vperm.xlu0 %4931, %v5797_v14  }
  0xaa   : > { %827 = vmatpush2.msra.mxu0 %v770_v16  ;;  %1295 = vmatprep.subr.mxu1 %v1219_v55  ;;  %v5977_v16 = vld [vmem:[%s7985_s4 + $0xe0] sm:$0xff] }
  0xab   : > { %828 = vmatprep.subr.mxu0 %v768_v17  ;;  %1296 = vmatpush1.msra.mxu1 %v1218_v56  ;;  %v6165_v56 = vld [vmem:[%s7985_s4] sm:$0xff] }
  0xac   : > { %829 = vmatpush2.msra.mxu0 %v767_v18  ;;  %4934 = vset.pattern.permute.xlu1 %v5313_v22  ;;  %v5986_v18 = vld [vmem:[%s7985_s4 + $0xd8] sm:$0xff]  ;;  %v6004_v22 = vld [vmem:[%s7985_s4 + $0xc0] sm:$0xff]  ;;  %8135 = vst [vmem:[#allocation28_spill] sm:$0xff] %v6165_v56 }
  0xad   : > { %830 = vmatprep.subr.mxu0 %v765_v19  ;;  %1032 = vperm.xlu1 %4934, %v5797_v14  }
  0xae   : > { %831 = vmatpush2.msra.mxu0 %v764_v20  ;;  %4932 = vset.pattern.permute.xlu0 %v5314_v25  ;;  %v6022_v25 = vld [vmem:[%s7985_s4 + $0x348] sm:$0x3f] }
  0xaf   : > { %832 = vmatprep.subr.mxu0 %v762_v21  ;;  %982 = vperm.xlu0 %4932, %v5797_v14   ;;  %v5998_v21 = vld [vmem:[%s7985_s4 + $0xc8] sm:$0xff] }
  0xb0   : > { %833 = vmatpush2.msra.mxu0 %v761_v23  ;;  %1297 = vmatprep.subr.mxu1 %v1216_v59  ;;  %v6009_v23 = vld [vmem:[%s7985_s4 + $0x350] sm:$0x3f] }
  0xb1   : > { %834 = vmatprep.subr.mxu0 %v759_v24  ;;  %4935 = vset.pattern.permute.xlu1 %v5315_v29  ;;  %v6017_v24 = vld [vmem:[%s7985_s4 + $0xb0] sm:$0xff] }
  0xb2   : > { %835 = vmatpush2.msra.mxu0 %v758_v26  ;;  %1057 = vperm.xlu1 %4935, %v5797_v14   ;;  %v6030_v26 = vld [vmem:[%s7985_s4 + $0xa8] sm:$0xff]  ;;  %v6047_v29 = vld [vmem:[%s7985_s4 + $0x330] sm:$0xff] }
  0xb3   : > { %836 = vmatprep.subr.mxu0 %v756_v27  ;;  %4936 = vset.pattern.permute.xlu0 %v5316_v32  ;;  %v6035_v27 = vld [vmem:[%s7985_s4 + $0x338] sm:$0xff]  ;;  %v6061_v32 = vld [vmem:[%s7985_s4 + $0x320] sm:$0xff]  ;;  %v6175_v59 = vld [vmem:[%s7985_s4 + $0x2f0] sm:$0xff] }
  0xb4   : > { %837 = vmatpush2.msra.mxu0 %v755_v28  ;;  %1082 = vperm.xlu0 %4936, %v5797_v14   ;;  %v6042_v28 = vld [vmem:[%s7985_s4 + $0x98] sm:$0xff]  ;;  %8136 = vst [vmem:[#allocation29_spill] sm:$0xff] %v6175_v59 }
  0xb5   : > { %838 = vmatprep.subr.mxu0 %v753_v30  ;;  %1298 = vmatpush1.msra.mxu1 %v1215_v60 }
  0xb6   : > { %839 = vmatpush2.msra.mxu0 %v752_v31  ;;  %4937 = vset.pattern.permute.xlu1 %v5317_v36  ;;  %v6056_v31 = vld [vmem:[%s7985_s4 + $0x90] sm:$0xff]  ;;  %v6082_v36 = vld [vmem:[%s7985_s4 + $0x78] sm:$0xff] }
  0xb7   : > { %840 = vmatprep.subr.mxu0 %v750_v33  ;;  %1107 = vperm.xlu1 %4937, %v5797_v14  }
  0xb8   : > { %841 = vmatpush2.msra.mxu0 %v749_v34  ;;  %4939 = vset.pattern.permute.xlu0 %v5318_v39  ;;  %v6070_v34 = vld [vmem:[%s7985_s4 + $0x80] sm:$0xff] }
  0xb9   : > { %842 = vmatprep.subr.mxu0 %v747_v35  ;;  %935 = vperm.xlu0 %4939, %v5797_v14   ;;  %v6075_v35 = vld [vmem:[%s7985_s4 + $0x318] sm:$0xff] }
  0xba   : > { %843 = vmatpush2.msra.mxu0 %v746_v37  ;;  %1299 = vmatprep.subr.mxu1 %v1213_v61  ;;  %v6087_v37 = vld [vmem:[%s7985_s4 + $0x308] sm:$0xff] }
  0xbb   : > { %844 = vmatprep.subr.mxu0 %v744_v38  ;;  %4938 = vset.pattern.permute.xlu1 %v5319_v45  ;;  %v6094_v38 = vld [vmem:[%s7985_s4 + $0x68] sm:$0xff] }
  0xbc   : > { %845 = vmatpush2.msra.mxu0 %v743_v40  ;;  %1132 = vperm.xlu1 %4938, %v5797_v14   ;;  %v6124_v45 = vld [vmem:[%s7985_s4 + $0x48] sm:$0xff] }
  0xbd   : > { %846 = vmatprep.subr.mxu0 %v741_v41  ;;  %1158 = vperm.xlu0 %4939, %v932_v42   ;;  %v6110_v41 = vld [vmem:[%s7985_s4 + $0x60] sm:$0xff]  ;;  %v6117_v42 = vld [vmem:[%s7985_s4 + $0x50] sm:$0xff] }
  0xbe   : > { %847 = vmatpush2.msra.mxu0 %v740_v44  ;;  %1300 = vmatpush1.msra.mxu1 %v1212_v62  ;;  %v8019_v44 = vmov 0.0  }
  0xbf   : > { %848 = vmatprep.subr.mxu0 %v738_v46  ;;  %1301 = vmatprep.subr.mxu1 %v5928_v4  ;;  %v6130_v46 = vld [vmem:[%s7985_s4 + $0x38] sm:$0xff] }
  0xc0   : > { %849 = vmatpush2.msra.mxu0 %v737_v47  ;;  %4940 = vset.pattern.permute.xlu1 %v5318_v39  ;;  %v6099_v39 = vld [vmem:[%s7985_s4 + $0x300] sm:$0xff]  ;;  %v6136_v47 = vld [vmem:[%s7985_s4 + $0x30] sm:$0xff] }
  0xc1   : > { %850 = vmatprep.subr.mxu0 %v735_v48  ;;  %1302 = vmatpush1.msra.mxu1 %v5933_v5  ;;  %v6142_v48 = vld [vmem:[%s7985_s4 + $0x20] sm:$0xff] }
  0xc2   : > { %851 = vmatpush2.msra.mxu0 %v734_v49  ;;  %1303 = vmatprep.subr.mxu1 %v5938_v6  ;;  %v6148_v49 = vld [vmem:[%s7985_s4 + $0x18] sm:$0xff] }
  0xc3   : > { %852 = vmatprep.subr.mxu0 %v732_v50  ;;  %1304 = vmatpush1.msra.mxu1 %v5947_v8  ;;  %v6154_v50 = vld [vmem:[%s7985_s4 + $0x8] sm:$0xff] }
  0xc4   : > { %853 = vmatpush2.msra.mxu0 %v731_v51  ;;  %1305 = vmatprep.subr.mxu1 %v5961_v12  ;;  %8134 = vst [vmem:[#allocation27_spill] sm:$0xff] %v6154_v50  ;;  %v6159_v51 = vld [vmem:[%s7985_s4 + $0x2f8] sm:$0xff] }
  0xc5   : > { %855 = vmatmul.mubr.f32.vlgmr.msra.gmra.mxu0 %v5783_v9  ;;  %1306 = vmatpush1.msra.mxu1 %v5966_v13 }
  0xc6   : > { %1307 = vmatprep.subr.mxu1 %v5977_v16  ;;  %4337 = vmatprep.subr.msk.mxu0 %vm1285_vm0, %v6009_v23 }
  0xc7   : > { %1308 = vmatpush1.msra.mxu1 %v5986_v18  ;;  %4338 = vmatpush1.msk.msra.mxu0 %vm1285_vm0, %v6022_v25 }
  0xc8   : > { %1309 = vmatprep.subr.mxu1 %v5998_v21  ;;  %1392 = vmatprep.subr.mxu0 %v6035_v27 }
  0xc9   : > { %1310 = vmatpush1.msra.mxu1 %v6004_v22  ;;  %1393 = vmatpush1.msra.mxu0 %v6047_v29 }
  0xca   : > { %1311 = vmatprep.subr.mxu1 %v6017_v24  ;;  %1394 = vmatprep.subr.mxu0 %v6061_v32 }
  0xcb   : > { %1312 = vmatpush1.msra.mxu1 %v6030_v26  ;;  %1395 = vmatpush1.msra.mxu0 %v6075_v35 }
  0xcc   : > { %1313 = vmatprep.subr.mxu1 %v6042_v28  ;;  %1396 = vmatprep.subr.mxu0 %v6087_v37 }
  0xcd   : > { %1314 = vmatpush1.msra.mxu1 %v6056_v31  ;;  %1397 = vmatpush1.msra.mxu0 %v6099_v39 }
  0xce   : > { %1315 = vmatprep.subr.mxu1 %v6070_v34  ;;  %1430 = vmatprep.mubr.f32.mxu0 %v8019_v44  ;;  %v6297_v44 = vld [vmem:[%s7985_s4 + $0x230] sm:$0xff] }
  0xcf   : > { %1316 = vmatpush1.msra.mxu1 %v6082_v36  ;;  %4421 = vmatprep.subr.mxu0 %v6159_v51  ;;  %8152 = vst [vmem:[#allocation45_spill] sm:$0xff] %v6297_v44 }
  0xd0   : > { %1317 = vmatprep.subr.mxu1 %v6094_v38 }
  0xd1   : > { %1318 = vmatpush1.msra.mxu1 %v6110_v41 }
  0xd2   : > { %1319 = vmatprep.subr.mxu1 %v6117_v42 }
  0xd3   : > { %1320 = vmatpush1.msra.mxu1 %v6124_v45 }
  0xd4   : > { %1321 = vmatprep.subr.mxu1 %v6130_v46 }
  0xd5   : > { %1322 = vmatpush1.msra.mxu1 %v6136_v47 }
  0xd6   : > { %1323 = vmatprep.subr.mxu1 %v6142_v48 }
  0xd7   : > { %1324 = vmatpush1.msra.mxu1 %v6148_v49 }
  0xd8   : > { %1325 = vmatprep.subr.mxu1 %v6154_v50 }
  0xd9   : > { %1326 = vmatpush1.msra.mxu1 %v6165_v56 }
  0xda   : > { %1327 = vmatprep.subr.mxu1 %v6175_v59 }
 0x123   : > { %v5897_v53 = vpop.permute.xlu1 %1007 }
 0x124   : > { %v5921_v63 = vpop.permute.xlu0 %957 }
 0x128   : > { %v5899_v54 = vpop.permute.xlu1 %1032 }
 0x12a   : > { %v5955_v11 = vpop.permute.xlu0 %982 }
 0x12d   : > { %v5907_v57 = vpop.permute.xlu1 %1057 }
 0x12f   : > { %v6049_v30 = vpop.permute.xlu0 %1082 }
 0x132   : > { %v5923_v3 = vpop.permute.xlu1 %1107 }
 0x137   : > { %v5979_v17 = vpop.permute.xlu1 %1132 }
 0x166   : > { %v4418_v58 = vpop.f32.mrf.mxu1 }
 0x168   : > { %v4419_v0 = vpop.f32.mrf.mxu1 }
 0x169   : > { %v4420_v2 = vadd.f32 %v4419_v0, %v4418_v58  ;;  %v6187_v0 = vld [vmem:[%s7985_s4 + $0x2e8] sm:$0xff] }
 0x16a   : > { %8137 = vst [vmem:[#allocation30_spill] sm:$0xff] %v6187_v0  ;;  %1328 = vmatpush2.msra.mxu1 %v6187_v0 }
 0x16b   : > { %v5941_v7 = vrot.slane %v4420_v2, %v5762_v1  ;;  %v6193_v2 = vld [vmem:[%s7985_s4 + $0x2d8] sm:$0xff] }
 0x16c   : > { %8138 = vst [vmem:[#allocation31_spill] sm:$0xff] %v6193_v2  ;;  %1329 = vmatprep.subr.mxu1 %v6193_v2 }
 0x16d   : > { %v1012_v9 = vmul.f32 %v5897_v53, %v5941_v7  ;;  %v962_v10 = vmul.f32 %v5921_v63, %v5941_v7  ;;  %v1062_v14 = vmul.f32 %v5907_v57, %v5941_v7  ;;  %v987_v15 = vmul.f32 %v5955_v11, %v5941_v7 }
 0x16e   : > { %v1137_v19 = vmul.f32 %v5979_v17, %v5941_v7  ;;  %v1037_v20 = vmul.f32 %v5899_v54, %v5941_v7  ;;  %v1087_v33 = vmul.f32 %v6049_v30, %v5941_v7  ;;  %v1112_v40 = vmul.f32 %v5923_v3, %v5941_v7 }
 0x16f   : > { %1020 = vrot.lane.b32.xlu0 %v1012_v9, %s8087_s0  ;;  %970 = vrot.lane.b32.xlu1 %v962_v10, %s8031_s24  ;;  %v6201_v10 = vld [vmem:[%s7985_s4 + $0x2d0] sm:$0xff] }
 0x170   : > { %8139 = vst [vmem:[#allocation32_spill] sm:$0xff] %v6201_v10  ;;  %1330 = vmatpush2.msra.mxu1 %v6201_v10  ;;  %v6532_v10 = vld [vmem:[%s7985_s4 + $0x250] sm:$0xff] }
 0x171   : > { %8185 = vst [vmem:[#allocation74_spill] sm:$0xff] %v6532_v10 }
 0x173   : > { %1070 = vrot.lane.b32.xlu0 %v1062_v14, %s8014_s9  ;;  %995 = vrot.lane.b32.xlu1 %v987_v15, %s8083_s20  ;;  %v6207_v14 = vld [vmem:[%s7985_s4 + $0x2c0] sm:$0xff]  ;;  %s5330_s9 = smov 107  }
 0x174   : > { %8140 = vst [vmem:[#allocation33_spill] sm:$0xff] %v6207_v14  ;;  %1331 = vmatprep.subr.mxu1 %v6207_v14  ;;  %v6520_v14 = vld [vmem:[%s7985_s4 + $0x268] sm:$0xff] }
 0x175   : > { %8183 = vst [vmem:[#allocation72_spill] sm:$0xff] %v6520_v14 }
 0x177   : > { %1145 = vrot.lane.b32.xlu0 %v1137_v19, %s8012_s5  ;;  %1045 = vrot.lane.b32.xlu1 %v1037_v20, %s8085_s3  ;;  %v6222_v19 = vld [vmem:[%s7985_s4 + $0x2a8] sm:$0xff]  ;;  %s8196_s5 = smov 127  }
 0x178   : > { %8142 = vst [vmem:[#allocation35_spill] sm:$0xff] %v6222_v19 }
 0x17b   : > { %1095 = vrot.lane.b32.xlu1 %v1087_v33, %s8089_s23  ;;  %v6231_v33 = vld [vmem:[%s7985_s4 + $0x2a0] sm:$0xff] }
 0x17c   : > { %8143 = vst [vmem:[#allocation36_spill] sm:$0xff] %v6231_v33 }
 0x17f   : > { %1120 = vrot.lane.b32.xlu1 %v1112_v40, %s8016_s25  ;;  %v6237_v40 = vld [vmem:[%s7985_s4 + $0x290] sm:$0xff] }
 0x180   : > { %8144 = vst [vmem:[#allocation37_spill] sm:$0xff] %v6237_v40 }
 0x185   : > { %v856_v55 = vpop.f32.mrf.mxu0 }
 0x186   : > { %v6169_v58 = vrot.slane %v856_v55, %v5762_v1 }
 0x187   : > { %v858_v60 = vpop.f32.mrf.mxu0 }
 0x188   : > { %v6179_v61 = vrot.slane %v858_v60, %v5762_v1  ;;  %v960_v62 = vmul.f32 %v5921_v63, %v6169_v58  ;;  %v985_v15 = vmul.f32 %v5955_v11, %v6169_v58  ;;  %v1010_v55 = vmul.f32 %v5897_v53, %v6169_v58  ;;  %v6252_v60 = vld [vmem:[%s7985_s4 + $0x278] sm:$0xff]  ;;  %v6321_v1 = vld [vmem:[%s7985_s4 + $0x210] sm:$0xff] }
 0x189   : > { %8146 = vst [vmem:[#allocation39_spill] sm:$0xff] %v6252_v60  ;;  %8156 = vst [vmem:[#allocation48_spill] sm:$0xff] %v6321_v1 }
 0x18a   : > { %966 = vrot.lane.b32.xlu0 %v960_v62, %s8031_s24  ;;  %v961_v9 = vmul.f32 %v5921_v63, %v6179_v61  ;;  %v6216_v63 = vld [vmem:[%s7985_s4 + $0x2b8] sm:$0xff]  ;;  %v986_v20 = vmul.f32 %v5955_v11, %v6179_v61  ;;  %v6246_v11 = vld [vmem:[%s7985_s4 + $0x288] sm:$0xff]  ;;  %v1011_v62 = vmul.f32 %v5897_v53, %v6179_v61 }
 0x18b   : > { %8141 = vst [vmem:[#allocation34_spill] sm:$0xff] %v6216_v63  ;;  %1332 = vmatpush2.msra.mxu1 %v6216_v63  ;;  %8145 = vst [vmem:[#allocation38_spill] sm:$0xff] %v6246_v11  ;;  %v6276_v53 = vld [vmem:[%s7985_s4 + $0x258] sm:$0xff]  ;;  %v6508_v63 = vld [vmem:[%s7985_s4 + $0x280] sm:$0xff] }
 0x18c   : > { %968 = vrot.lane.b32.xlu1 %v961_v9, %s8031_s24  ;;  %1333 = vmatprep.subr.mxu1 %v6222_v19  ;;  %v6261_v9 = vld [vmem:[%s7985_s4 + $0x270] sm:$0xff]  ;;  %8149 = vst [vmem:[#allocation42_spill] sm:$0xff] %v6276_v53  ;;  %v6496_v19 = vld [vmem:[%s7985_s4 + $0x298] sm:$0xff]  ;;  %8181 = vst [vmem:[#allocation70_spill] sm:$0xff] %v6508_v63  ;;  %s5331_s24 = smov 116  }
 0x18d   : > { %1334 = vmatpush2.msra.mxu1 %v6231_v33  ;;  %8147 = vst [vmem:[#allocation40_spill] sm:$0xff] %v6261_v9  ;;  %v6484_v33 = vld [vmem:[%s7985_s4 + $0x2b0] sm:$0xff]  ;;  %8179 = vst [vmem:[#allocation68_spill] sm:$0xff] %v6496_v19 }
 0x18e   : > { %991 = vrot.lane.b32.xlu0 %v985_v15, %s8083_s20  ;;  %1335 = vmatprep.subr.mxu1 %v6237_v40  ;;  %v6267_v15 = vld [vmem:[%s7985_s4 + $0x260] sm:$0xff]  ;;  %8177 = vst [vmem:[#allocation66_spill] sm:$0xff] %v6484_v33 }
 0x18f   : > { %1336 = vmatpush2.msra.mxu1 %v6246_v11  ;;  %8148 = vst [vmem:[#allocation41_spill] sm:$0xff] %v6267_v15 }
 0x190   : > { %993 = vrot.lane.b32.xlu1 %v986_v20, %s8083_s20  ;;  %v1035_v20 = vmul.f32 %v5899_v54, %v6169_v58  ;;  %1337 = vmatprep.subr.mxu1 %v6252_v60 }
 0x191   : > { %1338 = vmatpush2.msra.mxu1 %v6261_v9 }
 0x192   : > { %1016 = vrot.lane.b32.xlu0 %v1010_v55, %s8087_s0  ;;  %v6282_v55 = vld [vmem:[%s7985_s4 + $0x248] sm:$0xff]  ;;  %1339 = vmatprep.subr.mxu1 %v6267_v15 }
 0x193   : > { %8150 = vst [vmem:[#allocation43_spill] sm:$0xff] %v6282_v55  ;;  %1340 = vmatpush2.msra.mxu1 %v6276_v53 }
 0x194   : > { %1018 = vrot.lane.b32.xlu1 %v1011_v62, %s8087_s0  ;;  %v1036_v62 = vmul.f32 %v5899_v54, %v6179_v61  ;;  %1341 = vmatprep.subr.mxu1 %v6282_v55  ;;  %v6306_v54 = vld [vmem:[%s7985_s4 + $0x228] sm:$0xff] }
 0x195   : > { %8153 = vst [vmem:[#allocation46_spill] sm:$0xff] %v6306_v54  ;;  %1342 = vmatpush2.msra.mxu1 %v6291_v43  ;;  %v6327_v43 = vld [vmem:[%s7985_s4 + $0x200] sm:$0xff] }
 0x196   : > { %1041 = vrot.lane.b32.xlu0 %v1035_v20, %s8085_s3  ;;  %v1060_v20 = vmul.f32 %v5907_v57, %v6169_v58  ;;  %1343 = vmatprep.subr.mxu1 %v6297_v44  ;;  %8157 = vst [vmem:[#allocation49_spill] sm:$0xff] %v6327_v43 }
 0x197   : > { %1344 = vmatpush2.msra.mxu1 %v6306_v54  ;;  %v6342_v54 = vld [vmem:[%s7985_s4 + $0x1e8] sm:$0xff] }
 0x198   : > { %1043 = vrot.lane.b32.xlu1 %v1036_v62, %s8085_s3  ;;  %v1061_v62 = vmul.f32 %v5907_v57, %v6179_v61  ;;  %1345 = vmatprep.subr.mxu1 %v6312_v52  ;;  %v6336_v57 = vld [vmem:[%s7985_s4 + $0x1f8] sm:$0xff]  ;;  %8159 = vst [vmem:[#allocation51_spill] sm:$0xff] %v6342_v54  ;;  %v6351_v52 = vld [vmem:[%s7985_s4 + $0x1e0] sm:$0xff] }
 0x199   : > { %8158 = vst [vmem:[#allocation50_spill] sm:$0xff] %v6336_v57  ;;  %1346 = vmatpush2.msra.mxu1 %v6321_v1  ;;  %8160 = vst [vmem:[#allocation52_spill] sm:$0xff] %v6351_v52  ;;  %v6357_v1 = vld [vmem:[%s7985_s4 + $0x1d0] sm:$0xff] }
 0x19a   : > { %1066 = vrot.lane.b32.xlu0 %v1060_v20, %s8155_s2  ;;  %v1085_v20 = vmul.f32 %v6049_v30, %v6169_v58  ;;  %1347 = vmatprep.subr.mxu1 %v6327_v43  ;;  %8161 = vst [vmem:[#allocation53_spill] sm:$0xff] %v6357_v1 }
 0x19b   : > { %1348 = vmatpush2.msra.mxu1 %v6336_v57  ;;  %v6372_v57 = vld [vmem:[%s7985_s4 + $0x1b8] sm:$0xff] }
 0x19c   : > { %1068 = vrot.lane.b32.xlu1 %v1061_v62, %s8155_s2  ;;  %v1086_v62 = vmul.f32 %v6049_v30, %v6179_v61  ;;  %1349 = vmatprep.subr.mxu1 %v6342_v54  ;;  %v6366_v30 = vld [vmem:[%s7985_s4 + $0x1c8] sm:$0xff]  ;;  %8163 = vst [vmem:[#allocation55_spill] sm:$0xff] %v6372_v57  ;;  %v6381_v54 = vld [vmem:[%s7985_s4 + $0x1b0] sm:$0xff] }
 0x19d   : > { %8162 = vst [vmem:[#allocation54_spill] sm:$0xff] %v6366_v30  ;;  %1350 = vmatpush2.msra.mxu1 %v6351_v52  ;;  %8165 = vst [vmem:[#allocation56_spill] sm:$0xff] %v6381_v54  ;;  %v6387_v52 = vld [vmem:[%s7985_s4 + $0x1a0] sm:$0xff] }
 0x19e   : > { %1091 = vrot.lane.b32.xlu0 %v1085_v20, %s8089_s23  ;;  %v1110_v20 = vmul.f32 %v5923_v3, %v6169_v58  ;;  %1351 = vmatprep.subr.mxu1 %v6357_v1  ;;  %8166 = vst [vmem:[#allocation57_spill] sm:$0xff] %v6387_v52 }
 0x19f   : > { %1352 = vmatpush2.msra.mxu1 %v6366_v30  ;;  %v6402_v30 = vld [vmem:[%s7985_s4 + $0x188] sm:$0xff] }
 0x1a0   : > { %1093 = vrot.lane.b32.xlu1 %v1086_v62, %s8089_s23  ;;  %v1111_v62 = vmul.f32 %v5923_v3, %v6179_v61  ;;  %1353 = vmatprep.subr.mxu1 %v6372_v57  ;;  %v6396_v3 = vld [vmem:[%s7985_s4 + $0x198] sm:$0xff]  ;;  %8168 = vst [vmem:[#allocation59_spill] sm:$0xff] %v6402_v30  ;;  %v6411_v57 = vld [vmem:[%s7985_s4 + $0x180] sm:$0xff] }
 0x1a1   : > { %8167 = vst [vmem:[#allocation58_spill] sm:$0xff] %v6396_v3  ;;  %1354 = vmatpush2.msra.mxu1 %v6381_v54  ;;  %8170 = vst [vmem:[#allocation60_spill] sm:$0xff] %v6411_v57  ;;  %v8171_v54 = vmov 0.0  }
 0x1a2   : > { %1116 = vrot.lane.b32.xlu0 %v1110_v20, %s8164_s29  ;;  %v1135_v20 = vmul.f32 %v5979_v17, %v6169_v58  ;;  %1355 = vmatprep.subr.mxu1 %v6387_v52 }
 0x1a3   : > { %1356 = vmatpush2.msra.mxu1 %v6396_v3 }
 0x1a4   : > { %1118 = vrot.lane.b32.xlu1 %v1111_v62, %s8164_s29  ;;  %v1136_v62 = vmul.f32 %v5979_v17, %v6179_v61  ;;  %1357 = vmatprep.subr.mxu1 %v6402_v30 }
 0x1a5   : > { %1358 = vmatpush2.msra.mxu1 %v6411_v57 }
 0x1a6   : > { %1141 = vrot.lane.b32.xlu0 %v1135_v20, %s8169_s27  ;;  %4643 = vmatprep.subr.mxu1 %v8171_v54  ;;  %v6418_v20 = vpop.permute.xlu0 %935 }
 0x1a7   : > { %v952_v1 = vmul.f32 %v5941_v7, %v6418_v20  ;;  %v951_v56 = vmul.f32 %v6179_v61, %v6418_v20 }
 0x1a8   : > { %1143 = vrot.lane.b32.xlu1 %v1136_v62, %s8169_s27 }
 0x1aa   : > { %v6420_v17 = vpop.permute.xlu0 %1158 }
 0x1e1   : > { %v6422_v52 = vpop.permute.xlu1 %970  ;;  %v6427_v3 = vpop.permute.xlu0 %1020 }
 0x1e2   : > { %v980_v43 = vadd.f32 %v6422_v52, %v952_v1 }
 0x1e5   : > { %v6429_v62 = vpop.permute.xlu1 %995  ;;  %v6436_v53 = vpop.permute.xlu0 %1070 }
 0x1e6   : > { %v1005_v30 = vadd.f32 %v6429_v62, %v980_v43 }
 0x1e8   : > { %v1030_v57 = vadd.f32 %v6427_v3, %v1005_v30 }
 0x1e9   : > { %v6433_v44 = vpop.permute.xlu1 %1045  ;;  %v6445_v11 = vpop.permute.xlu0 %1145 }
 0x1ea   : > { %v1055_v55 = vadd.f32 %v6433_v44, %v1030_v57 }
 0x1ec   : > { %v1080_v15 = vadd.f32 %v6436_v53, %v1055_v55  ;;  %v6452_v55 = vld [vmem:[%s7985_s4 + $0x178] sm:$0xff] }
 0x1ed   : > { %v6439_v9 = vpop.permute.xlu1 %1095  ;;  %8172 = vst [vmem:[#allocation61_spill] sm:$0xff] %v6452_v55 }
 0x1ee   : > { %v1105_v1 = vadd.f32 %v6439_v9, %v1080_v15  ;;  %v6459_v15 = vld [vmem:[%s7985_s4 + $0x2e0] sm:$0xff] }
 0x1ef   : > { %8173 = vst [vmem:[#allocation62_spill] sm:$0xff] %v6459_v15 }
 0x1f1   : > { %v6442_v7 = vpop.permute.xlu1 %1120 }
 0x1f2   : > { %v1130_v60 = vadd.f32 %v6442_v7, %v1105_v1 }
 0x1f4   : > { %v1155_v43 = vadd.f32 %v6445_v11, %v1130_v60  ;;  %v6466_v60 = vld [vmem:[%s7985_s4 + $0x160] sm:$0xff] }
 0x1f5   : > { %8174 = vst [vmem:[#allocation63_spill] sm:$0xff] %v6466_v60 }
 0x1f6   : > { %v1163_v30 = vadd.f32 %v6420_v17, %v1155_v43  ;;  %v6472_v43 = vld [vmem:[%s7985_s4 + $0x2c8] sm:$0xff] }
 0x1f7   : > { %8175 = vst [vmem:[#allocation64_spill] sm:$0xff] %v6472_v43 }
 0x1f8   : > { %vm1166_vm1 = vcmp.ge.f32.partialorder %v1163_v30, 0.0  ;;  %v1169_v57 = vmul.f32 0.01, %v1163_v30 }
 0x1fa   : > { %v6454_v40 = vsel %vm1166_vm1, %v1163_v30, %v1169_v57  ;;  %v6478_v30 = vld [vmem:[%s7985_s4 + $0x148] sm:$0xff] }
 0x1fb   : > { %4339 = vmatmul.mubr.msk.f32.vlgmr.msra.gmra.mxu0 %vm1281_vm2, %v6454_v40  ;;  %8176 = vst [vmem:[#allocation65_spill] sm:$0xff] %v6478_v30 }
 0x1fc   : > { %v967_v1 = vpop.permute.xlu0 %966  ;;  %4422 = vmatpush3.msra.mxu0 %v6452_v55  ;;  %v6490_v55 = vld [vmem:[%s7985_s4 + $0x130] sm:$0xff] }
 0x1fd   : > { %4423 = vmatprep.subr.mxu0 %v6459_v15  ;;  %8178 = vst [vmem:[#allocation67_spill] sm:$0xff] %v6490_v55 }
 0x1fe   : > { %v969_v57 = vpop.permute.xlu1 %968  ;;  %4424 = vmatpush3.msra.mxu0 %v6466_v60  ;;  %v6502_v60 = vld [vmem:[%s7985_s4 + $0x118] sm:$0xff] }
 0x1ff   : > { %4425 = vmatprep.subr.mxu0 %v6472_v43  ;;  %8180 = vst [vmem:[#allocation69_spill] sm:$0xff] %v6502_v60  ;;  %v973_v0 = vsel %vm972_vm3, %v967_v1, %v969_v57  ;;  %v974_v59 = vsel %vm972_vm3, %v969_v57, %v6422_v52  ;;  %v6575_v52 = vld [vmem:[%s7985_s4 + $0x208] sm:$0xff] }
 0x200   : > { %v992_v15 = vpop.permute.xlu0 %991  ;;  %4426 = vmatpush3.msra.mxu0 %v6478_v30  ;;  %v6514_v30 = vld [vmem:[%s7985_s4 + $0x100] sm:$0xff] }
 0x201   : > { %4427 = vmatprep.subr.mxu0 %v6484_v33  ;;  %8182 = vst [vmem:[#allocation71_spill] sm:$0xff] %v6514_v30 }
 0x202   : > { %v994_v43 = vpop.permute.xlu1 %993  ;;  %4428 = vmatpush3.msra.mxu0 %v6490_v55  ;;  %v6526_v55 = vld [vmem:[%s7985_s4 + $0xe8] sm:$0xff] }
 0x203   : > { %4429 = vmatprep.subr.mxu0 %v6496_v19  ;;  %8184 = vst [vmem:[#allocation73_spill] sm:$0xff] %v6526_v55  ;;  %v998_v1 = vsel %vm997_vm4, %v992_v15, %v994_v43  ;;  %v999_v57 = vsel %vm997_vm4, %v994_v43, %v6429_v62  ;;  %v6590_v15 = vld [vmem:[%s7985_s4 + $0x1f0] sm:$0xff] }
 0x204   : > { %v1017_v33 = vpop.permute.xlu0 %1016  ;;  %4430 = vmatpush3.msra.mxu0 %v6502_v60  ;;  %v6538_v60 = vld [vmem:[%s7985_s4 + $0xd0] sm:$0xff] }
 0x205   : > { %4431 = vmatprep.subr.mxu0 %v6508_v63  ;;  %8186 = vst [vmem:[#allocation75_spill] sm:$0xff] %v6538_v60 }
 0x206   : > { %v1019_v19 = vpop.permute.xlu1 %1018  ;;  %4432 = vmatpush3.msra.mxu0 %v6514_v30  ;;  %v6544_v30 = vld [vmem:[%s7985_s4 + $0x238] sm:$0xff] }
 0x207   : > { %4433 = vmatprep.subr.mxu0 %v6520_v14  ;;  %v6550_v14 = vld [vmem:[%s7985_s4 + $0xb8] sm:$0xff]  ;;  %v1023_v62 = vsel %vm1022_vm5, %v1017_v33, %v1019_v19  ;;  %v1024_v43 = vsel %vm1022_vm5, %v1019_v19, %v6427_v3 }
 0x208   : > { %v1042_v63 = vpop.permute.xlu0 %1041  ;;  %4434 = vmatpush3.msra.mxu0 %v6526_v55  ;;  %8187 = vst [vmem:[#allocation76_spill] sm:$0xff] %v6550_v14  ;;  %v6556_v55 = vld [vmem:[%s7985_s4 + $0x220] sm:$0xff]  ;;  %v6605_v33 = vld [vmem:[%s7985_s4 + $0x1d8] sm:$0xff] }
 0x209   : > { %4435 = vmatprep.subr.mxu0 %v6532_v10  ;;  %v6565_v10 = vld [vmem:[%s7985_s4 + $0xa0] sm:$0xff] }
 0x20a   : > { %v1044_v2 = vpop.permute.xlu1 %1043  ;;  %4436 = vmatpush3.msra.mxu0 %v6538_v60  ;;  %v950_v60 = vmul.f32 %v6169_v58, %v6418_v20  ;;  %v6584_v58 = vld [vmem:[%s7985_s4 + $0x88] sm:$0xff]  ;;  %v979_v20 = vadd.f32 %v974_v59, %v951_v56  ;;  %v6599_v56 = vld [vmem:[%s7985_s4 + $0x70] sm:$0xff] }
 0x20b   : > { %4437 = vmatprep.subr.mxu0 %v6544_v30  ;;  %v1048_v19 = vsel %vm1047_vm6, %v1042_v63, %v1044_v2  ;;  %v1049_v3 = vsel %vm1047_vm6, %v1044_v2, %v6433_v44  ;;  %v6620_v63 = vld [vmem:[%s7985_s4 + $0x1c0] sm:$0xff] }
 0x20c   : > { %v1067_v50 = vpop.permute.xlu0 %1066  ;;  %4438 = vmatpush3.msra.mxu0 %v6550_v14  ;;  %v978_v61 = vadd.f32 %v973_v0, %v950_v60  ;;  %v1004_v0 = vadd.f32 %v999_v57, %v979_v20  ;;  %8189 = vst [vmem:[#allocation78_spill] sm:$0xff] %v6620_v63 }
 0x20d   : > { %4439 = vmatprep.subr.mxu0 %v6556_v55 }
 0x20e   : > { %v1069_v14 = vpop.permute.xlu1 %1068  ;;  %4440 = vmatpush3.msra.mxu0 %v6565_v10  ;;  %v1003_v59 = vadd.f32 %v998_v1, %v978_v61  ;;  %v6614_v1 = vld [vmem:[%s7985_s4 + $0x58] sm:$0xff]  ;;  %v1029_v61 = vadd.f32 %v1024_v43, %v1004_v0 }
 0x20f   : > { %4441 = vmatprep.subr.mxu0 %v6575_v52  ;;  %8188 = vst [vmem:[#allocation77_spill] sm:$0xff] %v6614_v1  ;;  %v1073_v44 = vsel %vm1072_vm7, %v1067_v50, %v1069_v14  ;;  %v1074_v2 = vsel %vm1072_vm7, %v1069_v14, %v6436_v53  ;;  %v6635_v50 = vld [vmem:[%s7985_s4 + $0x1a8] sm:$0xff] }
 0x210   : > { %v1092_v60 = vpop.permute.xlu0 %1091  ;;  %4442 = vmatpush3.msra.mxu0 %v6584_v58  ;;  %v1028_v57 = vadd.f32 %v1023_v62, %v1003_v59  ;;  %v6629_v62 = vld [vmem:[%s7985_s4 + $0x40] sm:$0xff]  ;;  %v1054_v59 = vadd.f32 %v1049_v3, %v1029_v61  ;;  %8191 = vst [vmem:[#allocation80_spill] sm:$0xff] %v6635_v50 }
 0x211   : > { %4443 = vmatprep.subr.mxu0 %v6590_v15  ;;  %8190 = vst [vmem:[#allocation79_spill] sm:$0xff] %v6629_v62 }
 0x212   : > { %v1094_v20 = vpop.permute.xlu1 %1093  ;;  %4444 = vmatpush3.msra.mxu0 %v6599_v56  ;;  %v1053_v43 = vadd.f32 %v1048_v19, %v1028_v57  ;;  %v6644_v19 = vld [vmem:[%s7985_s4 + $0x28] sm:$0xff]  ;;  %v1079_v57 = vadd.f32 %v1074_v2, %v1054_v59 }
 0x213   : > { %4445 = vmatprep.subr.mxu0 %v6605_v33  ;;  %v1098_v14 = vsel %vm1097_vm8, %v1092_v60, %v1094_v20  ;;  %v1099_v53 = vsel %vm1097_vm8, %v1094_v20, %v6439_v9  ;;  %v6659_v20 = vld [vmem:[%s7985_s4 + $0x10] sm:$0xff] }
 0x214   : > { %v1117_v0 = vpop.permute.xlu0 %1116  ;;  %4446 = vmatpush3.msra.mxu0 %v6614_v1  ;;  %v1078_v3 = vadd.f32 %v1073_v44, %v1053_v43  ;;  %v6650_v1 = vld [vmem:[%s7985_s4 + $0x190] sm:$0xff]  ;;  %v1104_v2 = vadd.f32 %v1099_v53, %v1079_v57 }
 0x215   : > { %4447 = vmatprep.subr.mxu0 %v6620_v63 }
 0x216   : > { %v1119_v61 = vpop.permute.xlu1 %1118  ;;  %4448 = vmatpush3.msra.mxu0 %v6629_v62  ;;  %v1103_v44 = vadd.f32 %v1098_v14, %v1078_v3 }
 0x217   : > { %v1123_v60 = vsel %vm1122_vm9, %v1117_v0, %v1119_v61  ;;  %v1124_v9 = vsel %vm1122_vm9, %v1119_v61, %v6442_v7  ;;  %4449 = vmatprep.subr.mxu0 %v6635_v50 }
 0x218   : > { %4450 = vmatpush3.msra.mxu0 %v6644_v19  ;;  %v1128_v43 = vadd.f32 %v1123_v60, %v1103_v44  ;;  %v1129_v59 = vadd.f32 %v1124_v9, %v1104_v2  ;;  %v1142_v0 = vpop.permute.xlu0 %1141  ;;  %v6672_v44 = vld [vmem:[%s7985_s4 + $0x358] sm:$0x3f] }
 0x219   : > { %4451 = vmatprep.subr.mxu0 %v6650_v1  ;;  %8192 = vst [vmem:[#allocation81_spill] sm:$0xff] %v6672_v44 }
 0x21a   : > { %v1144_v62 = vpop.permute.xlu1 %1143  ;;  %4452 = vmatpush3.msra.mxu0 %v6659_v20 }
 0x21b   : > { %v1148_v7 = vsel %vm1147_vm10, %v1142_v0, %v1144_v62  ;;  %v1149_v61 = vsel %vm1147_vm10, %v1144_v62, %v6445_v11  ;;  %v6677_v11 = vld [vmem:[%s7985_s4 + $0x340] sm:$0xff] }
 0x21c   : > { %v1153_v50 = vadd.f32 %v1148_v7, %v1128_v43  ;;  %v1154_v63 = vadd.f32 %v1149_v61, %v1129_v59  ;;  %8193 = vst [vmem:[#allocation82_spill] sm:$0xff] %v6677_v11 }
 0x21e   : > { %v1161_v14 = vadd.f32 %v6420_v17, %v1153_v50  ;;  %v1162_v53 = vadd.f32 %v6420_v17, %v1154_v63  ;;  %v6687_v17 = vld [vmem:[%s7985_s4 + $0x328] sm:$0xff]  ;;  %v6695_v63 = vld [vmem:[%s7985_s4 + $0x310] sm:$0xff] }
 0x21f   : > { %8194 = vst [vmem:[#allocation83_spill] sm:$0xff] %v6687_v17  ;;  %8195 = vst [vmem:[#allocation84_spill] sm:$0xff] %v6695_v63 }
 0x220   : > { %vm1165_vm11 = vcmp.ge.f32.partialorder %v1162_v53, 0.0  ;;  %v1168_v3 = vmul.f32 0.01, %v1162_v53  ;;  %vm1164_vm12 = vcmp.ge.f32.partialorder %v1161_v14, 0.0  ;;  %v1167_v57 = vmul.f32 0.01, %v1161_v14 }
 0x222   : > { %v1171_v60 = vsel %vm1165_vm11, %v1162_v53, %v1168_v3  ;;  %v1170_v9 = vsel %vm1164_vm12, %v1161_v14, %v1167_v57  ;;  %v1578_v57 = vld [vmem:[%s8197_s6] sm:$0xff]  ;;  %s8256_s6 = smov 92  }
 0x223   : > { %1359 = vmatprep.mubr.f32.mxu1 %v1171_v60  ;;  %1501 = vmatprep.mubr.f32.mxu0 %v1171_v60 }
 0x224   : > { %1360 = vmatmul.mubr.f32.vlgmr.msra.gmra.mxu1 %v1170_v9  ;;  %1502 = vmatmul.mubr.f32.vlgmr.msra.gmra.mxu0 %v1170_v9 }
 0x225   : > { %4644 = vmatpush3.msk.msra.mxu1 %vm1285_vm0, %v6672_v44  ;;  %4651 = vmatprep.mubr.msk.f32.mxu1 %vm8092_vm13, %v8171_v54 }
 0x226   : > { %4645 = vmatprep.subr.mxu1 %v8171_v54  ;;  %1743 = vmatprep.mubr.f32.mxu0 %v8171_v54 }
 0x227   : > { %4646 = vmatpush3.msra.mxu1 %v6677_v11 }
 0x228   : > { %4647 = vmatprep.subr.mxu1 %v8171_v54 }
 0x229   : > { %4648 = vmatpush3.msra.mxu1 %v6687_v17 }
 0x22a   : > { %4649 = vmatprep.subr.mxu1 %v8171_v54 }
 0x22b   : > { %4650 = vmatpush3.msra.mxu1 %v6695_v63  ;;  %v1577_v63 = vld [vmem:[#allocation6] sm:$0xff] }
 0x22c   : > { %4652 = vmatmul.mubr.msk.f32.vlgmr.msra.gmra.mxu1 %vm1281_vm2, %v6454_v40  ;;  %4654 = vmatprep.subr.mxu1 %v8171_v54 }
 0x22d   : > { %4672 = vmatprep.mubr.msk.f32.mxu1 %vm8092_vm13, %v8171_v54 }
 0x2bb   : > { %v1432_v62 = vpop.f32.mrf.mxu0 }
 0x2bd   : > { %v1434_v50 = vpop.f32.mrf.mxu0 }
 0x2e4   : > { %v4453_v2 = vpop.f32.mrf.mxu0  ;;  %v1361_v43 = vpop.f32.mrf.mxu1 }
 0x2e5   : > { %v6711_v40 = vadd.f32 %v1432_v62, %v1361_v43 }
 0x2e6   : > { %v4454_v59 = vpop.f32.mrf.mxu0  ;;  %v1363_v0 = vpop.f32.mrf.mxu1 }
 0x2e7   : > { %v4455_v7 = vadd.f32 %v4454_v59, %v4453_v2  ;;  %v6716_v3 = vadd.f32 %v1434_v50, %v1363_v0 }
 0x2ec   : > { %v1573_v61 = vpop.f32.mrf.mxu1 }
 0x2ed   : > { %v1574_v14 = vadd.f32 %v4455_v7, %v1573_v61 }
 0x2ee   : > { %v4653_v53 = vpop.f32.mrf.mxu1 }
 0x2ef   : > { %1652 = vrot.lane.b32.xlu0 %v1574_v14, %s8164_s29  ;;  %1663 = vrot.lane.b32.xlu1 %v1574_v14, %s8169_s27 }
 0x2f3   : > { %1630 = vrot.lane.b32.xlu0 %v1574_v14, %s8155_s2  ;;  %1641 = vrot.lane.b32.xlu1 %v1574_v14, %s8089_s23 }
 0x2f7   : > { %1608 = vrot.lane.b32.xlu0 %v1574_v14, %s8087_s0  ;;  %1619 = vrot.lane.b32.xlu1 %v1574_v14, %s8085_s3 }
 0x2fb   : > { %1659 = vrot.lane.b32.xlu0 %v6711_v40, %s8169_s27  ;;  %1597 = vrot.lane.b32.xlu1 %v1574_v14, %s8083_s20 }
 0x2ff   : > { %1586 = vrot.lane.b32.xlu0 %v1574_v14, %s8196_s5  ;;  %1661 = vrot.lane.b32.xlu1 %v6716_v3, %s8169_s27 }
 0x303   : > { %1648 = vrot.lane.b32.xlu0 %v6711_v40, %s8164_s29  ;;  %1650 = vrot.lane.b32.xlu1 %v6716_v3, %s8164_s29 }
 0x307   : > { %1637 = vrot.lane.b32.xlu0 %v6711_v40, %s8089_s23  ;;  %1639 = vrot.lane.b32.xlu1 %v6716_v3, %s8089_s23 }
 0x30b   : > { %1626 = vrot.lane.b32.xlu0 %v6711_v40, %s8155_s2  ;;  %1628 = vrot.lane.b32.xlu1 %v6716_v3, %s8155_s2 }
 0x30f   : > { %1615 = vrot.lane.b32.xlu0 %v6711_v40, %s8085_s3  ;;  %1617 = vrot.lane.b32.xlu1 %v6716_v3, %s8085_s3  ;;  %s8259_s3 = smov 126  }
 0x313   : > { %1604 = vrot.lane.b32.xlu0 %v6711_v40, %s8087_s0  ;;  %1606 = vrot.lane.b32.xlu1 %v6716_v3, %s8087_s0  ;;  %s8257_s0 = smov 110  }
 0x317   : > { %1593 = vrot.lane.b32.xlu0 %v6711_v40, %s8083_s20  ;;  %1595 = vrot.lane.b32.xlu1 %v6716_v3, %s8083_s20  ;;  %s8258_s20 = smov 109  }
 0x31b   : > { %1582 = vrot.lane.b32.xlu0 %v6711_v40, %s8196_s5  ;;  %1584 = vrot.lane.b32.xlu1 %v6716_v3, %s8196_s5 }
 0x31f   : > { %1672 = vperm.xlu1 %4940, %v1578_v57  }
 0x361   : > { %v1653_v60 = vpop.permute.xlu0 %1652  ;;  %v1664_v9 = vpop.permute.xlu1 %1663 }
 0x362   : > { %4655 = vmatpush3.msra.mxu1 %v1664_v9 }
 0x363   : > { %4656 = vmatprep.subr.mxu1 %v8171_v54 }
 0x364   : > { %4657 = vmatpush3.msra.mxu1 %v1653_v60 }
 0x365   : > { %v1631_v62 = vpop.permute.xlu0 %1630  ;;  %4658 = vmatprep.subr.mxu1 %v8171_v54  ;;  %v1642_v50 = vpop.permute.xlu1 %1641 }
 0x366   : > { %4659 = vmatpush3.msra.mxu1 %v1642_v50 }
 0x367   : > { %4660 = vmatprep.subr.mxu1 %v8171_v54 }
 0x368   : > { %4661 = vmatpush3.msra.mxu1 %v1631_v62 }
 0x369   : > { %v1609_v2 = vpop.permute.xlu0 %1608  ;;  %4662 = vmatprep.subr.mxu1 %v8171_v54  ;;  %v1620_v43 = vpop.permute.xlu1 %1619 }
 0x36a   : > { %4663 = vmatpush3.msra.mxu1 %v1620_v43 }
 0x36b   : > { %4664 = vmatprep.subr.mxu1 %v8171_v54 }
 0x36c   : > { %4665 = vmatpush3.msra.mxu1 %v1609_v2 }
 0x36d   : > { %v1660_v59 = vpop.permute.xlu0 %1659  ;;  %4666 = vmatprep.subr.mxu1 %v8171_v54  ;;  %v1598_v0 = vpop.permute.xlu1 %1597 }
 0x36e   : > { %4667 = vmatpush3.msra.mxu1 %v1598_v0 }
 0x36f   : > { %4668 = vmatprep.subr.mxu1 %v8171_v54 }
 0x371   : > { %v1587_v7 = vpop.permute.xlu0 %1586  ;;  %v1662_v61 = vpop.permute.xlu1 %1661 }
 0x372   : > { %4669 = vmatpush3.msra.mxu1 %v1587_v7  ;;  %v1666_v53 = vsel %vm1147_vm10, %v1662_v61, %v1664_v9  ;;  %v1665_v57 = vsel %vm1147_vm10, %v1660_v59, %v1662_v61 }
 0x373   : > { %1693 = vmatprep.subr.mxu0 %v1666_v53  ;;  %4670 = vmatprep.subr.mxu1 %v8171_v54 }
 0x374   : > { %1694 = vmatpush1.msra.mxu0 %v1665_v57  ;;  %4671 = vmatpush3.msra.mxu1 %v1574_v14 }
 0x375   : > { %v1649_v17 = vpop.permute.xlu0 %1648  ;;  %v1651_v11 = vpop.permute.xlu1 %1650  ;;  %4673 = vmatmul.mubr.msk.f32.vlgmr.msra.gmra.mxu1 %vm8091_vm14, %v1577_v63  ;;  %4344 = vmatprep.subr.msk.mxu1 %vm1285_vm0, %v6009_v23 }
 0x376   : > { %v1655_v44 = vsel %vm1122_vm9, %v1651_v11, %v1653_v60  ;;  %v1654_v9 = vsel %vm1122_vm9, %v1649_v17, %v1651_v11  ;;  %4345 = vmatpush1.msk.msra.mxu1 %vm1285_vm0, %v6022_v25  ;;  %1967 = vmatprep.mubr.f32.mxu1 %v8171_v54 }
 0x377   : > { %1695 = vmatprep.subr.mxu0 %v1655_v44  ;;  %1929 = vmatprep.subr.mxu1 %v6035_v27 }
 0x378   : > { %1696 = vmatpush1.msra.mxu0 %v1654_v9  ;;  %1930 = vmatpush1.msra.mxu1 %v6047_v29 }
 0x379   : > { %v1638_v14 = vpop.permute.xlu0 %1637  ;;  %v1640_v59 = vpop.permute.xlu1 %1639  ;;  %1931 = vmatprep.subr.mxu1 %v6061_v32 }
 0x37a   : > { %v1644_v23 = vsel %vm1097_vm8, %v1640_v59, %v1642_v50  ;;  %v1643_v60 = vsel %vm1097_vm8, %v1638_v14, %v1640_v59  ;;  %1932 = vmatpush1.msra.mxu1 %v6075_v35 }
 0x37b   : > { %1697 = vmatprep.subr.mxu0 %v1644_v23  ;;  %1933 = vmatprep.subr.mxu1 %v6087_v37  ;;  %v8222_v23 = vld [vmem:[#allocation51_spill] sm:$0xff] }
 0x37c   : > { %1698 = vmatpush1.msra.mxu0 %v1643_v60  ;;  %1934 = vmatpush1.msra.mxu1 %v6099_v39  ;;  %v8223_v60 = vld [vmem:[#allocation52_spill] sm:$0xff] }
 0x37d   : > { %v1627_v25 = vpop.permute.xlu0 %1626  ;;  %v1629_v27 = vpop.permute.xlu1 %1628  ;;  %4471 = vmatprep.subr.mxu1 %v6159_v51 }
 0x37e   : > { %v1633_v29 = vsel %vm1072_vm7, %v1629_v27, %v1631_v62  ;;  %v1632_v32 = vsel %vm1072_vm7, %v1627_v25, %v1629_v27  ;;  %v8224_v25 = vld [vmem:[#allocation53_spill] sm:$0xff]  ;;  %v8225_v27 = vld [vmem:[#allocation54_spill] sm:$0xff] }
 0x37f   : > { %1699 = vmatprep.subr.mxu0 %v1633_v29  ;;  %v8226_v29 = vld [vmem:[#allocation55_spill] sm:$0xff] }
 0x380   : > { %1700 = vmatpush1.msra.mxu0 %v1632_v32  ;;  %v8227_v32 = vld [vmem:[#allocation56_spill] sm:$0xff] }
 0x381   : > { %v1616_v44 = vpop.permute.xlu0 %1615  ;;  %v1618_v11 = vpop.permute.xlu1 %1617 }
 0x382   : > { %v1622_v35 = vsel %vm1047_vm6, %v1618_v11, %v1620_v43  ;;  %v1621_v17 = vsel %vm1047_vm6, %v1616_v44, %v1618_v11  ;;  %v8228_v44 = vld [vmem:[#allocation57_spill] sm:$0xff]  ;;  %v8229_v11 = vld [vmem:[#allocation58_spill] sm:$0xff] }
 0x383   : > { %1701 = vmatprep.subr.mxu0 %v1622_v35  ;;  %v8230_v35 = vld [vmem:[#allocation59_spill] sm:$0xff] }
 0x384   : > { %1702 = vmatpush1.msra.mxu0 %v1621_v17  ;;  %v8231_v17 = vld [vmem:[#allocation60_spill] sm:$0xff] }
 0x385   : > { %v1605_v37 = vpop.permute.xlu0 %1604  ;;  %v1607_v39 = vpop.permute.xlu1 %1606 }
 0x386   : > { %v1611_v50 = vsel %vm1022_vm5, %v1607_v39, %v1609_v2  ;;  %v1610_v51 = vsel %vm1022_vm5, %v1605_v37, %v1607_v39  ;;  %v4953_v2 = vld [vmem:[%s7985_s4 + $0x170] sm:$0xff] }
 0x387   : > { %1703 = vmatprep.subr.mxu0 %v1611_v50 }
 0x388   : > { %1704 = vmatpush1.msra.mxu0 %v1610_v51 }
 0x389   : > { %v1594_v62 = vpop.permute.xlu0 %1593  ;;  %v1596_v61 = vpop.permute.xlu1 %1595 }
 0x38a   : > { %v1600_v53 = vsel %vm997_vm4, %v1596_v61, %v1598_v0  ;;  %v1599_v57 = vsel %vm997_vm4, %v1594_v62, %v1596_v61  ;;  %v4954_v0 = vld [vmem:[%s7985_s4 + $0x168] sm:$0xff] }
 0x38b   : > { %1705 = vmatprep.subr.mxu0 %v1600_v53  ;;  %v8232_v53 = vld [vmem:[#allocation61_spill] sm:$0xff] }
 0x38c   : > { %1706 = vmatpush1.msra.mxu0 %v1599_v57  ;;  %v8233_v57 = vld [vmem:[#allocation62_spill] sm:$0xff] }
 0x38d   : > { %v1583_v43 = vpop.permute.xlu0 %1582  ;;  %v1585_v9 = vpop.permute.xlu1 %1584 }
 0x38e   : > { %v1589_v14 = vsel %vm972_vm3, %v1585_v9, %v1587_v7  ;;  %v1588_v59 = vsel %vm972_vm3, %v1583_v43, %v1585_v9  ;;  %v4955_v7 = vld [vmem:[%s7985_s4 + $0x158] sm:$0xff]  ;;  %v8234_v43 = vld [vmem:[#allocation63_spill] sm:$0xff] }
 0x38f   : > { %1707 = vmatprep.subr.mxu0 %v1589_v14  ;;  %v8235_v9 = vld [vmem:[#allocation64_spill] sm:$0xff]  ;;  %v8236_v14 = vld [vmem:[#allocation65_spill] sm:$0xff] }
 0x390   : > { %1708 = vmatpush1.msra.mxu0 %v1588_v59  ;;  %v8237_v59 = vld [vmem:[#allocation66_spill] sm:$0xff] }
 0x391   : > { %1709 = vmatprep.subr.mxu0 %v6716_v3  ;;  %v4958_v3 = vld [vmem:[%s7985_s4 + $0x138] sm:$0xff] }
 0x392   : > { %1710 = vmatpush1.msra.mxu0 %v6711_v40  ;;  %v4956_v40 = vld [vmem:[%s7985_s4 + $0x150] sm:$0xff] }
 0x393   : > { %4342 = vmatmul.mubr.msk.f32.vlgmr.msra.gmra.mxu0 %vm8091_vm14, %v1577_v63  ;;  %1832 = vmatprep.subr.mxu0 %v4953_v2  ;;  %v4957_v63 = vld [vmem:[%s7985_s4 + $0x140] sm:$0xff]  ;;  %v8238_v2 = vld [vmem:[#allocation67_spill] sm:$0xff] }
 0x394   : > { %1833 = vmatpush1.msra.mxu0 %v4954_v0  ;;  %v8239_v0 = vld [vmem:[#allocation68_spill] sm:$0xff] }
 0x395   : > { %1834 = vmatprep.subr.mxu0 %v4955_v7  ;;  %v8240_v7 = vld [vmem:[#allocation69_spill] sm:$0xff] }
 0x396   : > { %1835 = vmatpush1.msra.mxu0 %v4956_v40  ;;  %v8241_v40 = vld [vmem:[#allocation70_spill] sm:$0xff] }
 0x397   : > { %1836 = vmatprep.subr.mxu0 %v4957_v63  ;;  %v8242_v63 = vld [vmem:[#allocation71_spill] sm:$0xff] }
 0x398   : > { %1837 = vmatpush1.msra.mxu0 %v4958_v3  ;;  %v8243_v3 = vld [vmem:[#allocation72_spill] sm:$0xff] }
 0x399   : > { %1838 = vmatprep.subr.mxu0 %v5928_v4  ;;  %v8198_v4 = vld [vmem:[#allocation27_spill] sm:$0xff] }
 0x39a   : > { %1839 = vmatpush1.msra.mxu0 %v5933_v5  ;;  %v8199_v5 = vld [vmem:[#allocation28_spill] sm:$0xff]  ;;  %v1673_v37 = vpop.permute.xlu1 %1672 }
 0x39b   : > { %1840 = vmatprep.subr.mxu0 %v5938_v6  ;;  %v8200_v6 = vld [vmem:[#allocation29_spill] sm:$0xff] }
 0x39c   : > { %1841 = vmatpush1.msra.mxu0 %v5947_v8  ;;  %v8201_v8 = vld [vmem:[#allocation30_spill] sm:$0xff] }
 0x39d   : > { %1842 = vmatprep.subr.mxu0 %v5961_v12  ;;  %v8202_v12 = vld [vmem:[#allocation31_spill] sm:$0xff] }
 0x39e   : > { %1843 = vmatpush1.msra.mxu0 %v5966_v13  ;;  %v8203_v13 = vld [vmem:[#allocation32_spill] sm:$0xff] }
 0x39f   : > { %1844 = vmatprep.subr.mxu0 %v5977_v16  ;;  %v8204_v16 = vld [vmem:[#allocation33_spill] sm:$0xff] }
 0x3a0   : > { %1845 = vmatpush1.msra.mxu0 %v5986_v18  ;;  %v8205_v18 = vld [vmem:[#allocation34_spill] sm:$0xff] }
 0x3a1   : > { %1846 = vmatprep.subr.mxu0 %v5998_v21  ;;  %v8206_v21 = vld [vmem:[#allocation35_spill] sm:$0xff] }
 0x3a2   : > { %1847 = vmatpush1.msra.mxu0 %v6004_v22  ;;  %v8207_v22 = vld [vmem:[#allocation36_spill] sm:$0xff] }
 0x3a3   : > { %1848 = vmatprep.subr.mxu0 %v6017_v24  ;;  %v8208_v24 = vld [vmem:[#allocation37_spill] sm:$0xff] }
 0x3a4   : > { %1849 = vmatpush1.msra.mxu0 %v6030_v26  ;;  %v8209_v26 = vld [vmem:[#allocation38_spill] sm:$0xff] }
 0x3a5   : > { %1850 = vmatprep.subr.mxu0 %v6042_v28  ;;  %v8210_v28 = vld [vmem:[#allocation39_spill] sm:$0xff] }
 0x3a6   : > { %1851 = vmatpush1.msra.mxu0 %v6056_v31  ;;  %v8211_v31 = vld [vmem:[#allocation40_spill] sm:$0xff] }
 0x3a7   : > { %1852 = vmatprep.subr.mxu0 %v6070_v34  ;;  %v8212_v34 = vld [vmem:[#allocation41_spill] sm:$0xff] }
 0x3a8   : > { %1853 = vmatpush1.msra.mxu0 %v6082_v36  ;;  %v8213_v36 = vld [vmem:[#allocation42_spill] sm:$0xff] }
 0x3a9   : > { %1854 = vmatprep.subr.mxu0 %v6094_v38  ;;  %v8214_v38 = vld [vmem:[#allocation43_spill] sm:$0xff] }
 0x3aa   : > { %1855 = vmatpush1.msra.mxu0 %v6110_v41  ;;  %v8215_v41 = vld [vmem:[#allocation44_spill] sm:$0xff] }
 0x3ab   : > { %1856 = vmatprep.subr.mxu0 %v6117_v42  ;;  %v8216_v42 = vld [vmem:[#allocation45_spill] sm:$0xff] }
 0x3ac   : > { %1857 = vmatpush1.msra.mxu0 %v6124_v45  ;;  %v8217_v45 = vld [vmem:[#allocation46_spill] sm:$0xff] }
 0x3ad   : > { %1858 = vmatprep.subr.mxu0 %v6130_v46  ;;  %v8218_v46 = vld [vmem:[#allocation47_spill] sm:$0xff] }
 0x3ae   : > { %1859 = vmatpush1.msra.mxu0 %v6136_v47  ;;  %v8219_v47 = vld [vmem:[#allocation48_spill] sm:$0xff] }
 0x3af   : > { %1860 = vmatprep.subr.mxu0 %v6142_v48  ;;  %v8220_v48 = vld [vmem:[#allocation49_spill] sm:$0xff] }
 0x3b0   : > { %1861 = vmatpush1.msra.mxu0 %v6148_v49  ;;  %v8221_v49 = vld [vmem:[#allocation50_spill] sm:$0xff] }
 0x3b1   : > { %1862 = vmatprep.subr.mxu0 %v8198_v4  ;;  %v8244_v4 = vld [vmem:[#allocation73_spill] sm:$0xff] }
 0x3b2   : > { %1863 = vmatpush1.msra.mxu0 %v8199_v5  ;;  %v8245_v5 = vld [vmem:[#allocation74_spill] sm:$0xff] }
 0x3b3   : > { %1864 = vmatprep.subr.mxu0 %v8200_v6  ;;  %v8246_v6 = vld [vmem:[#allocation75_spill] sm:$0xff] }
 0x3b4   : > { %1865 = vmatpush2.msra.mxu0 %v8201_v8  ;;  %v8247_v8 = vld [vmem:[#allocation76_spill] sm:$0xff] }
 0x3b5   : > { %1866 = vmatprep.subr.mxu0 %v8202_v12 }
 0x3b6   : > { %1867 = vmatpush2.msra.mxu0 %v8203_v13 }
 0x3b7   : > { %1868 = vmatprep.subr.mxu0 %v8204_v16  ;;  %v8248_v16 = vld [vmem:[#allocation77_spill] sm:$0xff] }
 0x3b8   : > { %1869 = vmatpush2.msra.mxu0 %v8205_v18  ;;  %v8249_v18 = vld [vmem:[#allocation78_spill] sm:$0xff] }
 0x3b9   : > { %1870 = vmatprep.subr.mxu0 %v8206_v21  ;;  %v8250_v21 = vld [vmem:[#allocation79_spill] sm:$0xff] }
 0x3ba   : > { %1871 = vmatpush2.msra.mxu0 %v8207_v22 }
 0x3bb   : > { %1872 = vmatprep.subr.mxu0 %v8208_v24 }
 0x3bc   : > { %1873 = vmatpush2.msra.mxu0 %v8209_v26 }
 0x3bd   : > { %1874 = vmatprep.subr.mxu0 %v8210_v28 }
 0x3be   : > { %1875 = vmatpush2.msra.mxu0 %v8211_v31 }
 0x3bf   : > { %1876 = vmatprep.subr.mxu0 %v8212_v34 }
 0x3c0   : > { %1877 = vmatpush2.msra.mxu0 %v8213_v36 }
 0x3c1   : > { %1878 = vmatprep.subr.mxu0 %v8214_v38 }
 0x3c2   : > { %1879 = vmatpush2.msra.mxu0 %v8215_v41 }
 0x3c3   : > { %1880 = vmatprep.subr.mxu0 %v8216_v42 }
 0x3c4   : > { %1881 = vmatpush2.msra.mxu0 %v8217_v45 }
 0x3c5   : > { %1882 = vmatprep.subr.mxu0 %v8218_v46 }
 0x3c6   : > { %1883 = vmatpush2.msra.mxu0 %v8219_v47  ;;  %v6958_v47 = vld [vmem:[%s8260_s7] sm:$0xff] }
 0x3c7   : > { %1884 = vmatprep.subr.mxu0 %v8220_v48  ;;  %v2117_v48 = vld [vmem:[%s8261_s8 + $0x8] sm:$0xff] }
 0x3c8   : > { %1885 = vmatpush2.msra.mxu0 %v8221_v49  ;;  %v2116_v49 = vld [vmem:[%s8261_s8] sm:$0xff]  ;;  %s5336_s8 = smov [#allocation14]  }
 0x3c9   : > { %1886 = vmatprep.subr.mxu0 %v8222_v23 }
 0x3ca   : > { %1887 = vmatpush2.msra.mxu0 %v8223_v60 }
 0x3cb   : > { %1888 = vmatprep.subr.mxu0 %v8224_v25 }
 0x3cc   : > { %1889 = vmatpush2.msra.mxu0 %v8225_v27 }
 0x3cd   : > { %1890 = vmatprep.subr.mxu0 %v8226_v29 }
 0x3ce   : > { %1891 = vmatpush2.msra.mxu0 %v8227_v32 }
 0x3cf   : > { %1892 = vmatprep.subr.mxu0 %v8228_v44 }
 0x3d0   : > { %1893 = vmatpush2.msra.mxu0 %v8229_v11 }
 0x3d1   : > { %1894 = vmatprep.subr.mxu0 %v8230_v35 }
 0x3d2   : > { %1895 = vmatpush2.msra.mxu0 %v8231_v17 }
 0x435   : > { %v1816_v39 = vpop.f32.mrf.mxu1 }
 0x436   : > { %v1817_v50 = vadd.f32 %v1816_v39, %v1673_v37 }
 0x437   : > { %v4674_v51 = vpop.f32.mrf.mxu1 }
 0x438   : > { %vm1822_vm15 = vcmp.ge.f32.partialorder %v1817_v50, 0.0  ;;  %v1825_v62 = vmul.f32 0.01, %v1817_v50 }
 0x43a   : > { %v1828_v61 = vsel %vm1822_vm15, %v1817_v50, %v1825_v62 }
 0x43b   : > { %4346 = vmatmul.mubr.msk.f32.vlgmr.msra.gmra.mxu1 %vm1281_vm2, %v1828_v61 }
 0x43c   : > { %4472 = vmatpush3.msra.mxu1 %v8232_v53 }
 0x43d   : > { %4473 = vmatprep.subr.mxu1 %v8233_v57 }
 0x43e   : > { %4474 = vmatpush3.msra.mxu1 %v8234_v43 }
 0x43f   : > { %4475 = vmatprep.subr.mxu1 %v8235_v9 }
 0x440   : > { %4476 = vmatpush3.msra.mxu1 %v8236_v14 }
 0x441   : > { %4477 = vmatprep.subr.mxu1 %v8237_v59 }
 0x442   : > { %4478 = vmatpush3.msra.mxu1 %v8238_v2 }
 0x443   : > { %4479 = vmatprep.subr.mxu1 %v8239_v0 }
 0x444   : > { %4480 = vmatpush3.msra.mxu1 %v8240_v7 }
 0x445   : > { %4481 = vmatprep.subr.mxu1 %v8241_v40 }
 0x446   : > { %4482 = vmatpush3.msra.mxu1 %v8242_v63 }
 0x447   : > { %4483 = vmatprep.subr.mxu1 %v8243_v3 }
 0x448   : > { %4484 = vmatpush3.msra.mxu1 %v8244_v4 }
 0x449   : > { %4485 = vmatprep.subr.mxu1 %v8245_v5 }
 0x44a   : > { %4486 = vmatpush3.msra.mxu1 %v8246_v6 }
 0x44b   : > { %4487 = vmatprep.subr.mxu1 %v6544_v30 }
 0x44c   : > { %4488 = vmatpush3.msra.mxu1 %v8247_v8 }
 0x44d   : > { %4489 = vmatprep.subr.mxu1 %v6556_v55 }
 0x44e   : > { %4490 = vmatpush3.msra.mxu1 %v6565_v10 }
 0x44f   : > { %4491 = vmatprep.subr.mxu1 %v6575_v52  ;;  %v8251_v52 = vld [vmem:[#allocation80_spill] sm:$0xff] }
 0x450   : > { %4492 = vmatpush3.msra.mxu1 %v6584_v58 }
 0x451   : > { %4493 = vmatprep.subr.mxu1 %v6590_v15 }
 0x452   : > { %4494 = vmatpush3.msra.mxu1 %v6599_v56 }
 0x453   : > { %v1745_v12 = vpop.f32.mrf.mxu0  ;;  %4495 = vmatprep.subr.mxu1 %v6605_v33  ;;  %v8252_v33 = vld [vmem:[#allocation81_spill] sm:$0xff] }
 0x454   : > { %v1746_v13 = vadd.f32 %v1745_v12, %v1673_v37  ;;  %4496 = vmatpush3.msra.mxu1 %v8248_v16 }
 0x455   : > { %v1747_v30 = vpop.f32.mrf.mxu0  ;;  %4497 = vmatprep.subr.mxu1 %v8249_v18 }
 0x456   : > { %v1748_v55 = vadd.f32 %v1747_v30, %v1673_v37  ;;  %4498 = vmatpush3.msra.mxu1 %v8250_v21  ;;  %v1823_v10 = vmul.f32 0.01, %v1746_v13  ;;  %vm1820_vm1 = vcmp.ge.f32.partialorder %v1746_v13, 0.0 }
 0x457   : > { %4499 = vmatprep.subr.mxu1 %v8251_v52  ;;  %v2115_v52 = vld [vmem:[%s8260_s7 + $0x8] sm:$0xff] }
 0x458   : > { %v1824_v58 = vmul.f32 0.01, %v1748_v55  ;;  %4500 = vmatpush3.msra.mxu1 %v6644_v19  ;;  %vm1821_vm11 = vcmp.ge.f32.partialorder %v1748_v55, 0.0  ;;  %v1826_v56 = vsel %vm1820_vm1, %v1746_v13, %v1823_v10  ;;  %v8253_v19 = vld [vmem:[#allocation82_spill] sm:$0xff] }
 0x459   : > { %4501 = vmatprep.subr.mxu1 %v6650_v1  ;;  %v8254_v1 = vld [vmem:[#allocation83_spill] sm:$0xff] }
 0x45a   : > { %4502 = vmatpush3.msra.mxu1 %v6659_v20  ;;  %v1827_v15 = vsel %vm1821_vm11, %v1748_v55, %v1824_v58  ;;  %v8255_v20 = vld [vmem:[#allocation84_spill] sm:$0xff]  ;;  %v2426_v58 = vld [vmem:[#allocation8 + $0xf8] sm:$0xff] }
 0x45b   : > { %1896 = vmatprep.mubr.f32.mxu0 %v1827_v15  ;;  %2038 = vmatprep.mubr.f32.mxu1 %v1827_v15  ;;  %v2410_v15 = vld [vmem:[#allocation8 + $0x78] sm:$0xff] }
 0x45c   : > { %4675 = vmatprep.subr.mxu1 %v8171_v54  ;;  %1897 = vmatmul.mubr.f32.vlgmr.msra.gmra.mxu0 %v1826_v56 }
 0x45d   : > { %2039 = vmatmul.mubr.f32.vlgmr.msra.gmra.mxu1 %v1826_v56  ;;  %4704 = vmatprep.mubr.msk.f32.mxu0 %vm8091_vm14, %v6958_v47  ;;  %v2425_v56 = vld [vmem:[#allocation8 + $0xf0] sm:$0xff] }
 0x45e   : > { %4676 = vmatpush3.msk.msra.mxu1 %vm1285_vm0, %v8252_v33  ;;  %4683 = vmatprep.mubr.msk.f32.mxu1 %vm8092_vm13, %v8171_v54  ;;  %v2409_v33 = vld [vmem:[#allocation8 + $0x70] sm:$0xff] }
 0x45f   : > { %4677 = vmatprep.subr.mxu1 %v8171_v54 }
 0x460   : > { %4678 = vmatpush3.msra.mxu1 %v8253_v19  ;;  %v2424_v19 = vld [vmem:[#allocation8 + $0xe8] sm:$0xff] }
 0x461   : > { %4679 = vmatprep.subr.mxu1 %v8171_v54 }
 0x462   : > { %4680 = vmatpush3.msra.mxu1 %v8254_v1  ;;  %v2408_v1 = vld [vmem:[#allocation8 + $0x68] sm:$0xff] }
 0x463   : > { %4681 = vmatprep.subr.mxu1 %v8171_v54 }
 0x464   : > { %4682 = vmatpush3.msra.mxu1 %v8255_v20  ;;  %v2423_v20 = vld [vmem:[#allocation8 + $0xe0] sm:$0xff] }
 0x465   : > { %4684 = vmatmul.mubr.msk.f32.vlgmr.msra.gmra.mxu1 %vm1281_vm2, %v1828_v61 }
 0x466   : > { %2289 = vmatprep.mubr.f32.mxu1 %v8171_v54 }
 0x4fb   : > { %v1969_v22 = vpop.f32.mrf.mxu1 }
 0x4fd   : > { %v1971_v26 = vpop.f32.mrf.mxu1 }
 0x51c   : > { %v1898_v24 = vpop.f32.mrf.mxu0 }
 0x51d   : > { %v6913_v28 = vadd.f32 %v1969_v22, %v1898_v24  ;;  %v4503_v31 = vpop.f32.mrf.mxu1  ;;  %v2407_v22 = vld [vmem:[#allocation8 + $0x60] sm:$0xff]  ;;  %v2422_v24 = vld [vmem:[#allocation8 + $0xd8] sm:$0xff] }
 0x51e   : > { %v1900_v38 = vpop.f32.mrf.mxu0 }
 0x51f   : > { %2187 = vrot.lane.b32.xlu1 %v6913_v28, %s8164_s29  ;;  %2198 = vrot.lane.b32.xlu0 %v6913_v28, %s8169_s27  ;;  %v4504_v34 = vpop.f32.mrf.mxu1  ;;  %v6927_v42 = vadd.f32 %v1971_v26, %v1900_v38  ;;  %v2406_v26 = vld [vmem:[#allocation8 + $0x58] sm:$0xff]  ;;  %v2419_v38 = vld [vmem:[#allocation8 + $0xc0] sm:$0xff] }
 0x520   : > { %v4505_v45 = vadd.f32 %v4504_v34, %v4503_v31  ;;  %v2405_v31 = vld [vmem:[#allocation8 + $0x50] sm:$0xff]  ;;  %v2420_v34 = vld [vmem:[#allocation8 + $0xc8] sm:$0xff] }
 0x523   : > { %2165 = vrot.lane.b32.xlu1 %v6913_v28, %s8155_s2  ;;  %2176 = vrot.lane.b32.xlu0 %v6913_v28, %s8256_s6 }
 0x525   : > { %v2110_v36 = vpop.f32.mrf.mxu1 }
 0x526   : > { %v6945_v46 = vadd.f32 %v4505_v45, %v2110_v36  ;;  %v2404_v36 = vld [vmem:[#allocation8 + $0x48] sm:$0xff]  ;;  %v2402_v45 = vld [vmem:[#allocation8 + $0x38] sm:$0xff] }
 0x527   : > { %v4685_v41 = vpop.f32.mrf.mxu1  ;;  %2143 = vrot.lane.b32.xlu1 %v6913_v28, %s8257_s0  ;;  %2154 = vrot.lane.b32.xlu0 %v6913_v28, %s8258_s20 }
 0x528   : > { %v2403_v41 = vld [vmem:[#allocation8 + $0x40] sm:$0xff] }
 0x52b   : > { %2132 = vrot.lane.b32.xlu0 %v6913_v28, %s8259_s3  ;;  %2189 = vrot.lane.b32.xlu1 %v6927_v42, %s8164_s29 }
 0x52f   : > { %2167 = vrot.lane.b32.xlu1 %v6927_v42, %s8155_s2  ;;  %2200 = vrot.lane.b32.xlu0 %v6927_v42, %s8169_s27 }
 0x533   : > { %2145 = vrot.lane.b32.xlu1 %v6927_v42, %s8257_s0  ;;  %2178 = vrot.lane.b32.xlu0 %v6927_v42, %s8256_s6 }
 0x537   : > { %2123 = vrot.lane.b32.xlu1 %v6927_v42, %s8196_s5  ;;  %2156 = vrot.lane.b32.xlu0 %v6927_v42, %s8258_s20 }
 0x53b   : > { %2202 = vrot.lane.b32.xlu1 %v6945_v46, %s8169_s27  ;;  %2134 = vrot.lane.b32.xlu0 %v6927_v42, %s8259_s3 }
 0x53f   : > { %2180 = vrot.lane.b32.xlu1 %v6945_v46, %s8256_s6  ;;  %2191 = vrot.lane.b32.xlu0 %v6945_v46, %s8164_s29 }
 0x543   : > { %2158 = vrot.lane.b32.xlu1 %v6945_v46, %s8258_s20  ;;  %2169 = vrot.lane.b32.xlu0 %v6945_v46, %s8155_s2 }
 0x547   : > { %2136 = vrot.lane.b32.xlu1 %v6945_v46, %s8259_s3  ;;  %2147 = vrot.lane.b32.xlu0 %v6945_v46, %s8257_s0 }
 0x54b   : > { %2121 = vrot.lane.b32.xlu1 %v6913_v28, %s8196_s5  ;;  %2125 = vrot.lane.b32.xlu0 %v6945_v46, %s8196_s5 }
 0x54f   : > { %2216 = vperm.xlu1 %4940, %v2117_v48   ;;  %2211 = vperm.xlu0 %4939, %v2116_v49   ;;  %v2416_v48 = vld [vmem:[#allocation8 + $0xa8] sm:$0xff] }
 0x550   : > { %v2400_v49 = vld [vmem:[#allocation8 + $0x28] sm:$0xff] }
 0x591   : > { %v2188_v23 = vpop.permute.xlu1 %2187  ;;  %v2199_v60 = vpop.permute.xlu0 %2198 }
 0x595   : > { %v2166_v25 = vpop.permute.xlu1 %2165  ;;  %v2177_v27 = vpop.permute.xlu0 %2176 }
 0x599   : > { %v2144_v29 = vpop.permute.xlu1 %2143  ;;  %v2155_v32 = vpop.permute.xlu0 %2154 }
 0x59d   : > { %v2133_v44 = vpop.permute.xlu0 %2132  ;;  %v2190_v11 = vpop.permute.xlu1 %2189 }
 0x59e   : > { %v2193_v59 = vsel %vm1122_vm9, %v2188_v23, %v2190_v11  ;;  %v2415_v23 = vld [vmem:[#allocation8 + $0xa0] sm:$0xff] }
 0x5a1   : > { %v2168_v35 = vpop.permute.xlu1 %2167  ;;  %v2201_v17 = vpop.permute.xlu0 %2200 }
 0x5a2   : > { %v2204_v57 = vsel %vm1147_vm10, %v2199_v60, %v2201_v17  ;;  %v2171_v3 = vsel %vm1072_vm7, %v2166_v25, %v2168_v35  ;;  %v2399_v60 = vld [vmem:[#allocation8 + $0x20] sm:$0xff]  ;;  %v2430_v25 = vld [vmem:[#allocation8 + $0x118] sm:$0x3f] }
 0x5a5   : > { %v2146_v37 = vpop.permute.xlu1 %2145  ;;  %v2179_v39 = vpop.permute.xlu0 %2178 }
 0x5a6   : > { %v2182_v40 = vsel %vm1097_vm8, %v2177_v27, %v2179_v39  ;;  %v2149_v13 = vsel %vm1022_vm5, %v2144_v29, %v2146_v37  ;;  %v2414_v27 = vld [vmem:[#allocation8 + $0x98] sm:$0xff] }
 0x5a7   : > { %v2398_v29 = vld [vmem:[#allocation8 + $0x18] sm:$0xff] }
 0x5a9   : > { %v2124_v50 = vpop.permute.xlu1 %2123  ;;  %v2157_v51 = vpop.permute.xlu0 %2156 }
 0x5aa   : > { %v2160_v8 = vsel %vm1047_vm6, %v2155_v32, %v2157_v51  ;;  %v2429_v32 = vld [vmem:[#allocation8 + $0x110] sm:$0xff] }
 0x5ad   : > { %v2203_v62 = vpop.permute.xlu1 %2202  ;;  %v2135_v61 = vpop.permute.xlu0 %2134 }
 0x5ae   : > { %4686 = vmatprep.subr.mxu0 %v2203_v62  ;;  %v2205_v53 = vsel %vm1147_vm10, %v2201_v17, %v2203_v62  ;;  %v2138_v55 = vsel %vm997_vm4, %v2133_v44, %v2135_v61  ;;  %v2413_v44 = vld [vmem:[#allocation8 + $0x90] sm:$0xff]  ;;  %v2412_v17 = vld [vmem:[#allocation8 + $0x88] sm:$0xff] }
 0x5af   : > { %2239 = vmatprep.subr.mxu1 %v2205_v53  ;;  %4687 = vmatpush3.msra.mxu0 %v2203_v62 }
 0x5b0   : > { %2240 = vmatpush1.msra.mxu1 %v2204_v57 }
 0x5b1   : > { %v2181_v43 = vpop.permute.xlu1 %2180  ;;  %v2192_v9 = vpop.permute.xlu0 %2191 }
 0x5b2   : > { %4688 = vmatprep.subr.mxu0 %v2192_v9  ;;  %v2194_v14 = vsel %vm1122_vm9, %v2190_v11, %v2192_v9  ;;  %v2183_v2 = vsel %vm1097_vm8, %v2179_v39, %v2181_v43  ;;  %v2397_v11 = vld [vmem:[#allocation8 + $0x10] sm:$0xff]  ;;  %v2427_v39 = vld [vmem:[#allocation8 + $0x100] sm:$0xff] }
 0x5b3   : > { %2241 = vmatprep.subr.mxu1 %v2194_v14  ;;  %4689 = vmatpush3.msra.mxu0 %v2192_v9 }
 0x5b4   : > { %2242 = vmatpush1.msra.mxu1 %v2193_v59  ;;  %4690 = vmatprep.subr.mxu0 %v2181_v43 }
 0x5b5   : > { %v2159_v0 = vpop.permute.xlu1 %2158  ;;  %2243 = vmatprep.subr.mxu1 %v2183_v2  ;;  %4691 = vmatpush3.msra.mxu0 %v2181_v43  ;;  %v2170_v7 = vpop.permute.xlu0 %2169 }
 0x5b6   : > { %2244 = vmatpush1.msra.mxu1 %v2182_v40  ;;  %4692 = vmatprep.subr.mxu0 %v2170_v7  ;;  %v2172_v63 = vsel %vm1072_vm7, %v2168_v35, %v2170_v7  ;;  %v2161_v4 = vsel %vm1047_vm6, %v2157_v51, %v2159_v0  ;;  %v2428_v35 = vld [vmem:[#allocation8 + $0x108] sm:$0xff]  ;;  %v2395_v51 = vld [vmem:[#allocation8] sm:$0xff] }
 0x5b7   : > { %2245 = vmatprep.subr.mxu1 %v2172_v63  ;;  %4693 = vmatpush3.msra.mxu0 %v2170_v7 }
 0x5b8   : > { %2246 = vmatpush1.msra.mxu1 %v2171_v3  ;;  %4694 = vmatprep.subr.mxu0 %v2159_v0 }
 0x5b9   : > { %v2137_v5 = vpop.permute.xlu1 %2136  ;;  %2247 = vmatprep.subr.mxu1 %v2161_v4  ;;  %4695 = vmatpush3.msra.mxu0 %v2159_v0  ;;  %v2148_v6 = vpop.permute.xlu0 %2147 }
 0x5ba   : > { %2248 = vmatpush1.msra.mxu1 %v2160_v8  ;;  %4696 = vmatprep.subr.mxu0 %v2148_v6  ;;  %v2150_v12 = vsel %vm1022_vm5, %v2146_v37, %v2148_v6  ;;  %v2139_v16 = vsel %vm997_vm4, %v2135_v61, %v2137_v5  ;;  %v2396_v37 = vld [vmem:[#allocation8 + $0x8] sm:$0xff] }
 0x5bb   : > { %2249 = vmatprep.subr.mxu1 %v2150_v12  ;;  %4697 = vmatpush3.msra.mxu0 %v2148_v6 }
 0x5bc   : > { %2250 = vmatpush1.msra.mxu1 %v2149_v13  ;;  %4698 = vmatprep.subr.mxu0 %v2137_v5 }
 0x5bd   : > { %v2122_v30 = vpop.permute.xlu1 %2121  ;;  %2251 = vmatprep.subr.mxu1 %v2139_v16  ;;  %4699 = vmatpush3.msra.mxu0 %v2137_v5  ;;  %v2126_v18 = vpop.permute.xlu0 %2125 }
 0x5be   : > { %v2127_v21 = vsel %vm972_vm3, %v2122_v30, %v2124_v50  ;;  %2252 = vmatpush1.msra.mxu1 %v2138_v55  ;;  %4700 = vmatprep.subr.mxu0 %v2126_v18  ;;  %v2128_v10 = vsel %vm972_vm3, %v2124_v50, %v2126_v18  ;;  %v2411_v50 = vld [vmem:[#allocation8 + $0x80] sm:$0xff] }
 0x5bf   : > { %2253 = vmatprep.subr.mxu1 %v2128_v10  ;;  %4701 = vmatpush3.msra.mxu0 %v2126_v18 }
 0x5c0   : > { %2254 = vmatpush1.msra.mxu1 %v2127_v21  ;;  %4702 = vmatprep.subr.mxu0 %v6945_v46 }
 0x5c1   : > { %2255 = vmatprep.subr.mxu1 %v6927_v42  ;;  %4703 = vmatpush3.msra.mxu0 %v6945_v46  ;;  %v2418_v42 = vld [vmem:[#allocation8 + $0xb8] sm:$0xff]  ;;  %v2417_v46 = vld [vmem:[#allocation8 + $0xb0] sm:$0xff] }
 0x5c2   : > { %2256 = vmatpush1.msra.mxu1 %v6913_v28  ;;  %4705 = vmatmul.mubr.msk.f32.vlgmr.msra.gmra.mxu0 %vm8091_vm14, %v2115_v52  ;;  %v2421_v28 = vld [vmem:[#allocation8 + $0xd0] sm:$0xff] }
 0x5c3   : > { %4349 = vmatmul.mubr.msk.f32.vlgmr.msra.gmra.mxu1 %vm8091_vm14, %v6958_v47  ;;  %4522 = vmatprep.subr.mxu1 %v2426_v58  ;;  %v2401_v47 = vld [vmem:[#allocation8 + $0x30] sm:$0xff] }
 0x5c4   : > { %2295 = vmatprep.mubr.f32.mxu1 %v8171_v54  ;;  %4523 = vmatpush3.msra.mxu1 %v2410_v15 }
 0x5c5   : > { %4524 = vmatprep.subr.mxu1 %v2425_v56  ;;  %4707 = vmatprep.subr.msk.mxu0 %vm1285_vm0, %v2430_v25 }
 0x5c6   : > { %4525 = vmatpush3.msra.mxu1 %v2409_v33  ;;  %4708 = vmatpush3.msk.msra.mxu0 %vm1285_vm0, %v2430_v25 }
 0x5c7   : > { %4350 = vmatmul.mubr.msk.f32.gmra.mxu1 %vm8091_vm14, %v2115_v52  ;;  %4526 = vmatprep.subr.mxu1 %v2424_v19 }
 0x5c8   : > { %4527 = vmatpush3.msra.mxu1 %v2408_v1  ;;  %4709 = vmatprep.subr.mxu0 %v2429_v32 }
 0x5c9   : > { %4528 = vmatprep.subr.mxu1 %v2423_v20  ;;  %4710 = vmatpush3.msra.mxu0 %v2429_v32 }
 0x5ca   : > { %4529 = vmatpush3.msra.mxu1 %v2407_v22  ;;  %4711 = vmatprep.subr.mxu0 %v2428_v35  ;;  %v2217_v62 = vpop.permute.xlu1 %2216  ;;  %v2212_v53 = vpop.permute.xlu0 %2211 }
 0x5cb   : > { %4530 = vmatprep.subr.mxu1 %v2422_v24  ;;  %4712 = vmatpush3.msra.mxu0 %v2428_v35 }
 0x5cc   : > { %4531 = vmatpush3.msra.mxu1 %v2406_v26  ;;  %4713 = vmatprep.subr.mxu0 %v2427_v39  ;;  %v2591_v26 = vld [vmem:[%s8262_s10 + $0x8] sm:$0xff] }
 0x5cd   : > { %4532 = vmatprep.subr.mxu1 %v2421_v28  ;;  %4714 = vmatpush3.msra.mxu0 %v2427_v39  ;;  %v2595_v28 = vld [vmem:[%s8263_s11 + $0x8] sm:$0xff] }
 0x5ce   : > { %4533 = vmatpush3.msra.mxu1 %v2405_v31  ;;  %2663 = vmatprep.subr.mxu0 %v8171_v54  ;;  %v2753_v31 = vld [vmem:[#allocation9 + $0x48] sm:$0x3f] }
 0x5cf   : > { %4534 = vmatprep.subr.mxu1 %v2420_v34  ;;  %v2752_v34 = vld [vmem:[#allocation9 + $0x40] sm:$0xff] }
 0x5d0   : > { %4535 = vmatpush3.msra.mxu1 %v2404_v36  ;;  %v2594_v36 = vld [vmem:[%s8263_s11] sm:$0xff] }
 0x5d1   : > { %4536 = vmatprep.subr.mxu1 %v2419_v38  ;;  %v2751_v38 = vld [vmem:[#allocation9 + $0x38] sm:$0xff] }
 0x5d2   : > { %4537 = vmatpush3.msra.mxu1 %v2403_v41  ;;  %v2750_v41 = vld [vmem:[#allocation9 + $0x30] sm:$0xff] }
 0x5d3   : > { %4538 = vmatprep.subr.mxu1 %v2418_v42  ;;  %v2749_v42 = vld [vmem:[#allocation9 + $0x28] sm:$0xff] }
 0x5d4   : > { %4539 = vmatpush3.msra.mxu1 %v2402_v45 }
 0x5d5   : > { %4540 = vmatprep.subr.mxu1 %v2417_v46 }
 0x5d6   : > { %4541 = vmatpush3.msra.mxu1 %v2401_v47 }
 0x5d7   : > { %4542 = vmatprep.subr.mxu1 %v2416_v48 }
 0x5d8   : > { %4543 = vmatpush3.msra.mxu1 %v2400_v49 }
 0x5d9   : > { %4544 = vmatprep.subr.mxu1 %v2415_v23 }
 0x5da   : > { %4545 = vmatpush3.msra.mxu1 %v2399_v60 }
 0x5db   : > { %4546 = vmatprep.subr.mxu1 %v2414_v27 }
 0x5dc   : > { %4547 = vmatpush3.msra.mxu1 %v2398_v29 }
 0x5dd   : > { %4548 = vmatprep.subr.mxu1 %v2413_v44 }
 0x5de   : > { %4549 = vmatpush3.msra.mxu1 %v2397_v11 }
 0x5df   : > { %4550 = vmatprep.subr.mxu1 %v2412_v17 }
 0x5e0   : > { %4551 = vmatpush3.msra.mxu1 %v2396_v37  ;;  %v2590_v37 = vld [vmem:[%s8262_s10] sm:$0xff] }
 0x5e1   : > { %4552 = vmatprep.subr.mxu1 %v2411_v50  ;;  %v2593_v50 = vld [vmem:[%s8262_s10 + $0x18] sm:$0xff] }
 0x5e2   : > { %4553 = vmatpush3.msra.mxu1 %v2395_v51  ;;  %v2592_v51 = vld [vmem:[%s8262_s10 + $0x10] sm:$0xff] }
 0x5e3   : > { %4718 = vmatprep.subr.msk.mxu1 %vm1285_vm0, %v2753_v31 }
 0x682   : > { %v4706_v61 = vpop.f32.mrf.mxu0 }
 0x683   : > { %v2374_v57 = vadd.f32 %v4706_v61, %v2217_v62  ;;  %v2291_v43 = vpop.f32.mrf.mxu1  ;;  %v2747_v61 = vld [vmem:[#allocation9 + $0x18] sm:$0xff] }
 0x684   : > { %v2292_v9 = vadd.f32 %v2291_v43, %v2212_v53  ;;  %v2368_v14 = vpop.f32.mrf.mxu0  ;;  %v2744_v43 = vld [vmem:[#allocation9] sm:$0xff] }
 0x685   : > { %v2369_v59 = vadd.f32 %v2368_v14, %v2212_v53  ;;  %v2293_v2 = vpop.f32.mrf.mxu1  ;;  %v2388_v0 = vmul.f32 0.01, %v2374_v57  ;;  %vm2382_vm12 = vcmp.ge.f32.partialorder %v2374_v57, 0.0 }
 0x686   : > { %v2294_v7 = vadd.f32 %v2293_v2, %v2212_v53  ;;  %v2383_v40 = vmul.f32 0.01, %v2292_v9  ;;  %vm2377_vm1 = vcmp.ge.f32.partialorder %v2292_v9, 0.0  ;;  %v2746_v53 = vld [vmem:[#allocation9 + $0x10] sm:$0xff] }
 0x687   : > { %vm2379_vm15 = vcmp.ge.f32.partialorder %v2369_v59, 0.0  ;;  %v2385_v63 = vmul.f32 0.01, %v2369_v59  ;;  %v2297_v3 = vpop.f32.mrf.mxu1  ;;  %v2394_v12 = vsel %vm2382_vm12, %v2374_v57, %v2388_v0  ;;  %v2745_v57 = vld [vmem:[#allocation9 + $0x8] sm:$0xff] }
 0x688   : > { %v2384_v4 = vmul.f32 0.01, %v2294_v7  ;;  %v2298_v5 = vadd.f32 %v2297_v3, %v2217_v62  ;;  %vm2378_vm11 = vcmp.ge.f32.partialorder %v2294_v7, 0.0  ;;  %v2389_v30 = vsel %vm2377_vm1, %v2292_v9, %v2383_v40  ;;  %v2876_v9 = vld [vmem:[#allocation11 + $0x128] sm:$0xf] }
 0x689   : > { %v2299_v6 = vpop.f32.mrf.mxu1  ;;  %v2391_v8 = vsel %vm2379_vm15, %v2369_v59, %v2385_v63  ;;  %vm2754_vm15 = vcmask 637952  }
 0x68a   : > { %v2300_v13 = vadd.f32 %v2299_v6, %v2217_v62  ;;  %4715 = vmatprep.mubr.msk.f32.mxu0 %vm1281_vm2, %v2391_v8  ;;  %v2390_v16 = vsel %vm2378_vm11, %v2294_v7, %v2384_v4  ;;  %v2386_v18 = vmul.f32 0.01, %v2298_v5  ;;  %vm2380_vm13 = vcmp.ge.f32.partialorder %v2298_v5, 0.0  ;;  %v2748_v62 = vld [vmem:[#allocation9 + $0x20] sm:$0xff]  ;;  %v2875_v8 = vld [vmem:[#allocation11 + $0x120] sm:$0xf] }
 0x68b   : > { %2504 = vmatprep.mubr.f32.mxu1 %v2390_v16  ;;  %4716 = vmatmul.mubr.msk.f32.vlgmr.msra.gmra.mxu0 %vm1281_vm2, %v2394_v12  ;;  %v2872_v16 = vld [vmem:[#allocation11 + $0x108] sm:$0xff]  ;;  %vm2878_vm11 = vcmask 818176  }
 0x68c   : > { %v2387_v55 = vmul.f32 0.01, %v2300_v13  ;;  %2505 = vmatmul.mubr.f32.vlgmr.msra.gmra.mxu1 %v2389_v30  ;;  %vm2381_vm14 = vcmp.ge.f32.partialorder %v2300_v13, 0.0  ;;  %v2392_v10 = vsel %vm2380_vm13, %v2298_v5, %v2386_v18  ;;  %vm2656_vm13 = vcmask 130048   ;;  %v2870_v30 = vld [vmem:[#allocation11 + $0xf8] sm:$0xff]  ;;  %v2869_v18 = vld [vmem:[#allocation11 + $0xf0] sm:$0xff] }
 0x68d   : > { %4356 = vmatprep.mubr.msk.f32.mxu0 %vm2656_vm13, %v2591_v26  ;;  %4719 = vmatpush3.msk.msra.mxu1 %vm1285_vm0, %v2753_v31  ;;  %v2848_v26 = vld [vmem:[#allocation11 + $0x48] sm:$0xff]  ;;  %v2845_v31 = vld [vmem:[#allocation11 + $0x30] sm:$0xff] }
 0x68e   : > { %v2393_v21 = vsel %vm2381_vm14, %v2300_v13, %v2387_v55  ;;  %4720 = vmatprep.subr.mxu1 %v2752_v34  ;;  %vm2885_vm14 = vcmask 1043456   ;;  %v2873_v13 = vld [vmem:[#allocation11 + $0x110] sm:$0xff]  ;;  %v2867_v55 = vld [vmem:[#allocation11 + $0xe0] sm:$0xff] }
 0x68f   : > { %2509 = vmatprep.mubr.f32.mxu1 %v2393_v21  ;;  %4721 = vmatpush3.msra.mxu1 %v2752_v34  ;;  %v2866_v21 = vld [vmem:[#allocation11 + $0xd8] sm:$0xff]  ;;  %v2843_v34 = vld [vmem:[#allocation11 + $0x20] sm:$0xff] }
 0x690   : > { %2510 = vmatmul.mubr.f32.gmra.mxu1 %v2392_v10  ;;  %4722 = vmatprep.subr.mxu1 %v2751_v38  ;;  %v2864_v10 = vld [vmem:[#allocation11 + $0xc8] sm:$0xff] }
 0x691   : > { %4723 = vmatpush3.msra.mxu1 %v2751_v38  ;;  %v2840_v38 = vld [vmem:[#allocation11 + $0x8] sm:$0xff] }
 0x692   : > { %4724 = vmatprep.subr.mxu1 %v2750_v41 }
 0x693   : > { %4725 = vmatpush3.msra.mxu1 %v2750_v41  ;;  %v2839_v41 = vld [vmem:[#allocation11] sm:$0xff] }
 0x694   : > { %4726 = vmatprep.subr.mxu1 %v2749_v42 }
 0x695   : > { %4727 = vmatpush3.msra.mxu1 %v2749_v42  ;;  %v2877_v42 = vld [vmem:[#allocation11 + $0x130] sm:$0xf] }
 0x696   : > { %4728 = vmatprep.subr.mxu1 %v2748_v62 }
 0x697   : > { %4729 = vmatpush3.msra.mxu1 %v2748_v62 }
 0x698   : > { %4730 = vmatprep.subr.mxu1 %v2747_v61 }
 0x699   : > { %4731 = vmatpush3.msra.mxu1 %v2747_v61  ;;  %v3048_v61 = vld [vmem:[%s7995_s14 + $0x8] sm:$0xff] }
 0x69a   : > { %4732 = vmatprep.subr.mxu1 %v2746_v53 }
 0x69b   : > { %4733 = vmatpush3.msra.mxu1 %v2746_v53  ;;  %v3049_v53 = vld [vmem:[%s7996_s15] sm:$0xff] }
 0x69c   : > { %4734 = vmatprep.subr.mxu1 %v2745_v57 }
 0x69d   : > { %4735 = vmatpush3.msra.mxu1 %v2745_v57 }
 0x69e   : > { %4736 = vmatprep.subr.mxu1 %v2744_v43 }
 0x69f   : > { %4737 = vmatpush3.msra.mxu1 %v2744_v43 }
 0x6a0   : > { %4361 = vmatprep.subr.msk.mxu1 %vm2885_vm14, %v2876_v9 }
 0x74b   : > { %v4717_v52 = vpop.f32.mrf.mxu0 }
 0x74c   : > { %v4554_v58 = vpop.f32.mrf.mxu1 }
 0x74d   : > { %v2581_v33 = vpop.f32.mrf.mxu0 }
 0x74e   : > { %v4555_v15 = vpop.f32.mrf.mxu1 }
 0x74f   : > { %v4556_v56 = vadd.f32 %v4555_v15, %v4554_v58  ;;  %v2861_v58 = vld [vmem:[#allocation11 + $0xb0] sm:$0xff]  ;;  %v2860_v15 = vld [vmem:[#allocation11 + $0xa8] sm:$0xff] }
 0x750   : > { %v4557_v19 = vpop.f32.mrf.mxu1 }
 0x751   : > { %v7013_v1 = vadd.f32 %v4556_v56, %v2581_v33  ;;  %v2858_v56 = vld [vmem:[#allocation11 + $0x98] sm:$0xff]  ;;  %v2857_v33 = vld [vmem:[#allocation11 + $0x90] sm:$0xff] }
 0x752   : > { %v4558_v20 = vpop.f32.mrf.mxu1 }
 0x753   : > { %v4559_v22 = vadd.f32 %v4558_v20, %v4557_v19  ;;  %2634 = vrot.lane.b32.xlu1 %v7013_v1, %s5330_s9  ;;  %v2855_v19 = vld [vmem:[#allocation11 + $0x80] sm:$0xff]  ;;  %v2852_v20 = vld [vmem:[#allocation11 + $0x68] sm:$0xff] }
 0x755   : > { %v7016_v24 = vadd.f32 %v4717_v52, %v4559_v22  ;;  %v2863_v52 = vld [vmem:[#allocation11 + $0xc0] sm:$0xff] }
 0x756   : > { %v2851_v22 = vld [vmem:[#allocation11 + $0x60] sm:$0xff] }
 0x757   : > { %2636 = vrot.lane.b32.xlu0 %v7016_v24, %s5330_s9  ;;  %2628 = vrot.lane.b32.xlu1 %v7013_v1, %s8155_s2  ;;  %s5334_s9 = smov 106  }
 0x75b   : > { %2630 = vrot.lane.b32.xlu0 %v7016_v24, %s8155_s2  ;;  %2622 = vrot.lane.b32.xlu1 %v7013_v1, %s5331_s24 }
 0x75f   : > { %2624 = vrot.lane.b32.xlu0 %v7016_v24, %s5331_s24  ;;  %2616 = vrot.lane.b32.xlu1 %v7013_v1, %s5332_s1 }
 0x763   : > { %2618 = vrot.lane.b32.xlu0 %v7016_v24, %s5332_s1  ;;  %2610 = vrot.lane.b32.xlu1 %v7013_v1, %s5333_s30 }
 0x767   : > { %2612 = vrot.lane.b32.xlu0 %v7016_v24, %s5333_s30  ;;  %2604 = vrot.lane.b32.xlu1 %v7013_v1, %s8259_s3 }
 0x76b   : > { %2606 = vrot.lane.b32.xlu0 %v7016_v24, %s8259_s3  ;;  %2598 = vrot.lane.b32.xlu1 %v7013_v1, %s8196_s5 }
 0x76f   : > { %2600 = vrot.lane.b32.xlu0 %v7016_v24, %s8196_s5  ;;  %2640 = vrot.lane.b32.xlu1 %v7013_v1, %s5334_s9 }
 0x773   : > { %2642 = vrot.lane.b32.xlu0 %v7016_v24, %s5334_s9  ;;  %2653 = vperm.xlu1 %4940, %v2595_v28   ;;  %v2846_v28 = vld [vmem:[#allocation11 + $0x38] sm:$0xff] }
 0x777   : > { %2648 = vperm.xlu0 %4939, %v2594_v36   ;;  %v2842_v36 = vld [vmem:[#allocation11 + $0x18] sm:$0xff] }
 0x7c5   : > { %v2635_v45 = vpop.permute.xlu1 %2634 }
 0x7c9   : > { %v2637_v46 = vpop.permute.xlu0 %2636  ;;  %v2629_v47 = vpop.permute.xlu1 %2628 }
 0x7ca   : > { %2664 = vmatpush1.msra.mxu0 %v2637_v46 }
 0x7cb   : > { %2665 = vmatprep.subr.mxu0 %v8171_v54 }
 0x7cc   : > { %2666 = vmatpush1.msra.mxu0 %v2635_v45 }
 0x7cd   : > { %v2631_v48 = vpop.permute.xlu0 %2630  ;;  %2667 = vmatprep.subr.mxu0 %v8171_v54  ;;  %v2623_v49 = vpop.permute.xlu1 %2622 }
 0x7ce   : > { %2668 = vmatpush1.msra.mxu0 %v2631_v48  ;;  %v2871_v48 = vld [vmem:[#allocation11 + $0x100] sm:$0xff] }
 0x7cf   : > { %2669 = vmatprep.subr.mxu0 %v8171_v54 }
 0x7d0   : > { %2670 = vmatpush1.msra.mxu0 %v2629_v47  ;;  %v2874_v47 = vld [vmem:[#allocation11 + $0x118] sm:$0xff] }
 0x7d1   : > { %v2625_v23 = vpop.permute.xlu0 %2624  ;;  %2671 = vmatprep.subr.mxu0 %v8171_v54  ;;  %v2617_v60 = vpop.permute.xlu1 %2616 }
 0x7d2   : > { %2672 = vmatpush1.msra.mxu0 %v2625_v23  ;;  %v2865_v23 = vld [vmem:[#allocation11 + $0xd0] sm:$0xff] }
 0x7d3   : > { %2673 = vmatprep.subr.mxu0 %v8171_v54 }
 0x7d4   : > { %2674 = vmatpush1.msra.mxu0 %v2623_v49  ;;  %v2868_v49 = vld [vmem:[#allocation11 + $0xe8] sm:$0xff] }
 0x7d5   : > { %v2619_v25 = vpop.permute.xlu0 %2618  ;;  %2675 = vmatprep.subr.mxu0 %v8171_v54  ;;  %v2611_v27 = vpop.permute.xlu1 %2610 }
 0x7d6   : > { %2676 = vmatpush1.msra.mxu0 %v2619_v25  ;;  %v2859_v25 = vld [vmem:[#allocation11 + $0xa0] sm:$0xff] }
 0x7d7   : > { %2677 = vmatprep.subr.mxu0 %v8171_v54 }
 0x7d8   : > { %2678 = vmatpush1.msra.mxu0 %v2617_v60  ;;  %v2862_v60 = vld [vmem:[#allocation11 + $0xb8] sm:$0xff] }
 0x7d9   : > { %v2613_v29 = vpop.permute.xlu0 %2612  ;;  %2679 = vmatprep.subr.mxu0 %v8171_v54  ;;  %v2605_v32 = vpop.permute.xlu1 %2604 }
 0x7da   : > { %2680 = vmatpush1.msra.mxu0 %v2613_v29  ;;  %v2853_v29 = vld [vmem:[#allocation11 + $0x70] sm:$0xff] }
 0x7db   : > { %2681 = vmatprep.subr.mxu0 %v8171_v54 }
 0x7dc   : > { %2682 = vmatpush1.msra.mxu0 %v2611_v27  ;;  %v2856_v27 = vld [vmem:[#allocation11 + $0x88] sm:$0xff] }
 0x7dd   : > { %v2607_v44 = vpop.permute.xlu0 %2606  ;;  %2683 = vmatprep.subr.mxu0 %v8171_v54  ;;  %v2599_v35 = vpop.permute.xlu1 %2598 }
 0x7de   : > { %2684 = vmatpush1.msra.mxu0 %v2607_v44  ;;  %v2847_v44 = vld [vmem:[#allocation11 + $0x40] sm:$0xff] }
 0x7df   : > { %2685 = vmatprep.subr.mxu0 %v8171_v54 }
 0x7e0   : > { %2686 = vmatpush1.msra.mxu0 %v2605_v32  ;;  %v2850_v32 = vld [vmem:[#allocation11 + $0x58] sm:$0xff] }
 0x7e1   : > { %v2601_v11 = vpop.permute.xlu0 %2600  ;;  %2687 = vmatprep.subr.mxu0 %v8171_v54  ;;  %v2641_v39 = vpop.permute.xlu1 %2640 }
 0x7e2   : > { %2688 = vmatpush1.msra.mxu0 %v2601_v11  ;;  %v2844_v11 = vld [vmem:[#allocation11 + $0x28] sm:$0xff] }
 0x7e3   : > { %2689 = vmatprep.subr.mxu0 %v8171_v54 }
 0x7e4   : > { %2690 = vmatpush1.msra.mxu0 %v2599_v35  ;;  %v2841_v35 = vld [vmem:[#allocation11 + $0x10] sm:$0xff] }
 0x7e5   : > { %2691 = vmatprep.subr.mxu0 %v8171_v54  ;;  %v2643_v17 = vpop.permute.xlu0 %2642 }
 0x7e6   : > { %2692 = vmatpush1.msra.mxu0 %v7016_v24  ;;  %v2849_v24 = vld [vmem:[#allocation11 + $0x50] sm:$0xff] }
 0x7e7   : > { %2693 = vmatprep.subr.mxu0 %v8171_v54 }
 0x7e8   : > { %2694 = vmatpush1.msra.mxu0 %v7013_v1  ;;  %v2854_v1 = vld [vmem:[#allocation11 + $0x78] sm:$0xff] }
 0x7e9   : > { %2723 = vmatprep.subr.mxu0 %v8171_v54 }
 0x7ea   : > { %2724 = vmatpush2.msra.mxu0 %v2643_v17 }
 0x7eb   : > { %2725 = vmatprep.subr.mxu0 %v8171_v54 }
 0x7ec   : > { %2726 = vmatpush2.msra.mxu0 %v2641_v39 }
 0x7ed   : > { %2728 = vmatmul.mubr.f32.vlgmr.msra.gmra.mxu0 %v2590_v37  ;;  %3311 = vmatprep.subr.mxu0 %v8171_v54 }
 0x7ee   : > { %4357 = vmatprep.mubr.msk.f32.mxu0 %vm2656_vm13, %v2593_v50  ;;  %v2654_v40 = vpop.permute.xlu1 %2653 }
 0x7f1   : > { %2733 = vmatmul.mubr.f32.gmra.mxu0 %v2592_v51 }
 0x7f2   : > { %v2649_v14 = vpop.permute.xlu0 %2648  ;;  %4369 = vmatprep.mubr.msk.f32.mxu0 %vm2656_vm13, %v3048_v61 }
 0x8ad   : > { %v2729_v59 = vpop.f32.mrf.mxu0 }
 0x8ae   : > { %v2730_v2 = vadd.f32 %v2729_v59, %v2649_v14 }
 0x8af   : > { %v2731_v0 = vpop.f32.mrf.mxu0 }
 0x8b0   : > { %vm2738_vm12 = vcmp.ge.f32.partialorder %v2730_v2, 0.0  ;;  %v2740_v7 = vmul.f32 0.01, %v2730_v2 }
 0x8b1   : > { %v2734_v63 = vpop.f32.mrf.mxu0 }
 0x8b2   : > { %v2735_v3 = vadd.f32 %v2734_v63, %v2654_v40  ;;  %v2742_v4 = vsel %vm2738_vm12, %v2730_v2, %v2740_v7 }
 0x8b3   : > { %v2736_v5 = vpop.f32.mrf.mxu0  ;;  %4738 = vmatprep.mubr.msk.f32.mxu1 %vm2754_vm15, %v2742_v4 }
 0x8b4   : > { %vm2739_vm1 = vcmp.ge.f32.partialorder %v2735_v3, 0.0  ;;  %v2741_v6 = vmul.f32 0.01, %v2735_v3 }
 0x8b6   : > { %v2743_v12 = vsel %vm2739_vm1, %v2735_v3, %v2741_v6 }
 0x8b7   : > { %4739 = vmatmul.mubr.msk.f32.vlgmr.msra.gmra.mxu1 %vm2754_vm15, %v2743_v12  ;;  %vm8264_vm15 = vmmov 0  }
 0x8b8   : > { %4362 = vmatpush1.msk.msra.mxu1 %vm2885_vm14, %v2875_v8  ;;  %2959 = vmatprep.mubr.f32.mxu1 %v8171_v54 }
 0x8b9   : > { %2903 = vmatprep.subr.mxu1 %v2873_v13 }
 0x8ba   : > { %2904 = vmatpush1.msra.mxu1 %v2872_v16 }
 0x8bb   : > { %2905 = vmatprep.subr.mxu1 %v2870_v30 }
 0x8bc   : > { %2906 = vmatpush1.msra.mxu1 %v2869_v18 }
 0x8bd   : > { %2907 = vmatprep.subr.mxu1 %v2867_v55 }
 0x8be   : > { %2908 = vmatpush1.msra.mxu1 %v2866_v21 }
 0x8bf   : > { %2909 = vmatprep.subr.mxu1 %v2864_v10 }
 0x8c0   : > { %2910 = vmatpush1.msra.mxu1 %v2863_v52 }
 0x8c1   : > { %2911 = vmatprep.subr.mxu1 %v2861_v58 }
 0x8c2   : > { %2912 = vmatpush1.msra.mxu1 %v2860_v15 }
 0x8c3   : > { %2913 = vmatprep.subr.mxu1 %v2858_v56 }
 0x8c4   : > { %2914 = vmatpush1.msra.mxu1 %v2857_v33 }
 0x8c5   : > { %2915 = vmatprep.subr.mxu1 %v2855_v19 }
 0x8c6   : > { %2916 = vmatpush1.msra.mxu1 %v2854_v1 }
 0x8c7   : > { %2917 = vmatprep.subr.mxu1 %v2852_v20 }
 0x8c8   : > { %2918 = vmatpush1.msra.mxu1 %v2851_v22 }
 0x8c9   : > { %2919 = vmatprep.subr.mxu1 %v2849_v24 }
 0x8ca   : > { %2920 = vmatpush1.msra.mxu1 %v2848_v26 }
 0x8cb   : > { %2921 = vmatprep.subr.mxu1 %v2846_v28 }
 0x8cc   : > { %2922 = vmatpush1.msra.mxu1 %v2845_v31 }
 0x8cd   : > { %2923 = vmatprep.subr.mxu1 %v2843_v34 }
 0x8ce   : > { %2924 = vmatpush1.msra.mxu1 %v2842_v36 }
 0x8cf   : > { %2925 = vmatprep.subr.mxu1 %v2840_v38 }
 0x8d0   : > { %2926 = vmatpush1.msra.mxu1 %v2839_v41 }
 0x8d1   : > { %4741 = vmatprep.subr.msk.mxu1 %vm2885_vm14, %v2877_v42 }
 0x977   : > { %v4740_v45 = vpop.f32.mrf.mxu1 }
 0x979   : > { %v2830_v46 = vpop.f32.mrf.mxu1 }
 0x97a   : > { %4363 = vmatmul.mubr.msk.f32.vlgmr.msra.gmra.mxu1 %vm2878_vm11, %v2830_v46 }
 0x97b   : > { %4742 = vmatpush3.msk.msra.mxu1 %vm2885_vm14, %v2877_v42  ;;  %2965 = vmatprep.mubr.f32.mxu1 %v8171_v54 }
 0x97c   : > { %4743 = vmatprep.subr.mxu1 %v2874_v47 }
 0x97d   : > { %4744 = vmatpush3.msra.mxu1 %v2874_v47 }
 0x97e   : > { %4745 = vmatprep.subr.mxu1 %v2871_v48  ;;  %4364 = vmatmul.mubr.msk.f32.gmra.mxu1 %vm2878_vm11, %v4740_v45 }
 0x97f   : > { %4746 = vmatpush3.msra.mxu1 %v2871_v48  ;;  %4767 = vmatprep.mubr.msk.f32.mxu1 %vm2878_vm11, %v2830_v46 }
 0x980   : > { %4747 = vmatprep.subr.mxu1 %v2868_v49 }
 0x981   : > { %4748 = vmatpush3.msra.mxu1 %v2868_v49 }
 0x982   : > { %4749 = vmatprep.subr.mxu1 %v2865_v23 }
 0x983   : > { %4750 = vmatpush3.msra.mxu1 %v2865_v23 }
 0x984   : > { %4751 = vmatprep.subr.mxu1 %v2862_v60 }
 0x985   : > { %4752 = vmatpush3.msra.mxu1 %v2862_v60 }
 0x986   : > { %4753 = vmatprep.subr.mxu1 %v2859_v25 }
 0x987   : > { %4754 = vmatpush3.msra.mxu1 %v2859_v25  ;;  %v7259_v25 = vld [vmem:[%s7995_s14] sm:$0xff] }
 0x988   : > { %4755 = vmatprep.subr.mxu1 %v2856_v27 }
 0x989   : > { %4756 = vmatpush3.msra.mxu1 %v2856_v27 }
 0x98a   : > { %4757 = vmatprep.subr.mxu1 %v2853_v29 }
 0x98b   : > { %4758 = vmatpush3.msra.mxu1 %v2853_v29 }
 0x98c   : > { %4759 = vmatprep.subr.mxu1 %v2850_v32 }
 0x98d   : > { %4760 = vmatpush3.msra.mxu1 %v2850_v32 }
 0x98e   : > { %4761 = vmatprep.subr.mxu1 %v2847_v44 }
 0x98f   : > { %4762 = vmatpush3.msra.mxu1 %v2847_v44 }
 0x990   : > { %4763 = vmatprep.subr.mxu1 %v2844_v11 }
 0x991   : > { %4764 = vmatpush3.msra.mxu1 %v2844_v11  ;;  %v4959_v11 = vld [vmem:[%s7985_s4 + $0x350] sm:$0x3f] }
 0x992   : > { %4765 = vmatprep.subr.mxu1 %v2841_v35 }
 0x993   : > { %4766 = vmatpush3.msra.mxu1 %v2841_v35 }
 0x994   : > { %4768 = vmatmul.mubr.msk.f32.vlgmr.msra.gmra.mxu1 %vm2878_vm11, %v4740_v45 }
 0x995   : > { %4368 = vmatprep.mubr.msk.f32.mxu1 %vm2656_vm13, %v3048_v61 }
 0xa3a   : > { %v7091_v17 = vpop.f32.mrf.mxu1 }
 0xa3b   : > { %3166 = vrot.lane.b32.xlu0 %v7091_v17, %s8256_s6  ;;  %3188 = vrot.lane.b32.xlu1 %v7091_v17, %s8164_s29 }
 0xa3c   : > { %v7097_v37 = vpop.f32.mrf.mxu1 }
 0xa3e   : > { %v7103_v39 = vpop.f32.mrf.mxu1 }
 0xa3f   : > { %3144 = vrot.lane.b32.xlu1 %v7091_v17, %s8155_s2  ;;  %3190 = vrot.lane.b32.xlu0 %v7097_v37, %s8164_s29 }
 0xa40   : > { %v7109_v50 = vpop.f32.mrf.mxu1 }
 0xa43   : > { %3168 = vrot.lane.b32.xlu1 %v7097_v37, %s8256_s6  ;;  %3146 = vrot.lane.b32.xlu0 %v7097_v37, %s8155_s2 }
 0xa47   : > { %3194 = vrot.lane.b32.xlu1 %v7103_v39, %s8164_s29  ;;  %3196 = vrot.lane.b32.xlu0 %v7109_v50, %s8164_s29 }
 0xa4b   : > { %3172 = vrot.lane.b32.xlu1 %v7103_v39, %s8256_s6  ;;  %3174 = vrot.lane.b32.xlu0 %v7109_v50, %s8256_s6 }
 0xa4f   : > { %3150 = vrot.lane.b32.xlu1 %v7103_v39, %s8155_s2  ;;  %3152 = vrot.lane.b32.xlu0 %v7109_v50, %s8155_s2 }
 0xa53   : > { %3128 = vrot.lane.b32.xlu1 %v7103_v39, %s8258_s20  ;;  %3130 = vrot.lane.b32.xlu0 %v7109_v50, %s8258_s20 }
 0xa54   : > { %v7127_v51 = vpop.f32.mrf.mxu1 }
 0xa56   : > { %v7133_v62 = vpop.f32.mrf.mxu1 }
 0xa57   : > { %3122 = vrot.lane.b32.xlu1 %v7091_v17, %s8258_s20  ;;  %3198 = vrot.lane.b32.xlu0 %v7127_v51, %s8164_s29 }
 0xa5b   : > { %3176 = vrot.lane.b32.xlu0 %v7127_v51, %s8256_s6  ;;  %3192 = vrot.lane.b32.xlu1 %v7133_v62, %s8164_s29 }
 0xa5f   : > { %3154 = vrot.lane.b32.xlu0 %v7127_v51, %s8155_s2  ;;  %3170 = vrot.lane.b32.xlu1 %v7133_v62, %s8256_s6 }
 0xa63   : > { %3132 = vrot.lane.b32.xlu0 %v7127_v51, %s8258_s20  ;;  %3148 = vrot.lane.b32.xlu1 %v7133_v62, %s8155_s2 }
 0xa67   : > { %3110 = vrot.lane.b32.xlu0 %v7127_v51, %s8257_s0  ;;  %3126 = vrot.lane.b32.xlu1 %v7133_v62, %s8258_s20 }
 0xa6b   : > { %3088 = vrot.lane.b32.xlu0 %v7127_v51, %s8259_s3  ;;  %3104 = vrot.lane.b32.xlu1 %v7133_v62, %s8257_s0 }
 0xa6f   : > { %3066 = vrot.lane.b32.xlu0 %v7127_v51, %s8196_s5  ;;  %3082 = vrot.lane.b32.xlu1 %v7133_v62, %s8259_s3 }
 0xa73   : > { %3124 = vrot.lane.b32.xlu0 %v7097_v37, %s8258_s20  ;;  %3060 = vrot.lane.b32.xlu1 %v7133_v62, %s8196_s5 }
 0xa77   : > { %3220 = vrot.lane.b32.xlu0 %v7127_v51, %s8169_s27  ;;  %3106 = vrot.lane.b32.xlu1 %v7103_v39, %s8257_s0 }
 0xa7b   : > { %3108 = vrot.lane.b32.xlu0 %v7109_v50, %s8257_s0  ;;  %3214 = vrot.lane.b32.xlu1 %v7133_v62, %s8169_s27 }
 0xa7f   : > { %3102 = vrot.lane.b32.xlu0 %v7097_v37, %s8257_s0  ;;  %3100 = vrot.lane.b32.xlu1 %v7091_v17, %s8257_s0 }
 0xa83   : > { %3086 = vrot.lane.b32.xlu0 %v7109_v50, %s8259_s3  ;;  %3084 = vrot.lane.b32.xlu1 %v7103_v39, %s8259_s3 }
 0xa87   : > { %3080 = vrot.lane.b32.xlu0 %v7097_v37, %s8259_s3  ;;  %3078 = vrot.lane.b32.xlu1 %v7091_v17, %s8259_s3 }
 0xa8b   : > { %3064 = vrot.lane.b32.xlu0 %v7109_v50, %s8196_s5  ;;  %3062 = vrot.lane.b32.xlu1 %v7103_v39, %s8196_s5 }
 0xa8f   : > { %3058 = vrot.lane.b32.xlu0 %v7097_v37, %s8196_s5  ;;  %3056 = vrot.lane.b32.xlu1 %v7091_v17, %s8196_s5 }
 0xa93   : > { %3218 = vrot.lane.b32.xlu0 %v7109_v50, %s8169_s27  ;;  %3216 = vrot.lane.b32.xlu1 %v7103_v39, %s8169_s27 }
 0xa97   : > { %3212 = vrot.lane.b32.xlu0 %v7097_v37, %s8169_s27  ;;  %3210 = vrot.lane.b32.xlu1 %v7091_v17, %s8169_s27 }
 0xa9b   : > { %3234 = vperm.xlu0 %4939, %v3049_v53  }
 0xaad   : > { %v3167_v57 = vpop.permute.xlu0 %3166  ;;  %v3189_v43 = vpop.permute.xlu1 %3188 }
 0xab1   : > { %v3145_v9 = vpop.permute.xlu1 %3144  ;;  %v3191_v14 = vpop.permute.xlu0 %3190 }
 0xab2   : > { %v3200_v21 = vsel %vm1122_vm9, %v3189_v43, %v3191_v14  ;;  %v4962_v43 = vld [vmem:[%s7985_s4 + $0x330] sm:$0xff] }
 0xab5   : > { %v3169_v59 = vpop.permute.xlu1 %3168  ;;  %v3147_v2 = vpop.permute.xlu0 %3146 }
 0xab6   : > { %v3178_v33 = vsel %vm1097_vm8, %v3167_v57, %v3169_v59  ;;  %v3156_v26 = vsel %vm1072_vm7, %v3145_v9, %v3147_v2  ;;  %v4961_v57 = vld [vmem:[%s7985_s4 + $0x338] sm:$0xff]  ;;  %v4963_v9 = vld [vmem:[%s7985_s4 + $0x320] sm:$0xff] }
 0xab9   : > { %v3195_v0 = vpop.permute.xlu1 %3194  ;;  %v3197_v7 = vpop.permute.xlu0 %3196 }
 0xaba   : > { %v3202_v16 = vsel %vm1122_vm9, %v3195_v0, %v3197_v7 }
 0xabd   : > { %v3173_v40 = vpop.permute.xlu1 %3172  ;;  %v3175_v63 = vpop.permute.xlu0 %3174 }
 0xabe   : > { %v3180_v52 = vsel %vm1097_vm8, %v3173_v40, %v3175_v63  ;;  %v4965_v40 = vld [vmem:[%s7985_s4 + $0x308] sm:$0xff] }
 0xac1   : > { %v3151_v3 = vpop.permute.xlu1 %3150  ;;  %v3153_v4 = vpop.permute.xlu0 %3152 }
 0xac2   : > { %v3158_v1 = vsel %vm1072_vm7, %v3151_v3, %v3153_v4  ;;  %v4967_v3 = vld [vmem:[%s7985_s4 + $0x2f8] sm:$0xff] }
 0xac5   : > { %v3129_v5 = vpop.permute.xlu1 %3128  ;;  %v3131_v6 = vpop.permute.xlu0 %3130 }
 0xac6   : > { %v3136_v31 = vsel %vm1047_vm6, %v3129_v5, %v3131_v6 }
 0xac9   : > { %v7207_v8 = vpop.permute.xlu1 %3122  ;;  %v3199_v12 = vpop.permute.xlu0 %3198 }
 0xaca   : > { %3312 = vmatpush1.msra.mxu0 %v3199_v12  ;;  %v3203_v13 = vsel %vm1122_vm9, %v3197_v7, %v3199_v12 }
 0xacb   : > { %3240 = vmatprep.subr.mxu1 %v3203_v13  ;;  %3313 = vmatprep.subr.mxu0 %v8171_v54 }
 0xacc   : > { %3241 = vmatpush1.msra.mxu1 %v3202_v16 }
 0xacd   : > { %v3177_v30 = vpop.permute.xlu0 %3176  ;;  %v3193_v18 = vpop.permute.xlu1 %3192 }
 0xace   : > { %3314 = vmatpush1.msra.mxu0 %v3193_v18  ;;  %v3201_v55 = vsel %vm1122_vm9, %v3191_v14, %v3193_v18  ;;  %v3181_v10 = vsel %vm1097_vm8, %v3175_v63, %v3177_v30  ;;  %v4966_v63 = vld [vmem:[%s7985_s4 + $0x300] sm:$0xff] }
 0xacf   : > { %3242 = vmatprep.subr.mxu1 %v3201_v55  ;;  %3315 = vmatprep.subr.mxu0 %v8171_v54 }
 0xad0   : > { %3243 = vmatpush1.msra.mxu1 %v3200_v21  ;;  %3316 = vmatpush1.msra.mxu0 %v3177_v30 }
 0xad1   : > { %v3155_v58 = vpop.permute.xlu0 %3154  ;;  %3244 = vmatprep.subr.mxu1 %v3181_v10  ;;  %3317 = vmatprep.subr.mxu0 %v8171_v54  ;;  %v3171_v15 = vpop.permute.xlu1 %3170 }
 0xad2   : > { %3245 = vmatpush1.msra.mxu1 %v3180_v52  ;;  %3318 = vmatpush1.msra.mxu0 %v3171_v15  ;;  %v3179_v56 = vsel %vm1097_vm8, %v3169_v59, %v3171_v15  ;;  %v3159_v19 = vsel %vm1072_vm7, %v3153_v4, %v3155_v58 }
 0xad3   : > { %3246 = vmatprep.subr.mxu1 %v3179_v56  ;;  %3319 = vmatprep.subr.mxu0 %v8171_v54 }
 0xad4   : > { %3247 = vmatpush1.msra.mxu1 %v3178_v33  ;;  %3320 = vmatpush1.msra.mxu0 %v3155_v58 }
 0xad5   : > { %v3133_v20 = vpop.permute.xlu0 %3132  ;;  %3248 = vmatprep.subr.mxu1 %v3159_v19  ;;  %3321 = vmatprep.subr.mxu0 %v8171_v54  ;;  %v3149_v22 = vpop.permute.xlu1 %3148 }
 0xad6   : > { %3249 = vmatpush1.msra.mxu1 %v3158_v1  ;;  %3322 = vmatpush1.msra.mxu0 %v3149_v22  ;;  %v3157_v24 = vsel %vm1072_vm7, %v3147_v2, %v3149_v22  ;;  %v3137_v28 = vsel %vm1047_vm6, %v3131_v6, %v3133_v20  ;;  %v4964_v2 = vld [vmem:[%s7985_s4 + $0x318] sm:$0xff]  ;;  %v4972_v22 = vld [vmem:[%s7985_s4 + $0x140] sm:$0xff] }
 0xad7   : > { %3250 = vmatprep.subr.mxu1 %v3157_v24  ;;  %3323 = vmatprep.subr.mxu0 %v8171_v54  ;;  %v4973_v24 = vld [vmem:[%s7985_s4 + $0x138] sm:$0xff] }
 0xad8   : > { %3251 = vmatpush1.msra.mxu1 %v3156_v26  ;;  %3324 = vmatpush1.msra.mxu0 %v3133_v20  ;;  %v4971_v20 = vld [vmem:[%s7985_s4 + $0x150] sm:$0xff]  ;;  %v4974_v26 = vld [vmem:[%s7985_s4 + $0x128] sm:$0xff] }
 0xad9   : > { %v3111_v34 = vpop.permute.xlu0 %3110  ;;  %3252 = vmatprep.subr.mxu1 %v3137_v28  ;;  %3325 = vmatprep.subr.mxu0 %v8171_v54  ;;  %v3127_v36 = vpop.permute.xlu1 %3126  ;;  %v4975_v28 = vld [vmem:[%s7985_s4 + $0x120] sm:$0xff] }
 0xada   : > { %3253 = vmatpush1.msra.mxu1 %v3136_v31  ;;  %3326 = vmatpush1.msra.mxu0 %v3127_v36  ;;  %v4976_v31 = vld [vmem:[%s7985_s4 + $0x110] sm:$0xff] }
 0xadb   : > { %3327 = vmatprep.subr.mxu0 %v8171_v54 }
 0xadc   : > { %3328 = vmatpush1.msra.mxu0 %v3111_v34 }
 0xadd   : > { %v3089_v38 = vpop.permute.xlu0 %3088  ;;  %3329 = vmatprep.subr.mxu0 %v8171_v54  ;;  %v3105_v41 = vpop.permute.xlu1 %3104 }
 0xade   : > { %3330 = vmatpush1.msra.mxu0 %v3105_v41 }
 0xadf   : > { %3331 = vmatprep.subr.mxu0 %v8171_v54 }
 0xae0   : > { %3332 = vmatpush1.msra.mxu0 %v3089_v38 }
 0xae1   : > { %v7233_v42 = vpop.permute.xlu0 %3066  ;;  %3333 = vmatprep.subr.mxu0 %v8171_v54  ;;  %v7236_v45 = vpop.permute.xlu1 %3082 }
 0xae2   : > { %3334 = vmatpush1.msra.mxu0 %v7236_v45 }
 0xae3   : > { %3335 = vmatprep.subr.mxu0 %v8171_v54 }
 0xae4   : > { %3336 = vmatpush1.msra.mxu0 %v7233_v42 }
 0xae5   : > { %v3125_v46 = vpop.permute.xlu0 %3124  ;;  %3337 = vmatprep.subr.mxu0 %v8171_v54  ;;  %v7242_v47 = vpop.permute.xlu1 %3060 }
 0xae6   : > { %v3134_v48 = vsel %vm1047_vm6, %v7207_v8, %v3125_v46  ;;  %3338 = vmatpush1.msra.mxu0 %v7242_v47  ;;  %v3135_v49 = vsel %vm1047_vm6, %v3125_v46, %v3127_v36  ;;  %v4978_v36 = vld [vmem:[%s7985_s4 + $0xf8] sm:$0xff]  ;;  %v4983_v46 = vld [vmem:[%s7985_s4 + $0xc0] sm:$0xff] }
 0xae7   : > { %3254 = vmatprep.subr.mxu1 %v3135_v49  ;;  %3339 = vmatprep.subr.mxu0 %v8171_v54  ;;  %v4986_v49 = vld [vmem:[%s7985_s4 + $0x98] sm:$0xff] }
 0xae8   : > { %3255 = vmatpush1.msra.mxu1 %v3134_v48  ;;  %3340 = vmatpush1.msra.mxu0 %v7127_v51  ;;  %v4985_v48 = vld [vmem:[%s7985_s4 + $0xa8] sm:$0xff] }
 0xae9   : > { %v7250_v23 = vpop.permute.xlu0 %3220  ;;  %3341 = vmatprep.subr.mxu0 %v8171_v54  ;;  %v3107_v60 = vpop.permute.xlu1 %3106 }
 0xaea   : > { %3342 = vmatpush1.msra.mxu0 %v7133_v62  ;;  %v4960_v62 = vld [vmem:[%s7985_s4 + $0x348] sm:$0x3f] }
 0xaeb   : > { %3371 = vmatprep.subr.mxu0 %v8171_v54 }
 0xaec   : > { %3372 = vmatpush2.msra.mxu0 %v7250_v23 }
 0xaed   : > { %v3109_v27 = vpop.permute.xlu0 %3108  ;;  %3373 = vmatprep.subr.mxu0 %v8171_v54  ;;  %v7262_v29 = vpop.permute.xlu1 %3214 }
 0xaee   : > { %v3114_v32 = vsel %vm1022_vm5, %v3107_v60, %v3109_v27  ;;  %3374 = vmatpush2.msra.mxu0 %v7262_v29  ;;  %v3115_v44 = vsel %vm1022_vm5, %v3109_v27, %v3111_v34  ;;  %v4977_v34 = vld [vmem:[%s7985_s4 + $0x108] sm:$0xff]  ;;  %v4988_v60 = vld [vmem:[%s7985_s4 + $0x80] sm:$0xff] }
 0xaef   : > { %3256 = vmatprep.subr.mxu1 %v3115_v44  ;;  %3376 = vmatmul.mubr.f32.vlgmr.msra.gmra.mxu0 %v7259_v25  ;;  %v4990_v27 = vld [vmem:[%s7985_s4 + $0x68] sm:$0xff] }
 0xaf0   : > { %3257 = vmatpush1.msra.mxu1 %v3114_v32  ;;  %4370 = vmatprep.subr.msk.mxu0 %vm1285_vm0, %v4959_v11  ;;  %v4992_v32 = vld [vmem:[%s7985_s4 + $0x50] sm:$0xff]  ;;  %v4993_v44 = vld [vmem:[%s7985_s4 + $0x48] sm:$0xff]  ;;  %v4994_v11 = vld [vmem:[%s7985_s4 + $0x38] sm:$0xff] }
 0xaf1   : > { %v3103_v35 = vpop.permute.xlu0 %3102  ;;  %v3101_v51 = vpop.permute.xlu1 %3100  ;;  %4371 = vmatpush1.msk.msra.mxu0 %vm1285_vm0, %v4960_v62  ;;  %3528 = vmatprep.mubr.f32.mxu0 %v8171_v54  ;;  %v4997_v62 = vld [vmem:[%s7985_s4 + $0x18] sm:$0xff] }
 0xaf2   : > { %v3112_v61 = vsel %vm1022_vm5, %v3101_v51, %v3103_v35  ;;  %v3113_v53 = vsel %vm1022_vm5, %v3103_v35, %v3105_v41  ;;  %3490 = vmatprep.subr.mxu0 %v4961_v57  ;;  %v4980_v41 = vld [vmem:[%s7985_s4 + $0xe0] sm:$0xff]  ;;  %v4995_v35 = vld [vmem:[%s7985_s4 + $0x30] sm:$0xff] }
 0xaf3   : > { %3258 = vmatprep.subr.mxu1 %v3113_v53  ;;  %3491 = vmatpush1.msra.mxu0 %v4962_v43  ;;  %v4996_v51 = vld [vmem:[%s7985_s4 + $0x20] sm:$0xff]  ;;  %v5000_v57 = vld [vmem:[%s7985_s4 + $0x2f0] sm:$0xff]  ;;  %v5001_v43 = vld [vmem:[%s7985_s4 + $0x2e8] sm:$0xff] }
 0xaf4   : > { %3259 = vmatpush1.msra.mxu1 %v3112_v61  ;;  %3492 = vmatprep.subr.mxu0 %v4963_v9  ;;  %v4998_v61 = vld [vmem:[%s7985_s4 + $0x8] sm:$0xff]  ;;  %v4999_v53 = vld [vmem:[%s7985_s4] sm:$0xff]  ;;  %v5002_v9 = vld [vmem:[%s7985_s4 + $0x2d8] sm:$0xff] }
 0xaf5   : > { %v3087_v14 = vpop.permute.xlu0 %3086  ;;  %v3085_v59 = vpop.permute.xlu1 %3084  ;;  %3493 = vmatpush1.msra.mxu0 %v4964_v2  ;;  %v5005_v2 = vld [vmem:[%s7985_s4 + $0x2b8] sm:$0xff] }
 0xaf6   : > { %v3092_v0 = vsel %vm997_vm4, %v3085_v59, %v3087_v14  ;;  %v3093_v7 = vsel %vm997_vm4, %v3087_v14, %v3089_v38  ;;  %3494 = vmatprep.subr.mxu0 %v4965_v40  ;;  %v4979_v38 = vld [vmem:[%s7985_s4 + $0xf0] sm:$0xff]  ;;  %v5004_v59 = vld [vmem:[%s7985_s4 + $0x2c0] sm:$0xff] }
 0xaf7   : > { %3260 = vmatprep.subr.mxu1 %v3093_v7  ;;  %3495 = vmatpush1.msra.mxu0 %v4966_v63  ;;  %v5003_v14 = vld [vmem:[%s7985_s4 + $0x2d0] sm:$0xff]  ;;  %v5007_v7 = vld [vmem:[%s7985_s4 + $0x2a0] sm:$0xff]  ;;  %v5009_v63 = vld [vmem:[%s7985_s4 + $0x288] sm:$0xff] }
 0xaf8   : > { %3261 = vmatpush1.msra.mxu1 %v3092_v0  ;;  %4593 = vmatprep.subr.mxu0 %v4967_v3  ;;  %v5006_v0 = vld [vmem:[%s7985_s4 + $0x2a8] sm:$0xff]  ;;  %v5008_v40 = vld [vmem:[%s7985_s4 + $0x290] sm:$0xff]  ;;  %v5010_v3 = vld [vmem:[%s7985_s4 + $0x278] sm:$0xff] }
 0xaf9   : > { %v3081_v4 = vpop.permute.xlu0 %3080  ;;  %v3079_v5 = vpop.permute.xlu1 %3078 }
 0xafa   : > { %v3090_v6 = vsel %vm997_vm4, %v3079_v5, %v3081_v4  ;;  %v3091_v8 = vsel %vm997_vm4, %v3081_v4, %v7236_v45  ;;  %v4982_v45 = vld [vmem:[%s7985_s4 + $0xc8] sm:$0xff]  ;;  %v5011_v4 = vld [vmem:[%s7985_s4 + $0x270] sm:$0xff]  ;;  %v5012_v5 = vld [vmem:[%s7985_s4 + $0x260] sm:$0xff] }
 0xafb   : > { %3262 = vmatprep.subr.mxu1 %v3091_v8  ;;  %v5014_v8 = vld [vmem:[%s7985_s4 + $0x248] sm:$0xff] }
 0xafc   : > { %3263 = vmatpush1.msra.mxu1 %v3090_v6  ;;  %v5013_v6 = vld [vmem:[%s7985_s4 + $0x258] sm:$0xff] }
 0xafd   : > { %v3065_v12 = vpop.permute.xlu0 %3064  ;;  %v3063_v13 = vpop.permute.xlu1 %3062 }
 0xafe   : > { %v3070_v16 = vsel %vm972_vm3, %v3063_v13, %v3065_v12  ;;  %v3071_v30 = vsel %vm972_vm3, %v3065_v12, %v7233_v42  ;;  %v4981_v42 = vld [vmem:[%s7985_s4 + $0xd8] sm:$0xff]  ;;  %v5015_v12 = vld [vmem:[%s7985_s4 + $0x240] sm:$0xff]  ;;  %v5016_v13 = vld [vmem:[%s7985_s4 + $0x230] sm:$0xff] }
 0xaff   : > { %3264 = vmatprep.subr.mxu1 %v3071_v30  ;;  %v5018_v30 = vld [vmem:[%s7985_s4 + $0x218] sm:$0xff] }
 0xb00   : > { %3265 = vmatpush1.msra.mxu1 %v3070_v16  ;;  %v5017_v16 = vld [vmem:[%s7985_s4 + $0x228] sm:$0xff] }
 0xb01   : > { %v3059_v18 = vpop.permute.xlu0 %3058  ;;  %v3057_v55 = vpop.permute.xlu1 %3056 }
 0xb02   : > { %v3068_v21 = vsel %vm972_vm3, %v3057_v55, %v3059_v18  ;;  %v3069_v10 = vsel %vm972_vm3, %v3059_v18, %v7242_v47  ;;  %v4984_v47 = vld [vmem:[%s7985_s4 + $0xb0] sm:$0xff]  ;;  %v5020_v55 = vld [vmem:[%s7985_s4 + $0x200] sm:$0xff] }
 0xb03   : > { %3266 = vmatprep.subr.mxu1 %v3069_v10  ;;  %v5019_v18 = vld [vmem:[%s7985_s4 + $0x210] sm:$0xff]  ;;  %v5022_v10 = vld [vmem:[%s7985_s4 + $0x1e8] sm:$0xff] }
 0xb04   : > { %3267 = vmatpush1.msra.mxu1 %v3068_v21  ;;  %v5021_v21 = vld [vmem:[%s7985_s4 + $0x1f8] sm:$0xff] }
 0xb05   : > { %v3219_v52 = vpop.permute.xlu0 %3218  ;;  %3268 = vmatprep.subr.mxu1 %v7109_v50  ;;  %v3217_v58 = vpop.permute.xlu1 %3216 }
 0xb06   : > { %3269 = vmatpush1.msra.mxu1 %v7103_v39  ;;  %v3225_v15 = vsel %vm1147_vm10, %v3219_v52, %v7250_v23  ;;  %v3224_v56 = vsel %vm1147_vm10, %v3217_v58, %v3219_v52  ;;  %v4970_v39 = vld [vmem:[%s7985_s4 + $0x158] sm:$0xff]  ;;  %v4987_v23 = vld [vmem:[%s7985_s4 + $0x90] sm:$0xff]  ;;  %v5023_v52 = vld [vmem:[%s7985_s4 + $0x1e0] sm:$0xff] }
 0xb07   : > { %3270 = vmatprep.subr.mxu1 %v7097_v37  ;;  %v4969_v37 = vld [vmem:[%s7985_s4 + $0x168] sm:$0xff]  ;;  %v5024_v58 = vld [vmem:[%s7985_s4 + $0x1d0] sm:$0xff] }
 0xb08   : > { %3271 = vmatpush1.msra.mxu1 %v7091_v17  ;;  %v4968_v17 = vld [vmem:[%s7985_s4 + $0x170] sm:$0xff] }
 0xb09   : > { %v3213_v33 = vpop.permute.xlu0 %3212  ;;  %3300 = vmatprep.subr.mxu1 %v3225_v15  ;;  %v3211_v19 = vpop.permute.xlu1 %3210  ;;  %v5025_v15 = vld [vmem:[%s7985_s4 + $0x1c8] sm:$0xff] }
 0xb0a   : > { %v3222_v1 = vsel %vm1147_vm10, %v3211_v19, %v3213_v33  ;;  %3301 = vmatpush2.msra.mxu1 %v3224_v56  ;;  %v3223_v50 = vsel %vm1147_vm10, %v3213_v33, %v7262_v29  ;;  %v4991_v29 = vld [vmem:[%s7985_s4 + $0x60] sm:$0xff]  ;;  %v5026_v56 = vld [vmem:[%s7985_s4 + $0x1b8] sm:$0xff]  ;;  %v5027_v33 = vld [vmem:[%s7985_s4 + $0x1b0] sm:$0xff] }
 0xb0b   : > { %3302 = vmatprep.subr.mxu1 %v3223_v50  ;;  %v5028_v19 = vld [vmem:[%s7985_s4 + $0x1a0] sm:$0xff]  ;;  %v5030_v50 = vld [vmem:[%s7985_s4 + $0x188] sm:$0xff] }
 0xb0c   : > { %3303 = vmatpush2.msra.mxu1 %v3222_v1  ;;  %v5029_v1 = vld [vmem:[%s7985_s4 + $0x198] sm:$0xff] }
 0xb0d   : > { %3305 = vmatmul.mubr.f32.vlgmr.msra.gmra.mxu1 %v7259_v25  ;;  %3393 = vmatprep.subr.mxu1 %v4968_v17  ;;  %v4989_v25 = vld [vmem:[%s7985_s4 + $0x78] sm:$0xff]  ;;  %v5031_v17 = vld [vmem:[%s7985_s4 + $0x180] sm:$0xff] }
 0xb0e   : > { %3394 = vmatpush1.msra.mxu1 %v4969_v37 }
 0xb0f   : > { %3395 = vmatprep.subr.mxu1 %v4970_v39 }
 0xb10   : > { %3396 = vmatpush1.msra.mxu1 %v4971_v20 }
 0xb11   : > { %3397 = vmatprep.subr.mxu1 %v4972_v22 }
 0xb12   : > { %3398 = vmatpush1.msra.mxu1 %v4973_v24 }
 0xb13   : > { %3399 = vmatprep.subr.mxu1 %v4974_v26 }
 0xb14   : > { %3400 = vmatpush1.msra.mxu1 %v4975_v28  ;;  %v5032_v28 = vld [vmem:[%s7985_s4 + $0x178] sm:$0xff] }
 0xb15   : > { %3401 = vmatprep.subr.mxu1 %v4976_v31  ;;  %v5033_v31 = vld [vmem:[%s7985_s4 + $0x2e0] sm:$0xff] }
 0xb16   : > { %3402 = vmatpush1.msra.mxu1 %v4977_v34  ;;  %v7515_v37 = vpop.permute.xlu0 %3234  ;;  %v5034_v34 = vld [vmem:[%s7985_s4 + $0x160] sm:$0xff] }
 0xb17   : > { %3403 = vmatprep.subr.mxu1 %v4978_v36  ;;  %v5035_v36 = vld [vmem:[%s7985_s4 + $0x2c8] sm:$0xff] }
 0xb18   : > { %3404 = vmatpush1.msra.mxu1 %v4979_v38  ;;  %v5036_v38 = vld [vmem:[%s7985_s4 + $0x148] sm:$0xff] }
 0xb19   : > { %3405 = vmatprep.subr.mxu1 %v4980_v41  ;;  %v5037_v41 = vld [vmem:[%s7985_s4 + $0x2b0] sm:$0xff] }
 0xb1a   : > { %3406 = vmatpush1.msra.mxu1 %v4981_v42  ;;  %v5038_v42 = vld [vmem:[%s7985_s4 + $0x130] sm:$0xff] }
 0xb1b   : > { %3407 = vmatprep.subr.mxu1 %v4982_v45  ;;  %v5039_v45 = vld [vmem:[%s7985_s4 + $0x298] sm:$0xff] }
 0xb1c   : > { %3408 = vmatpush1.msra.mxu1 %v4983_v46  ;;  %v5040_v46 = vld [vmem:[%s7985_s4 + $0x118] sm:$0xff] }
 0xb1d   : > { %3409 = vmatprep.subr.mxu1 %v4984_v47  ;;  %v5041_v47 = vld [vmem:[%s7985_s4 + $0x280] sm:$0xff] }
 0xb1e   : > { %3410 = vmatpush1.msra.mxu1 %v4985_v48  ;;  %v5042_v48 = vld [vmem:[%s7985_s4 + $0x100] sm:$0xff] }
 0xb1f   : > { %3411 = vmatprep.subr.mxu1 %v4986_v49  ;;  %v5043_v49 = vld [vmem:[%s7985_s4 + $0x268] sm:$0xff] }
 0xb20   : > { %3412 = vmatpush1.msra.mxu1 %v4987_v23  ;;  %v5044_v23 = vld [vmem:[%s7985_s4 + $0xe8] sm:$0xff] }
 0xb21   : > { %3413 = vmatprep.subr.mxu1 %v4988_v60  ;;  %v5045_v60 = vld [vmem:[%s7985_s4 + $0x250] sm:$0xff] }
 0xb22   : > { %3414 = vmatpush1.msra.mxu1 %v4989_v25  ;;  %v5046_v25 = vld [vmem:[%s7985_s4 + $0xd0] sm:$0xff] }
 0xb23   : > { %3415 = vmatprep.subr.mxu1 %v4990_v27  ;;  %v5047_v27 = vld [vmem:[%s7985_s4 + $0x238] sm:$0xff] }
 0xb24   : > { %3416 = vmatpush1.msra.mxu1 %v4991_v29  ;;  %v5048_v29 = vld [vmem:[%s7985_s4 + $0xb8] sm:$0xff] }
 0xb25   : > { %3417 = vmatprep.subr.mxu1 %v4992_v32  ;;  %v5049_v32 = vld [vmem:[%s7985_s4 + $0x220] sm:$0xff] }
 0xb26   : > { %3418 = vmatpush1.msra.mxu1 %v4993_v44  ;;  %v5050_v44 = vld [vmem:[%s7985_s4 + $0xa0] sm:$0xff] }
 0xb27   : > { %3419 = vmatprep.subr.mxu1 %v4994_v11  ;;  %v5051_v11 = vld [vmem:[%s7985_s4 + $0x208] sm:$0xff] }
 0xb28   : > { %3420 = vmatpush1.msra.mxu1 %v4995_v35  ;;  %v5052_v35 = vld [vmem:[%s7985_s4 + $0x88] sm:$0xff] }
 0xb29   : > { %3421 = vmatprep.subr.mxu1 %v4996_v51  ;;  %v5053_v51 = vld [vmem:[%s7985_s4 + $0x1f0] sm:$0xff] }
 0xb2a   : > { %3422 = vmatpush1.msra.mxu1 %v4997_v62  ;;  %v5054_v62 = vld [vmem:[%s7985_s4 + $0x70] sm:$0xff] }
 0xb2b   : > { %3423 = vmatprep.subr.mxu1 %v4998_v61 }
 0xb2c   : > { %3424 = vmatpush1.msra.mxu1 %v4999_v53  ;;  %v5055_v53 = vld [vmem:[%s7985_s4 + $0x1d8] sm:$0xff] }
 0xb2d   : > { %3425 = vmatprep.subr.mxu1 %v5000_v57 }
 0xb2e   : > { %3426 = vmatpush2.msra.mxu1 %v5001_v43  ;;  %v5056_v43 = vld [vmem:[%s7985_s4 + $0x58] sm:$0xff] }
 0xb2f   : > { %3427 = vmatprep.subr.mxu1 %v5002_v9 }
 0xb30   : > { %3428 = vmatpush2.msra.mxu1 %v5003_v14  ;;  %v5057_v14 = vld [vmem:[%s7985_s4 + $0x1c0] sm:$0xff] }
 0xb31   : > { %3429 = vmatprep.subr.mxu1 %v5004_v59 }
 0xb32   : > { %3430 = vmatpush2.msra.mxu1 %v5005_v2  ;;  %v5058_v2 = vld [vmem:[%s7985_s4 + $0x40] sm:$0xff] }
 0xb33   : > { %3431 = vmatprep.subr.mxu1 %v5006_v0 }
 0xb34   : > { %3432 = vmatpush2.msra.mxu1 %v5007_v7  ;;  %v5059_v7 = vld [vmem:[%s7985_s4 + $0x1a8] sm:$0xff] }
 0xb35   : > { %3433 = vmatprep.subr.mxu1 %v5008_v40 }
 0xb36   : > { %3434 = vmatpush2.msra.mxu1 %v5009_v63  ;;  %v5060_v63 = vld [vmem:[%s7985_s4 + $0x28] sm:$0xff] }
 0xb37   : > { %3435 = vmatprep.subr.mxu1 %v5010_v3  ;;  %v5061_v3 = vld [vmem:[%s7985_s4 + $0x190] sm:$0xff] }
 0xb38   : > { %3436 = vmatpush2.msra.mxu1 %v5011_v4  ;;  %v5062_v4 = vld [vmem:[%s7985_s4 + $0x10] sm:$0xff] }
 0xb39   : > { %3437 = vmatprep.subr.mxu1 %v5012_v5 }
 0xb3a   : > { %3438 = vmatpush2.msra.mxu1 %v5013_v6 }
 0xb3b   : > { %3439 = vmatprep.subr.mxu1 %v5014_v8  ;;  %v5063_v8 = vld [vmem:[%s7985_s4 + $0x358] sm:$0x3f] }
 0xb3c   : > { %3440 = vmatpush2.msra.mxu1 %v5015_v12  ;;  %v5064_v12 = vld [vmem:[%s7985_s4 + $0x340] sm:$0xff] }
 0xb3d   : > { %3441 = vmatprep.subr.mxu1 %v5016_v13  ;;  %v5065_v13 = vld [vmem:[%s7985_s4 + $0x328] sm:$0xff] }
 0xb3e   : > { %3442 = vmatpush2.msra.mxu1 %v5017_v16  ;;  %v5066_v16 = vld [vmem:[%s7985_s4 + $0x310] sm:$0xff] }
 0xb3f   : > { %3443 = vmatprep.subr.mxu1 %v5018_v30 }
 0xb40   : > { %3444 = vmatpush2.msra.mxu1 %v5019_v18 }
 0xb41   : > { %3445 = vmatprep.subr.mxu1 %v5020_v55 }
 0xb42   : > { %3446 = vmatpush2.msra.mxu1 %v5021_v21 }
 0xb43   : > { %3447 = vmatprep.subr.mxu1 %v5022_v10 }
 0xb44   : > { %3448 = vmatpush2.msra.mxu1 %v5023_v52 }
 0xb45   : > { %3449 = vmatprep.subr.mxu1 %v5024_v58 }
 0xb46   : > { %3450 = vmatpush2.msra.mxu1 %v5025_v15 }
 0xb47   : > { %3451 = vmatprep.subr.mxu1 %v5026_v56 }
 0xb48   : > { %3452 = vmatpush2.msra.mxu1 %v5027_v33 }
 0xb49   : > { %3453 = vmatprep.subr.mxu1 %v5028_v19 }
 0xb4a   : > { %3454 = vmatpush2.msra.mxu1 %v5029_v1 }
 0xb4b   : > { %3455 = vmatprep.subr.mxu1 %v5030_v50  ;;  %v3676_v50 = vld [vmem:[#allocation2] sm:$0x1] }
 0xb4c   : > { %3456 = vmatpush2.msra.mxu1 %v5031_v17 }
 0xb4d   : > { %4781 = vmatprep.subr.mxu1 %v8171_v54 }
 0xbaf   : > { %v3377_v39 = vpop.f32.mrf.mxu0 }
 0xbb0   : > { %v3378_v20 = vadd.f32 %v3377_v39, %v7515_v37 }
 0xbb1   : > { %v3379_v22 = vpop.f32.mrf.mxu0 }
 0xbb2   : > { %vm3383_vm13 = vcmp.ge.f32.partialorder %v3378_v20, 0.0  ;;  %v3386_v24 = vmul.f32 0.01, %v3378_v20 }
 0xbb4   : > { %v7518_v26 = vsel %vm3383_vm13, %v3378_v20, %v3386_v24 }
 0xbb5   : > { %4372 = vmatmul.mubr.msk.f32.vlgmr.msra.gmra.mxu0 %vm1281_vm2, %v7518_v26 }
 0xbb6   : > { %4594 = vmatpush3.msra.mxu0 %v5032_v28 }
 0xbb7   : > { %4595 = vmatprep.subr.mxu0 %v5033_v31 }
 0xbb8   : > { %4596 = vmatpush3.msra.mxu0 %v5034_v34 }
 0xbb9   : > { %4597 = vmatprep.subr.mxu0 %v5035_v36 }
 0xbba   : > { %4598 = vmatpush3.msra.mxu0 %v5036_v38 }
 0xbbb   : > { %4599 = vmatprep.subr.mxu0 %v5037_v41 }
 0xbbc   : > { %4600 = vmatpush3.msra.mxu0 %v5038_v42 }
 0xbbd   : > { %4601 = vmatprep.subr.mxu0 %v5039_v45 }
 0xbbe   : > { %4602 = vmatpush3.msra.mxu0 %v5040_v46 }
 0xbbf   : > { %4603 = vmatprep.subr.mxu0 %v5041_v47 }
 0xbc0   : > { %4604 = vmatpush3.msra.mxu0 %v5042_v48 }
 0xbc1   : > { %4605 = vmatprep.subr.mxu0 %v5043_v49 }
 0xbc2   : > { %4606 = vmatpush3.msra.mxu0 %v5044_v23 }
 0xbc3   : > { %4607 = vmatprep.subr.mxu0 %v5045_v60 }
 0xbc4   : > { %4608 = vmatpush3.msra.mxu0 %v5046_v25 }
 0xbc5   : > { %4609 = vmatprep.subr.mxu0 %v5047_v27 }
 0xbc6   : > { %4610 = vmatpush3.msra.mxu0 %v5048_v29 }
 0xbc7   : > { %4611 = vmatprep.subr.mxu0 %v5049_v32 }
 0xbc8   : > { %4612 = vmatpush3.msra.mxu0 %v5050_v44 }
 0xbc9   : > { %4613 = vmatprep.subr.mxu0 %v5051_v11 }
 0xbca   : > { %4614 = vmatpush3.msra.mxu0 %v5052_v35 }
 0xbcb   : > { %4615 = vmatprep.subr.mxu0 %v5053_v51 }
 0xbcc   : > { %4616 = vmatpush3.msra.mxu0 %v5054_v62 }
 0xbcd   : > { %v3306_v61 = vpop.f32.mrf.mxu1  ;;  %4617 = vmatprep.subr.mxu0 %v5055_v53 }
 0xbce   : > { %v3307_v57 = vadd.f32 %v3306_v61, %v7515_v37  ;;  %4618 = vmatpush3.msra.mxu0 %v5056_v43 }
 0xbcf   : > { %v3308_v9 = vpop.f32.mrf.mxu1  ;;  %4619 = vmatprep.subr.mxu0 %v5057_v14 }
 0xbd0   : > { %v3309_v59 = vadd.f32 %v3308_v9, %v7515_v37  ;;  %4620 = vmatpush3.msra.mxu0 %v5058_v2  ;;  %v3384_v0 = vmul.f32 0.01, %v3307_v57  ;;  %vm3381_vm14 = vcmp.ge.f32.partialorder %v3307_v57, 0.0 }
 0xbd1   : > { %4621 = vmatprep.subr.mxu0 %v5059_v7 }
 0xbd2   : > { %v3385_v40 = vmul.f32 0.01, %v3309_v59  ;;  %4622 = vmatpush3.msra.mxu0 %v5060_v63  ;;  %vm3382_vm12 = vcmp.ge.f32.partialorder %v3309_v59, 0.0  ;;  %v3387_v6 = vsel %vm3381_vm14, %v3307_v57, %v3384_v0  ;;  %v3970_v63 = vld [vmem:[%s7999_s18 + $0xf8] sm:$0xff] }
 0xbd3   : > { %4623 = vmatprep.subr.mxu0 %v5061_v3  ;;  %v3969_v3 = vld [vmem:[%s7999_s18 + $0xf0] sm:$0xff] }
 0xbd4   : > { %4624 = vmatpush3.msra.mxu0 %v5062_v4  ;;  %v3388_v5 = vsel %vm3382_vm12, %v3309_v59, %v3385_v40  ;;  %v3675_v40 = vld [vmem:[#allocation12] sm:$0x1]  ;;  %v3968_v4 = vld [vmem:[%s7999_s18 + $0xe8] sm:$0xff] }
 0xbd5   : > { %3457 = vmatprep.mubr.f32.mxu1 %v3388_v5  ;;  %3599 = vmatprep.mubr.f32.mxu0 %v3388_v5  ;;  %v3967_v5 = vld [vmem:[%s7999_s18 + $0xe0] sm:$0xff] }
 0xbd6   : > { %4770 = vmatprep.subr.mxu0 %v8171_v54  ;;  %3458 = vmatmul.mubr.f32.vlgmr.msra.gmra.mxu1 %v3387_v6 }
 0xbd7   : > { %3600 = vmatmul.mubr.f32.vlgmr.msra.gmra.mxu0 %v3387_v6  ;;  %4799 = vmatprep.mubr.msk.f32.mxu1 %vm8264_vm15, %v8171_v54  ;;  %v3966_v6 = vld [vmem:[%s7999_s18 + $0xd8] sm:$0xff] }
 0xbd8   : > { %4771 = vmatpush3.msk.msra.mxu0 %vm1285_vm0, %v5063_v8  ;;  %4778 = vmatprep.mubr.msk.f32.mxu0 %vm8264_vm15, %v8171_v54  ;;  %v3965_v8 = vld [vmem:[%s7999_s18 + $0xd0] sm:$0xff] }
 0xbd9   : > { %4772 = vmatprep.subr.mxu0 %v8171_v54 }
 0xbda   : > { %4773 = vmatpush3.msra.mxu0 %v5064_v12  ;;  %v3963_v12 = vld [vmem:[%s7999_s18 + $0xc0] sm:$0xff] }
 0xbdb   : > { %4774 = vmatprep.subr.mxu0 %v8171_v54 }
 0xbdc   : > { %4775 = vmatpush3.msra.mxu0 %v5065_v13  ;;  %v3962_v13 = vld [vmem:[%s7999_s18 + $0xb8] sm:$0xff] }
 0xbdd   : > { %4776 = vmatprep.subr.mxu0 %v8171_v54 }
 0xbde   : > { %4777 = vmatpush3.msra.mxu0 %v5066_v16  ;;  %v3961_v16 = vld [vmem:[%s7999_s18 + $0xb0] sm:$0xff] }
 0xbdf   : > { %4779 = vmatmul.mubr.msk.f32.vlgmr.msra.gmra.mxu0 %vm1281_vm2, %v7518_v26 }
 0xbe0   : > { %3844 = vmatprep.mubr.f32.mxu0 %v8171_v54 }
 0xc75   : > { %v3530_v30 = vpop.f32.mrf.mxu0 }
 0xc77   : > { %v3532_v55 = vpop.f32.mrf.mxu0 }
 0xc96   : > { %v3459_v18 = vpop.f32.mrf.mxu1 }
 0xc97   : > { %v7641_v21 = vadd.f32 %v3530_v30, %v3459_v18  ;;  %v4625_v10 = vpop.f32.mrf.mxu0  ;;  %v3960_v30 = vld [vmem:[%s7999_s18 + $0xa8] sm:$0xff]  ;;  %v3959_v18 = vld [vmem:[%s7999_s18 + $0xa0] sm:$0xff] }
 0xc98   : > { %v3461_v15 = vpop.f32.mrf.mxu1 }
 0xc99   : > { %3746 = vrot.lane.b32.xlu0 %v7641_v21, %s8164_s29  ;;  %3757 = vrot.lane.b32.xlu1 %v7641_v21, %s8169_s27  ;;  %v4626_v52 = vpop.f32.mrf.mxu0  ;;  %v7655_v33 = vadd.f32 %v3532_v55, %v3461_v15  ;;  %v3958_v55 = vld [vmem:[%s7999_s18 + $0x98] sm:$0xff]  ;;  %v3953_v15 = vld [vmem:[%s7999_s18 + $0x70] sm:$0xff] }
 0xc9a   : > { %v4627_v19 = vadd.f32 %v4626_v52, %v4625_v10  ;;  %v3956_v10 = vld [vmem:[%s7999_s18 + $0x88] sm:$0xff]  ;;  %v3955_v52 = vld [vmem:[%s7999_s18 + $0x80] sm:$0xff] }
 0xc9d   : > { %3724 = vrot.lane.b32.xlu0 %v7641_v21, %s8155_s2  ;;  %3735 = vrot.lane.b32.xlu1 %v7641_v21, %s8256_s6 }
 0xc9f   : > { %v3671_v58 = vpop.f32.mrf.mxu0 }
 0xca0   : > { %v7673_v1 = vadd.f32 %v4627_v19, %v3671_v58  ;;  %v3954_v58 = vld [vmem:[%s7999_s18 + $0x78] sm:$0xff] }
 0xca1   : > { %v4780_v56 = vpop.f32.mrf.mxu0  ;;  %3702 = vrot.lane.b32.xlu0 %v7641_v21, %s8257_s0  ;;  %3713 = vrot.lane.b32.xlu1 %v7641_v21, %s8258_s20  ;;  %v3950_v19 = vld [vmem:[%s7999_s18 + $0x58] sm:$0xff] }
 0xca2   : > { %v3952_v56 = vld [vmem:[%s7999_s18 + $0x68] sm:$0xff] }
 0xca5   : > { %3691 = vrot.lane.b32.xlu1 %v7641_v21, %s8259_s3  ;;  %3748 = vrot.lane.b32.xlu0 %v7655_v33, %s8164_s29 }
 0xca9   : > { %3726 = vrot.lane.b32.xlu0 %v7655_v33, %s8155_s2  ;;  %3759 = vrot.lane.b32.xlu1 %v7655_v33, %s8169_s27 }
 0xcad   : > { %3704 = vrot.lane.b32.xlu0 %v7655_v33, %s8257_s0  ;;  %3737 = vrot.lane.b32.xlu1 %v7655_v33, %s8256_s6 }
 0xcb1   : > { %3682 = vrot.lane.b32.xlu0 %v7655_v33, %s8196_s5  ;;  %3715 = vrot.lane.b32.xlu1 %v7655_v33, %s8258_s20 }
 0xcb5   : > { %3761 = vrot.lane.b32.xlu0 %v7673_v1, %s8169_s27  ;;  %3693 = vrot.lane.b32.xlu1 %v7655_v33, %s8259_s3  ;;  %s4385_s27 = sshll.u32 %s5461_s17, 5  ;;  %s5227_s17 = sshll.u32 %s5336_s8, 4  ;;  %s5228_s17 = int_to_ptr.vmem [resolvable:$false] %s5227_s17 }
 0xcb6   : > { %s5229_s1 = scalar_lea.vmem %s5228_s17, 64 }
 0xcb9   : > { %3739 = vrot.lane.b32.xlu0 %v7673_v1, %s8256_s6  ;;  %3750 = vrot.lane.b32.xlu1 %v7673_v1, %s8164_s29 }
 0xcbd   : > { %3717 = vrot.lane.b32.xlu0 %v7673_v1, %s8258_s20  ;;  %3728 = vrot.lane.b32.xlu1 %v7673_v1, %s8155_s2  ;;  %s675_s2 = sand.u32 1, %s5291_s21  }
 0xcbe   : > { %s4335_s29 = sshll.u32 %s675_s2, 1  ;;  %s4186_s10 = scalar_lea.sflag [#allocation5], %s675_s2 }
 0xcc1   : > { %3695 = vrot.lane.b32.xlu0 %v7673_v1, %s8259_s3  ;;  %3706 = vrot.lane.b32.xlu1 %v7673_v1, %s8257_s0  ;;  %s4198_s3 = scalar_lea.hbm %s8000_s19, %s4385_s27 }
 0xcc5   : > { %3680 = vrot.lane.b32.xlu0 %v7641_v21, %s8196_s5  ;;  %3684 = vrot.lane.b32.xlu1 %v7673_v1, %s8196_s5  ;;  %s677_s5 = scalar_lea.vmem [#allocation14], %s4335_s29 }
 0xcc6   : > { %s4200_s6 = sshll.u32 %s677_s5, 4  ;;  %s4201_s6 = int_to_ptr.vmem [resolvable:$true] %s4200_s6 }
 0xcc7   : > { %s5223_s11 = scalar_lea.vmem %s4201_s6, 32  ;;  %p5230_p10 = scmp.lt.s32.totalorder %s4201_s6, %s5228_s17 }
 0xcc8   : > { %p5224_p9 = scmp.ne.s32.totalorder %s4201_s6, %s5223_s11  ;;  %p5231_p3 = scmp.lt.s32.totalorder %s5229_s1, %s5223_s11 }
 0xcc9   : > { %3770 = vperm.xlu1 %4940, %v3676_v50   ;;  %v3948_v50 = vld [vmem:[%s7999_s18 + $0x48] sm:$0xff] }
 0xcca   : > { %p5225_p5 = pnand %p5224_p9, %p8270_p2  ;;  %p5232_p13 = por %p5231_p3, %p5230_p10 }
 0xccc   : > { %p5226_p6 = pneg %p5225_p5 }
 0xcce   : > { %p5233_p4 = pnand %p5232_p13, %p5226_p6 }
 0xd0b   : > { %v3747_v17 = vpop.permute.xlu0 %3746  ;;  %v3758_v37 = vpop.permute.xlu1 %3757 }
 0xd0f   : > { %v3725_v39 = vpop.permute.xlu0 %3724  ;;  %v3736_v20 = vpop.permute.xlu1 %3735 }
 0xd13   : > { %v3703_v22 = vpop.permute.xlu0 %3702  ;;  %v3714_v24 = vpop.permute.xlu1 %3713 }
 0xd17   : > { %v3692_v26 = vpop.permute.xlu1 %3691  ;;  %v3749_v28 = vpop.permute.xlu0 %3748 }
 0xd18   : > { %v3752_v25 = vsel %vm1122_vm9, %v3747_v17, %v3749_v28  ;;  %v3947_v17 = vld [vmem:[%s7999_s18 + $0x40] sm:$0xff] }
 0xd1b   : > { %v3727_v31 = vpop.permute.xlu0 %3726  ;;  %v3760_v34 = vpop.permute.xlu1 %3759 }
 0xd1c   : > { %v3763_v48 = vsel %vm1147_vm10, %v3758_v37, %v3760_v34  ;;  %v3730_v35 = vsel %vm1072_vm7, %v3725_v39, %v3727_v31  ;;  %v3946_v37 = vld [vmem:[%s7999_s18 + $0x38] sm:$0xff]  ;;  %v3945_v39 = vld [vmem:[%s7999_s18 + $0x30] sm:$0xff] }
 0xd1f   : > { %v3705_v36 = vpop.permute.xlu0 %3704  ;;  %v3738_v38 = vpop.permute.xlu1 %3737 }
 0xd20   : > { %v3741_v29 = vsel %vm1097_vm8, %v3736_v20, %v3738_v38  ;;  %v3708_v43 = vsel %vm1022_vm5, %v3703_v22, %v3705_v36  ;;  %v3944_v20 = vld [vmem:[%s7999_s18 + $0x28] sm:$0xff]  ;;  %v3943_v22 = vld [vmem:[%s7999_s18 + $0x20] sm:$0xff] }
 0xd23   : > { %v3683_v41 = vpop.permute.xlu0 %3682  ;;  %v3716_v42 = vpop.permute.xlu1 %3715 }
 0xd24   : > { %v3719_v62 = vsel %vm1047_vm6, %v3714_v24, %v3716_v42  ;;  %v3942_v24 = vld [vmem:[%s7999_s18 + $0x18] sm:$0xff] }
 0xd27   : > { %v3762_v45 = vpop.permute.xlu0 %3761  ;;  %v3694_v46 = vpop.permute.xlu1 %3693 }
 0xd28   : > { %4782 = vmatpush3.msra.mxu1 %v3762_v45  ;;  %v3764_v47 = vsel %vm1147_vm10, %v3760_v34, %v3762_v45  ;;  %v3697_v14 = vsel %vm997_vm4, %v3692_v26, %v3694_v46  ;;  %v3941_v26 = vld [vmem:[%s7999_s18 + $0x10] sm:$0xff]  ;;  %v4002_v34 = vld [vmem:[%s7999_s18 + $0x1f8] sm:$0xff] }
 0xd29   : > { %3794 = vmatprep.subr.mxu0 %v3764_v47  ;;  %4783 = vmatprep.subr.mxu1 %v8171_v54  ;;  %v3997_v45 = vld [vmem:[%s7999_s18 + $0x1d0] sm:$0xff]  ;;  %v3995_v47 = vld [vmem:[%s7999_s18 + $0x1c0] sm:$0xff] }
 0xd2a   : > { %3795 = vmatpush1.msra.mxu0 %v3763_v48  ;;  %v3994_v48 = vld [vmem:[%s7999_s18 + $0x1b8] sm:$0xff] }
 0xd2b   : > { %v3740_v49 = vpop.permute.xlu0 %3739  ;;  %v3751_v23 = vpop.permute.xlu1 %3750 }
 0xd2c   : > { %4784 = vmatpush3.msra.mxu1 %v3751_v23  ;;  %v3753_v60 = vsel %vm1122_vm9, %v3749_v28, %v3751_v23  ;;  %v3742_v27 = vsel %vm1097_vm8, %v3738_v38, %v3740_v49  ;;  %v3940_v28 = vld [vmem:[%s7999_s18 + $0x8] sm:$0xff] }
 0xd2d   : > { %3796 = vmatprep.subr.mxu0 %v3753_v60  ;;  %4785 = vmatprep.subr.mxu1 %v8171_v54  ;;  %v4000_v38 = vld [vmem:[%s7999_s18 + $0x1e8] sm:$0xff]  ;;  %v3991_v60 = vld [vmem:[%s7999_s18 + $0x1a0] sm:$0xff] }
 0xd2e   : > { %3797 = vmatpush1.msra.mxu0 %v3752_v25  ;;  %4786 = vmatpush3.msra.mxu1 %v3740_v49  ;;  %v3993_v49 = vld [vmem:[%s7999_s18 + $0x1b0] sm:$0xff]  ;;  %v3992_v23 = vld [vmem:[%s7999_s18 + $0x1a8] sm:$0xff]  ;;  %v3990_v25 = vld [vmem:[%s7999_s18 + $0x198] sm:$0xff] }
 0xd2f   : > { %v3718_v32 = vpop.permute.xlu0 %3717  ;;  %3798 = vmatprep.subr.mxu0 %v3742_v27  ;;  %4787 = vmatprep.subr.mxu1 %v8171_v54  ;;  %v3729_v44 = vpop.permute.xlu1 %3728  ;;  %v3989_v27 = vld [vmem:[%s7999_s18 + $0x190] sm:$0xff] }
 0xd30   : > { %3799 = vmatpush1.msra.mxu0 %v3741_v29  ;;  %4788 = vmatpush3.msra.mxu1 %v3729_v44  ;;  %v3731_v11 = vsel %vm1072_vm7, %v3727_v31, %v3729_v44  ;;  %v3720_v51 = vsel %vm1047_vm6, %v3716_v42, %v3718_v32  ;;  %v3939_v31 = vld [vmem:[%s7999_s18] sm:$0xff]  ;;  %v3998_v42 = vld [vmem:[%s7999_s18 + $0x1d8] sm:$0xff]  ;;  %v3988_v29 = vld [vmem:[%s7999_s18 + $0x188] sm:$0xff] }
 0xd31   : > { %3800 = vmatprep.subr.mxu0 %v3731_v11  ;;  %4789 = vmatprep.subr.mxu1 %v8171_v54  ;;  %v3986_v44 = vld [vmem:[%s7999_s18 + $0x178] sm:$0xff]  ;;  %v3985_v11 = vld [vmem:[%s7999_s18 + $0x170] sm:$0xff] }
 0xd32   : > { %3801 = vmatpush1.msra.mxu0 %v3730_v35  ;;  %4790 = vmatpush3.msra.mxu1 %v3718_v32  ;;  %v3987_v32 = vld [vmem:[%s7999_s18 + $0x180] sm:$0xff]  ;;  %v3984_v35 = vld [vmem:[%s7999_s18 + $0x168] sm:$0xff] }
 0xd33   : > { %v3696_v61 = vpop.permute.xlu0 %3695  ;;  %3802 = vmatprep.subr.mxu0 %v3720_v51  ;;  %4791 = vmatprep.subr.mxu1 %v8171_v54  ;;  %v3707_v53 = vpop.permute.xlu1 %3706  ;;  %v4010_v51 = vld [vmem:[%s7999_s18 + $0x238] sm:$0x3f] }
 0xd34   : > { %3803 = vmatpush1.msra.mxu0 %v3719_v62  ;;  %4792 = vmatpush3.msra.mxu1 %v3707_v53  ;;  %v3709_v57 = vsel %vm1022_vm5, %v3705_v36, %v3707_v53  ;;  %v3698_v9 = vsel %vm997_vm4, %v3694_v46, %v3696_v61  ;;  %vm8265_vm4 = vcmask 588800   ;;  %v4001_v36 = vld [vmem:[%s7999_s18 + $0x1f0] sm:$0xff]  ;;  %v3996_v46 = vld [vmem:[%s7999_s18 + $0x1c8] sm:$0xff]  ;;  %v3983_v62 = vld [vmem:[%s7999_s18 + $0x160] sm:$0xff] }
 0xd35   : > { %3804 = vmatprep.subr.mxu0 %v3709_v57  ;;  %4793 = vmatprep.subr.mxu1 %v8171_v54  ;;  %v3982_v53 = vld [vmem:[%s7999_s18 + $0x158] sm:$0xff]  ;;  %v4008_v57 = vld [vmem:[%s7999_s18 + $0x228] sm:$0xff] }
 0xd36   : > { %3805 = vmatpush1.msra.mxu0 %v3708_v43  ;;  %4794 = vmatpush3.msra.mxu1 %v3696_v61  ;;  %v4009_v61 = vld [vmem:[%s7999_s18 + $0x230] sm:$0x3f]  ;;  %v4007_v43 = vld [vmem:[%s7999_s18 + $0x220] sm:$0xff] }
 0xd37   : > { %v3681_v59 = vpop.permute.xlu0 %3680  ;;  %3806 = vmatprep.subr.mxu0 %v3698_v9  ;;  %4795 = vmatprep.subr.mxu1 %v8171_v54  ;;  %v3685_v2 = vpop.permute.xlu1 %3684  ;;  %v3981_v9 = vld [vmem:[%s7999_s18 + $0x150] sm:$0xff] }
 0xd38   : > { %v3686_v0 = vsel %vm972_vm3, %v3681_v59, %v3683_v41  ;;  %3807 = vmatpush1.msra.mxu0 %v3697_v14  ;;  %4796 = vmatpush3.msra.mxu1 %v3685_v2  ;;  %v3687_v7 = vsel %vm972_vm3, %v3683_v41, %v3685_v2  ;;  %vm8266_vm3 = vmmov %vm8265_vm4  ;;  %v3999_v41 = vld [vmem:[%s7999_s18 + $0x1e0] sm:$0xff]  ;;  %v4006_v14 = vld [vmem:[%s7999_s18 + $0x218] sm:$0xff] }
 0xd39   : > { %3808 = vmatprep.subr.mxu0 %v3687_v7  ;;  %4797 = vmatprep.subr.mxu1 %v8171_v54  ;;  %v3980_v59 = vld [vmem:[%s7999_s18 + $0x148] sm:$0xff]  ;;  %v4005_v2 = vld [vmem:[%s7999_s18 + $0x210] sm:$0xff]  ;;  %v3979_v7 = vld [vmem:[%s7999_s18 + $0x140] sm:$0xff] }
 0xd3a   : > { %3809 = vmatpush1.msra.mxu0 %v3686_v0  ;;  %4798 = vmatpush3.msra.mxu1 %v7673_v1  ;;  %v3949_v1 = vld [vmem:[%s7999_s18 + $0x50] sm:$0xff]  ;;  %v4004_v0 = vld [vmem:[%s7999_s18 + $0x208] sm:$0xff] }
 0xd3b   : > { %3810 = vmatprep.subr.mxu0 %v7655_v33  ;;  %4800 = vmatmul.mubr.msk.f32.vlgmr.msra.gmra.mxu1 %vm8265_vm4, %v3675_v40  ;;  %v3951_v33 = vld [vmem:[%s7999_s18 + $0x60] sm:$0xff] }
 0xd3c   : > { %3811 = vmatpush1.msra.mxu0 %v7641_v21  ;;  %4155 = vmatprep.mubr.f32.mxu1 %v8171_v54  ;;  %v3964_v54 = vld [vmem:[%s7999_s18 + $0xc8] sm:$0xff]  ;;  %v3957_v21 = vld [vmem:[%s7999_s18 + $0x90] sm:$0xff] }
 0xd3d   : > { %4375 = vmatmul.mubr.msk.f32.vlgmr.msra.gmra.mxu0 %vm8266_vm3, %v3675_v40  ;;  %4020 = vmatprep.subr.mxu0 %v3970_v63  ;;  %v4003_v40 = vld [vmem:[%s7999_s18 + $0x200] sm:$0xff]  ;;  %v3978_v63 = vld [vmem:[%s7999_s18 + $0x138] sm:$0xff] }
 0xd3e   : > { %4021 = vmatpush1.msra.mxu0 %v3969_v3  ;;  %4377 = vmatprep.subr.msk.mxu1 %vm1285_vm0, %v4010_v51  ;;  %v3977_v3 = vld [vmem:[%s7999_s18 + $0x130] sm:$0xff] }
 0xd3f   : > { %4022 = vmatprep.subr.mxu0 %v3968_v4  ;;  %4378 = vmatpush1.msk.msra.mxu1 %vm1285_vm0, %v4009_v61  ;;  %v3976_v4 = vld [vmem:[%s7999_s18 + $0x128] sm:$0xff] }
 0xd40   : > { %4023 = vmatpush1.msra.mxu0 %v3967_v5  ;;  %4117 = vmatprep.subr.mxu1 %v4008_v57  ;;  %v3975_v5 = vld [vmem:[%s7999_s18 + $0x120] sm:$0xff] }
 0xd41   : > { %4024 = vmatprep.subr.mxu0 %v3966_v6  ;;  %4118 = vmatpush1.msra.mxu1 %v4007_v43  ;;  %v3974_v6 = vld [vmem:[%s7999_s18 + $0x118] sm:$0xff] }
 0xd42   : > { %4025 = vmatpush1.msra.mxu0 %v3965_v8  ;;  %4119 = vmatprep.subr.mxu1 %v4006_v14  ;;  %v3973_v8 = vld [vmem:[%s7999_s18 + $0x110] sm:$0xff] }
 0xd43   : > { %4026 = vmatprep.subr.mxu0 %v3964_v54  ;;  %4120 = vmatpush1.msra.mxu1 %v4005_v2  ;;  %v3972_v54 = vld [vmem:[%s7999_s18 + $0x108] sm:$0xff] }
 0xd44   : > { %4027 = vmatpush1.msra.mxu0 %v3963_v12  ;;  %4121 = vmatprep.subr.mxu1 %v4004_v0  ;;  %v3971_v12 = vld [vmem:[%s7999_s18 + $0x100] sm:$0xff] }
 0xd45   : > { %4028 = vmatprep.subr.mxu0 %v3962_v13  ;;  %4122 = vmatpush1.msra.mxu1 %v4003_v40  ;;  %v3771_v13 = vpop.permute.xlu1 %3770 }
 0xd46   : > { %4029 = vmatpush1.msra.mxu0 %v3961_v16  ;;  %v8267_v16 = vld [vmem:[#allocation26_spill] sm:$0xff] }
 0xd47   : > { %4030 = vmatprep.subr.mxu0 %v3960_v30  ;;  %v3776_v30 = vrot.slane %v3771_v13, %v8267_v16 }
 0xd48   : > { %4031 = vmatpush1.msra.mxu0 %v3959_v18 }
 0xd49   : > { %4032 = vmatprep.subr.mxu0 %v3958_v55 }
 0xd4a   : > { %4033 = vmatpush1.msra.mxu0 %v3957_v21 }
 0xd4b   : > { %4034 = vmatprep.subr.mxu0 %v3956_v10 }
 0xd4c   : > { %4035 = vmatpush1.msra.mxu0 %v3955_v52 }
 0xd4d   : > { %4036 = vmatprep.subr.mxu0 %v3954_v58 }
 0xd4e   : > { %4037 = vmatpush1.msra.mxu0 %v3953_v15 }
 0xd4f   : > { %4038 = vmatprep.subr.mxu0 %v3952_v56 }
 0xd50   : > { %4039 = vmatpush1.msra.mxu0 %v3951_v33 }
 0xd51   : > { %4040 = vmatprep.subr.mxu0 %v3950_v19 }
 0xd52   : > { %4041 = vmatpush1.msra.mxu0 %v3949_v1 }
 0xd53   : > { %4042 = vmatprep.subr.mxu0 %v3948_v50 }
 0xd54   : > { %4043 = vmatpush1.msra.mxu0 %v3947_v17 }
 0xd55   : > { %4044 = vmatprep.subr.mxu0 %v3946_v37 }
 0xd56   : > { %4045 = vmatpush1.msra.mxu0 %v3945_v39 }
 0xd57   : > { %4046 = vmatprep.subr.mxu0 %v3944_v20 }
 0xd58   : > { %4047 = vmatpush1.msra.mxu0 %v3943_v22 }
 0xd59   : > { %4048 = vmatprep.subr.mxu0 %v3942_v24 }
 0xd5a   : > { %4049 = vmatpush1.msra.mxu0 %v3941_v26 }
 0xd5b   : > { %4050 = vmatprep.subr.mxu0 %v3940_v28 }
 0xd5c   : > { %4051 = vmatpush1.msra.mxu0 %v3939_v31 }
 0xd5d   : > { %4052 = vmatprep.subr.mxu0 %v4002_v34 }
 0xd5e   : > { %4053 = vmatpush2.msra.mxu0 %v4001_v36  ;;  %v5335_v36 = vmov 1966171168  }
 0xd5f   : > { %4054 = vmatprep.subr.mxu0 %v4000_v38  ;;  %v4166_v38 = vunpack.c.l.s4 %v5335_v36 }
 0xd60   : > { %4055 = vmatpush2.msra.mxu0 %v3999_v41 }
 0xd61   : > { %4056 = vmatprep.subr.mxu0 %v3998_v42  ;;  %v4167_v42 = vunpack.c.0.s8 %v4166_v38 }
 0xd62   : > { %4057 = vmatpush2.msra.mxu0 %v3997_v45 }
 0xd63   : > { %4058 = vmatprep.subr.mxu0 %v3996_v46 }
 0xd64   : > { %4059 = vmatpush2.msra.mxu0 %v3995_v47 }
 0xd65   : > { %4060 = vmatprep.subr.mxu0 %v3994_v48 }
 0xd66   : > { %4061 = vmatpush2.msra.mxu0 %v3993_v49 }
 0xd67   : > { %4062 = vmatprep.subr.mxu0 %v3992_v23  ;;  %v8268_v23 = vld [vmem:[#allocation25_spill] sm:$0xff] }
 0xd68   : > { %4063 = vmatpush2.msra.mxu0 %v3991_v60  ;;  %v4170_v60 = vsub.s32 %v4167_v42, %v8268_v23 }
 0xd69   : > { %4064 = vmatprep.subr.mxu0 %v3990_v25 }
 0xd6a   : > { %4065 = vmatpush2.msra.mxu0 %v3989_v27 }
 0xd6b   : > { %4066 = vmatprep.subr.mxu0 %v3988_v29  ;;  %v8269_v29 = vlaneseq }
 0xd6c   : > { %4067 = vmatpush2.msra.mxu0 %v3987_v32 }
 0xd6d   : > { %4068 = vmatprep.subr.mxu0 %v3986_v44  ;;  %vm4182_vm0 = vcmp.lt.s32.totalorder %v8269_v29, 256 }
 0xd6e   : > { %4069 = vmatpush2.msra.mxu0 %v3985_v11 }
 0xd6f   : > { %4070 = vmatprep.subr.mxu0 %v3984_v35 }
 0xd70   : > { %4071 = vmatpush2.msra.mxu0 %v3983_v62 }
 0xd71   : > { %4072 = vmatprep.subr.mxu0 %v3982_v53 }
 0xd72   : > { %4073 = vmatpush2.msra.mxu0 %v3981_v9 }
 0xd73   : > { %4074 = vmatprep.subr.mxu0 %v3980_v59 }
 0xd74   : > { %4075 = vmatpush2.msra.mxu0 %v3979_v7 }
 0xd75   : > { %4076 = vmatprep.subr.mxu0 %v3978_v63 }
 0xd76   : > { %4077 = vmatpush2.msra.mxu0 %v3977_v3 }
 0xd77   : > { %4078 = vmatprep.subr.mxu0 %v3976_v4 }
 0xd78   : > { %4079 = vmatpush2.msra.mxu0 %v3975_v5 }
 0xd79   : > { %4080 = vmatprep.subr.mxu0 %v3974_v6 }
 0xd7a   : > { %4081 = vmatpush2.msra.mxu0 %v3973_v8 }
 0xd7b   : > { %4082 = vmatprep.subr.mxu0 %v3972_v54 }
 0xd7c   : > { %4083 = vmatpush2.msra.mxu0 %v3971_v12 }
 0xdfb   : > { %v3917_v18 = vpop.f32.mrf.mxu1 }
 0xdfc   : > { %v3918_v55 = vadd.f32 %v3917_v18, %v3776_v30 }
 0xdfd   : > { %v3846_v21 = vpop.f32.mrf.mxu0  ;;  %v4801_v10 = vpop.f32.mrf.mxu1 }
 0xdfe   : > { %v3923_v52 = vsub.f32 0.0, %v3918_v55  ;;  %v3847_v58 = vadd.f32 %v3846_v21, %v3776_v30 }
 0xdff   : > { %v3848_v15 = vpop.f32.mrf.mxu0 }
 0xe00   : > { %v3928_v56 = vmul.f32 1.442695, %v3923_v52  ;;  %v3921_v33 = vsub.f32 0.0, %v3847_v58  ;;  %v3849_v19 = vadd.f32 %v3848_v15, %v3776_v30 }
 0xe02   : > { %4941 = vpow2.f32 %v3928_v56  ;;  %v3924_v1 = vmul.f32 1.442695, %v3921_v33  ;;  %v3922_v50 = vsub.f32 0.0, %v3849_v19 }
 0xe04   : > { %4943 = vpow2.f32 %v3924_v1  ;;  %v3926_v17 = vmul.f32 1.442695, %v3922_v50 }
 0xe06   : > { %4945 = vpow2.f32 %v3926_v17 }
 0xe0f   : > { %v4942_v37 = vpop.eup %4941 }
 0xe10   : > { %v3932_v39 = vadd.f32 1.0, %v4942_v37 }
 0xe11   : > { %v4944_v20 = vpop.eup %4943 }
 0xe12   : > { %4947 = vrcp.f32 %v3932_v39  ;;  %v3930_v24 = vadd.f32 1.0, %v4944_v20 }
 0xe13   : > { %v4946_v22 = vpop.eup %4945 }
 0xe14   : > { %v3931_v26 = vadd.f32 1.0, %v4946_v22 }
 0xe16   : > { %4949 = vrcp.f32 %v3931_v26 }
 0xe17   : > { %4951 = vrcp.f32 %v3930_v24 }
 0xe1f   : > { %v4948_v28 = vpop.eup %4947 }
 0xe20   : > { %4379 = vmatmul.mubr.msk.f32.vlgmr.msra.gmra.mxu1 %vm1281_vm2, %v4948_v28 }
 0xe23   : > { %v4950_v31 = vpop.eup %4949 }
 0xe24   : > { %v4952_v34 = vpop.eup %4951  ;;  %4084 = vmatprep.mubr.f32.mxu0 %v4950_v31 }
 0xe25   : > { %4085 = vmatmul.mubr.f32.vlgmr.msra.gmra.mxu0 %v4952_v34 }
 0xee0   : > { %v4157_v41 = vpop.f32.mrf.mxu1 }
 0xee2   : > { %v4159_v46 = vpop.f32.mrf.mxu1 }
 0xee5   : > { %v4086_v45 = vpop.f32.mrf.mxu0 }
 0xee6   : > { %v4158_v48 = vadd.f32 %v4157_v41, %v4086_v45 }
 0xee7   : > { %v4088_v47 = vpop.f32.mrf.mxu0 }
 0xee8   : > { %v4160_v49 = vadd.f32 %v4159_v46, %v4088_v47 }
 0xeea   : > { %v4164_v25 = vcombine.low %v4158_v48, %v4160_v49 }
 0xeec   : > { %v4171_v27 = vrot.slane %v4164_v25, %v4170_v60 }
 0xeee   : > { %v4178_v32 = vrot.slane %v4171_v27, %v4170_v60 }
 0xef0   : > { %4184 = vst.msk [vmem:[%s677_s5] sm:$0x3] %vm4182_vm0, %v4178_v32 }
 0xef1   : > { %5236 = shalt.err (!%p5233_p4)
}
 0xef2   : > { %s5237_s30 = scalar_lea.hbm %s4198_s3, 32  ;;  %s5241_s9 = scalar_lea.hbm %s8000_s19, 64 }
 0xef3   : > { %p5238_p7 = scmp.ne.s32.totalorder %s4198_s3, %s5237_s30  ;;  %p5242_p11 = scmp.lt.s32.totalorder %s4198_s3, %s8000_s19 }
 0xef4   : > { %p5243_p0 = scmp.lt.s32.totalorder %s5241_s9, %s5237_s30 }
 0xef5   : > { %p5239_p8 = pnand %p5238_p7, %p8270_p2 }
 0xef6   : > { %p5244_p1 = por %p5243_p0, %p5242_p11 }
 0xef7   : > { %p5240_p12 = pneg %p5239_p8 }
 0xef9   : > { %p5245_p9 = pnand %p5244_p1, %p5240_p12 }
 0xefb   : > { %5248 = shalt.err (!%p5245_p9)
}
 0xefc   : > { %4826 = dma.vmem_to_hbm [thread:$0]  (%p8270_p2), %s4201_s6, 32, %s4198_s3, %s4186_s10  }
 0xefd PF: > { %s8271_s2 = sld [smem:[#allocation20_spill]]  ;;  %p4863_p5 = scmp.ge.s32.totalorder %s5299_s22, 2 }
 0xefe   : > { %s8272_s29 = sld [smem:[#allocation24_spill]] }
 0xf03   : > { %s4212_s27 = sand.u32 1, %s8271_s2  }
 0xf04   : > { %p8273_p6 = scmp.ne.s32.totalorder %s8272_s29, 0  ;;  %s4213_s5 = scalar_lea.sflag [#allocation5], %s4212_s27 }
 0xf06   : > { %p4848_p10 = pnand %p4863_p5, %p8273_p6 }
 0xf08   : > { %p4849_p3 = pneg %p4848_p10 }
 0xf0a   : > { %5282 = dma.done.wait (%p4849_p3), %s4213_s5, 32  }
 0xf0b   : > { %5284 = vsyncadd (%p4849_p3), %s4213_s5, 4294967264  ;;  %s8274_s22 = sld [smem:[#allocation22_spill]]  ;;  %s8277_s20 = smov %s5291_s21 }
 0xf0c   : > { %s8275_s0 = sld [smem:[#allocation21_spill]] }
 0xf0d   : > { %s8276_s1 = sld [smem:[#allocation23_spill]] }
 0xf11   : > { %p35_p13 = scmp.ge.s32.totalorder %s8274_s22, 4  }
 0xf12   : > { %s8278_s21 = smov %s8275_s0 }
 0xf13   :  { %37 = sbr.rel (!%p35_p13) target bundleno = 19 (0x13), region = 156 }
 0xf18   :  { %4218 = vsyncpa [#allocation4], 1 }
 0xf19   :  { %4220 = vsyncpa [#allocation4 + $0x1], 1 }
 0xf1a   :  { %4221 = vsyncpa [#allocation7], 1 }
 0xf1b   :  { %4222 = vsyncpa [#allocation10], 1 }
 0xf1c   :  { %4223 = vsyncpa [#allocation13], 1 }
 0xf1d   :  { %4224 = vsyncpa [#allocation5], 1 }
 0xf1e   :  { %4226 = vsyncpa [#allocation5 + $0x1], 1 }

</bundles_post_ra>
